<compile_context>
chip_gen: v7x
topology: tpu7x:2x2x1
jax: 0.10.0
libtpu: 0.0.40
codegen_flags: <defaults>
</compile_context>

<pallas_src>
import jax
import jax.numpy as jnp
from jax import lax
from jax.experimental import pallas as pl
from jax.experimental.pallas import tpu as pltpu


def _clamp_vmem(nbytes):
    # scoped-VMEM budget: raise above the 16/32 MiB defaults, stay within
    # v7x's 64 MiB physical per TensorCore.
    return int(min(max(nbytes, 32 * 1024 * 1024), 64 * 1024 * 1024))


def _pick_attn_chunk(n, cap=512):
    """Largest chunk <= cap that divides n (multiple of 8 when chunked)."""
    if n <= cap:
        return n
    for c in range(cap, 7, -8):
        if n % c == 0:
            return c
    return n


# ----------------------------------------------------------------------------
# Kernel 1: fused  [center_pc -> encoders -> +z -> 2x(4 cross-attn blocks)
#                   -> residual adds]      one grid step per batch element
# ----------------------------------------------------------------------------
def _make_fused_model_kernel(n_blocks, pc_dim, center_robot_pc):
    nb = n_blocks

    def kernel(rpc_ref, opc_ref, z_ref,
               ew1_ref, eb1_ref, ew2_ref, eb2_ref, ew3_ref, eb3_ref,
               wq_ref, wk_ref, wv_ref, wo_ref,
               w1_ref, b1_ref, w2_ref, b2_ref,
               g1_ref, be1_ref, g2_ref, be2_ref,
               rt_ref, ot_ref, rz_buf, oz_buf):
        bf16 = jnp.bfloat16
        z = z_ref[...]                                            # (1, D) f32

        # ---- per-point shared-MLP encoders (branch 0 = robot, 1 = object) --
        def encode(x, ei):
            # first layer (K = pc_dim = 3) as VPU broadcast-FMAs: avoids both
            # the HBM-side zero-pad of the point cloud and a near-empty MXU
            # matmul.
            w1 = ew1_ref[ei]                                      # (pc_dim, C1) f32
            h = eb1_ref[ei]                                       # (1, C1)
            for c in range(pc_dim):
                h = h + x[:, c:c + 1] * w1[c:c + 1, :]
            h = jnp.maximum(h, 0.0)
            h = jnp.maximum(
                jnp.dot(h.astype(bf16), ew2_ref[ei],
                        preferred_element_type=jnp.float32) + eb2_ref[ei], 0.0)
            return (jnp.dot(h.astype(bf16), ew3_ref[ei],
                            preferred_element_type=jnp.float32) + eb3_ref[ei])

        rpc = rpc_ref[...]                                        # (N, pc_dim)
        if center_robot_pc:
            # cfg.center_pc: robot_pc - robot_pc.mean(dim=1) fused in-kernel
            rpc = rpc - jnp.mean(rpc, axis=0, keepdims=True)
        opc = opc_ref[...]                                        # (M, pc_dim)

        robot_z = encode(rpc, 0) + z                              # (N, D) f32
        object_z = encode(opc, 1) + z                             # (M, D) f32

        # cross-attention targets stay fixed across blocks -> keep them in
        # VMEM scratch so the flash chunk loop can slice them with pl.ds.
        rz_buf[...] = robot_z
        oz_buf[...] = object_z

        D = robot_z.shape[-1]
        inv_sqrt_d = 1.0 / float(D) ** 0.5

        # ---- one transformer branch: nb DCP-style cross-attention blocks ---
        def branch(src0, tgt_ref, w_off):
            n_tgt = tgt_ref.shape[0]
            chunk = _pick_attn_chunk(n_tgt)
            n_chunks = n_tgt // chunk
            ns = src0.shape[0]

            def block_body(bi, src):
                idx = w_off + bi                                  # dynamic weight index
                wq = wq_ref[idx]; wk = wk_ref[idx]
                wv = wv_ref[idx]; wo = wo_ref[idx]
                q = jnp.dot(src.astype(bf16), wq,
                            preferred_element_type=jnp.float32)   # (ns, D)
                qb = q.astype(bf16)

                # flash-style online softmax over the target axis
                def chunk_body(c, carry):
                    m, l, acc = carry
                    start = pl.multiple_of(c * chunk, chunk)
                    t = tgt_ref[pl.ds(start, chunk), :].astype(bf16)
                    k = jnp.dot(t, wk, preferred_element_type=jnp.float32)
                    v = jnp.dot(t, wv, preferred_element_type=jnp.float32)
                    s = lax.dot_general(qb, k.astype(bf16),
                                        (((1,), (1,)), ((), ())),
                                        preferred_element_type=jnp.float32)
                    s = s * inv_sqrt_d                            # (ns, chunk)
                    m_new = jnp.maximum(m, jnp.max(s, axis=-1, keepdims=True))
                    alpha = jnp.exp(m - m_new)
                    p = jnp.exp(s - m_new)
                    l_new = alpha * l + jnp.sum(p, axis=-1, keepdims=True)
                    acc_new = alpha * acc + jnp.dot(
                        p.astype(bf16), v.astype(bf16),
                        preferred_element_type=jnp.float32)
                    return m_new, l_new, acc_new

                m0 = jnp.full((ns, 1), -jnp.inf, jnp.float32)
                l0 = jnp.zeros((ns, 1), jnp.float32)
                a0 = jnp.zeros((ns, D), jnp.float32)
                m, l, acc = lax.fori_loop(0, n_chunks, chunk_body, (m0, l0, a0),
                                          unroll=(n_chunks <= 2))
                attn = acc * pl.reciprocal(l, approx=True)
                a = jnp.dot(attn.astype(bf16), wo,
                            preferred_element_type=jnp.float32)

                x = src + a
                mu = jnp.mean(x, axis=-1, keepdims=True)
                var = jnp.mean((x - mu) ** 2, axis=-1, keepdims=True)
                x = (x - mu) * lax.rsqrt(var + 1e-5) * g1_ref[idx] + be1_ref[idx]
                f = jnp.maximum(
                    jnp.dot(x.astype(bf16), w1_ref[idx],
                            preferred_element_type=jnp.float32) + b1_ref[idx], 0.0)
                f = (jnp.dot(f.astype(bf16), w2_ref[idx],
                             preferred_element_type=jnp.float32) + b2_ref[idx])
                y = x + f
                mu = jnp.mean(y, axis=-1, keepdims=True)
                var = jnp.mean((y - mu) ** 2, axis=-1, keepdims=True)
                return (y - mu) * lax.rsqrt(var + 1e-5) * g2_ref[idx] + be2_ref[idx]

            return lax.fori_loop(0, nb, block_body, src0)

        # robot branch attends to object_z; object branch attends to robot_z.
        src_r = branch(robot_z, oz_buf, 0)
        src_o = branch(object_z, rz_buf, nb)

        # final residual adds folded into the same kernel (bf16 writeback)
        rt_ref[...] = (robot_z + src_r).astype(rt_ref.dtype)      # robot_tf
        ot_ref[...] = (object_z + src_o).astype(ot_ref.dtype)     # object_tf

    return kernel


def fused_embed_transform(params, robot_pc, object_pc, language_emb,
                          center_pc=True):
    B, N, pc_dim = robot_pc.shape
    M = object_pc.shape[1]
    enc, tf = params["enc"], params["tf"]
    D = enc["w3"].shape[-1]
    nb = tf["wq"].shape[0] // 2

    rpc = robot_pc.astype(jnp.float32)
    opc = object_pc.astype(jnp.float32)
    z = language_emb[:, None, :].astype(jnp.float32)              # (B, 1, D)

    weights = [enc["w1"], enc["b1"], enc["w2"], enc["b2"], enc["w3"], enc["b3"],
               tf["wq"], tf["wk"], tf["wv"], tf["wo"],
               tf["w1"], tf["b1"], tf["w2"], tf["b2"],
               tf["g1"], tf["be1"], tf["g2"], tf["be2"]]

    def full(a):
        nd = a.ndim
        return pl.BlockSpec(a.shape, lambda b, _nd=nd: (0,) * _nd)

    in_specs = ([pl.BlockSpec((None, N, pc_dim), lambda b: (b, 0, 0)),
                 pl.BlockSpec((None, M, pc_dim), lambda b: (b, 0, 0)),
                 pl.BlockSpec((None, 1, D), lambda b: (b, 0, 0))]
                + [full(w) for w in weights])
    out_shapes = (jax.ShapeDtypeStruct((B, N, D), jnp.bfloat16),
                  jax.ShapeDtypeStruct((B, M, D), jnp.bfloat16))
    out_specs = (pl.BlockSpec((None, N, D), lambda b: (b, 0, 0)),
                 pl.BlockSpec((None, M, D), lambda b: (b, 0, 0)))

    # VMEM budget: 2x (double-buffered) weights + ~14 live (N+M, D) f32
    # activation-sized buffers + attention chunk temporaries + I/O tiles.
    w_bytes = sum(int(w.size) * w.dtype.itemsize for w in weights)
    act_bytes = 4 * D * (N + M)
    chunk = _pick_attn_chunk(max(N, M))
    attn_bytes = 4 * chunk * (max(N, M) + 2 * D)
    vmem_bytes = _clamp_vmem(2 * w_bytes + 14 * act_bytes + attn_bytes
                             + 4 * (N + M) * (4 * pc_dim + 2 * D))

    return pl.pallas_call(
        _make_fused_model_kernel(nb, pc_dim, center_pc),
        out_shape=out_shapes,
        grid=(B,),
        in_specs=in_specs,
        out_specs=out_specs,
        scratch_shapes=[pltpu.VMEM((N, D), jnp.float32),
                        pltpu.VMEM((M, D), jnp.float32)],
        compiler_params=pltpu.CompilerParams(
            dimension_semantics=("parallel",),
            vmem_limit_bytes=vmem_bytes),
    )(rpc, opc, z, *weights)


# ----------------------------------------------------------------------------
# Kernel 2: pairwise MLPKernel, tiled: dro[b,i,j] = MLP(cat(Phi_A[b,i], Phi_B[b,j]))
#   cat(a,b) @ W1 is split as a @ W1a + b @ W1b (never materializes the
#   (B*N*M, 2D) repeat/cat of the PyTorch reference); the (tn, tm, H)
#   intermediate is bounded per tile instead of O(N*M*H).
# ----------------------------------------------------------------------------
def _pairwise_kernel(a_ref, b_ref, w1a_ref, w1b_ref, b1_ref,
                     w2_ref, b2_ref, w3_ref, b3_ref, o_ref):
    A = a_ref[...]                                                 # (tn, D) bf16
    Bm = b_ref[...]                                                # (tm, D) bf16
    tn, tm = A.shape[0], Bm.shape[0]
    # fold b1 into hA before the broadcast: removes tn*tm*H VPU adds per tile
    hA = (jnp.dot(A, w1a_ref[...], preferred_element_type=jnp.float32)
          + b1_ref[...])                                           # (tn, H)
    hB = jnp.dot(Bm, w1b_ref[...], preferred_element_type=jnp.float32)  # (tm, H)
    H = hA.shape[-1]
    h = jnp.maximum(hA[:, None, :] + hB[None, :, :], 0.0)          # (tn, tm, H)
    # reshape is a layout no-op when tm % 8 == 0 (tm is 128 or the full dim)
    h2 = jnp.maximum(
        jnp.dot(h.reshape(tn * tm, H).astype(jnp.bfloat16), w2_ref[...],
                preferred_element_type=jnp.float32) + b2_ref[...], 0.0)
    H2 = h2.shape[-1]
    # final Linear(H2 -> 1) as a lane reduction against the weight row
    out = jnp.sum(h2.reshape(tn, tm, H2) * w3_ref[...], axis=-1)   # (tn, tm)
    o_ref[...] = out + b3_ref[...]


def dro_pairwise(p, phi_a, phi_b):
    B, N, D = phi_a.shape
    M = phi_b.shape[1]
    H = p["w1a"].shape[-1]
    H2 = p["w2"].shape[-1]

    # lane-dense output tiles (tm=128); tn shrinks with H so the (tn,tm,H) f32
    # and (tn*tm,H2) intermediates fit v7x's 64 MiB VMEM.
    tm_cap = 128
    tn_cap = 128 if H <= 128 else (64 if H <= 256 else 32)
    tn = tn_cap if (N > tn_cap and N % tn_cap == 0) else N
    tm = tm_cap if (M > tm_cap and M % tm_cap == 0) else M
    grid = (B, N // tn, M // tm)

    weights = [p["w1a"], p["w1b"], p["b1"], p["w2"], p["b2"], p["w3"], p["b3"]]

    def full(a):
        nd = a.ndim
        return pl.BlockSpec(a.shape, lambda b, i, j, _nd=nd: (0,) * _nd)

    in_specs = ([pl.BlockSpec((None, tn, D), lambda b, i, j: (b, i, 0)),
                 pl.BlockSpec((None, tm, D), lambda b, i, j: (b, j, 0))]
                + [full(w) for w in weights])

    w_bytes = sum(int(w.size) * w.dtype.itemsize for w in weights)
    tile_bytes = (tn * tm * (4 * H + 2 * H + 4 * H2)   # h f32 + h bf16 + h2 f32
                  + 2 * (tn + tm) * D * 2              # double-buffered bf16 inputs
                  + 2 * tn * tm * 4                    # double-buffered output
                  + (tn + tm) * H * 4)                 # hA / hB
    vmem_bytes = _clamp_vmem(2 * w_bytes + 2 * tile_bytes)

    return pl.pallas_call(
        _pairwise_kernel,
        out_shape=jax.ShapeDtypeStruct((B, N, M), jnp.float32),
        grid=grid,
        in_specs=in_specs,
        out_specs=pl.BlockSpec((None, tn, tm), lambda b, i, j: (b, i, j)),
        compiler_params=pltpu.CompilerParams(
            dimension_semantics=("parallel", "parallel", "parallel"),
            vmem_limit_bytes=vmem_bytes),
    )(phi_a, phi_b, *weights)


# ----------------------------------------------------------------------------
# Parameter init (deterministic, synthetic).  Matmul weights stored bf16,
# biases / LayerNorm params / VPU-path weights stored f32.
# ----------------------------------------------------------------------------
def init_params(key, pc_dim, emb_dim, n_blocks=4):
    keys = iter(jax.random.split(key, 256))

    def dense_w(cin, cout, dtype=jnp.float32):
        bound = 1.0 / float(cin) ** 0.5
        w = jax.random.uniform(next(keys), (cin, cout), jnp.float32,
                               -bound, bound)
        return w.astype(dtype)

    # encoders (branch 0 = robot, 1 = object), stacked on a leading axis
    def enc_branch():
        return (dense_w(pc_dim, 64),                      # f32: VPU first layer
                jnp.zeros((1, 64), jnp.float32),
                dense_w(64, 64, jnp.bfloat16), jnp.zeros((1, 64), jnp.float32),
                dense_w(64, emb_dim, jnp.bfloat16),
                jnp.zeros((1, emb_dim), jnp.float32))

    eb = [enc_branch() for _ in range(2)]
    enc = dict(w1=jnp.stack([b[0] for b in eb]), b1=jnp.stack([b[1] for b in eb]),
               w2=jnp.stack([b[2] for b in eb]), b2=jnp.stack([b[3] for b in eb]),
               w3=jnp.stack([b[4] for b in eb]), b3=jnp.stack([b[5] for b in eb]))

    # transformer blocks: robot branch = indices [0, nb), object = [nb, 2nb)
    D, F = emb_dim, 2 * emb_dim                           # ff_dims = 2 * emb_dim

    def tf_block():
        return dict(wq=dense_w(D, D, jnp.bfloat16), wk=dense_w(D, D, jnp.bfloat16),
                    wv=dense_w(D, D, jnp.bfloat16), wo=dense_w(D, D, jnp.bfloat16),
                    w1=dense_w(D, F, jnp.bfloat16),
                    b1=jnp.zeros((1, F), jnp.float32),
                    w2=dense_w(F, D, jnp.bfloat16),
                    b2=jnp.zeros((1, D), jnp.float32),
                    g1=jnp.ones((1, D), jnp.float32),
                    be1=jnp.zeros((1, D), jnp.float32),
                    g2=jnp.ones((1, D), jnp.float32),
                    be2=jnp.zeros((1, D), jnp.float32))

    blocks = [tf_block() for _ in range(2 * n_blocks)]
    tf = {k: jnp.stack([blk[k] for blk in blocks]) for k in blocks[0]}

    # pairwise MLPKernel: Linear(2D->D) -> ReLU -> Linear(D->D) -> ReLU -> Linear(D->1)
    w1 = dense_w(2 * D, D)
    kern = dict(w1a=w1[:D].astype(jnp.bfloat16), w1b=w1[D:].astype(jnp.bfloat16),
                b1=jnp.zeros((1, D), jnp.float32),
                w2=dense_w(D, D, jnp.bfloat16), b2=jnp.zeros((1, D), jnp.float32),
                w3=jnp.transpose(dense_w(D, 1)),          # (1, D), f32
                b3=jnp.zeros((1, 1), jnp.float32))

    return dict(enc=enc, tf=tf, kernel=kern)


# ----------------------------------------------------------------------------
# Forward pass (mirrors Network_clip_dgcnn_add.forward for the asserted config)
# ----------------------------------------------------------------------------
def forward(params, robot_pc, object_pc, language_emb, center_pc=True):
    robot_tf, object_tf = fused_embed_transform(
        params, robot_pc, object_pc, language_emb, center_pc=center_pc)
    dro = dro_pairwise(params["kernel"], robot_tf, object_tf)     # (B, N, M)
    # use_language=True  ->  z = language_emb, mu = logvar = None
    return {"dro": dro, "mu": None, "logvar": None}


if __name__ == "__main__":
    B, N, PC_DIM, EMB = 2, 16, 3, 32
    key = jax.random.PRNGKey(0)
    k1, k2, k3, kp = jax.random.split(key, 4)
    robot_pc = jax.random.normal(k1, (B, N, PC_DIM), jnp.float32)
    object_pc = jax.random.normal(k2, (B, N, PC_DIM), jnp.float32)
    language_emb = jax.random.normal(k3, (B, EMB), jnp.float32)

    params = init_params(kp, pc_dim=PC_DIM, emb_dim=EMB, n_blocks=4)
    fwd = jax.jit(lambda p, r, o, l: forward(p, r, o, l, center_pc=True))
    outputs = fwd(params, robot_pc, object_pc, language_emb)
    jax.block_until_ready(outputs["dro"])
    assert outputs["dro"].shape == (B, N, N)
    assert bool(jnp.all(jnp.isfinite(outputs["dro"])))
    print("KERNEL_OK")
</pallas_src>

<mosaic_0001>
module attributes {stable_mosaic.version = 11 : i64} {
  func.func @_pairwise_kernel(%arg0: i32, %arg1: i32, %arg2: i32, %arg3: memref<1x16x32xbf16, #tpu.memory_space<vmem>>, %arg4: memref<1x16x32xbf16, #tpu.memory_space<vmem>>, %arg5: memref<32x32xbf16, #tpu.memory_space<vmem>>, %arg6: memref<32x32xbf16, #tpu.memory_space<vmem>>, %arg7: memref<1x32xf32, #tpu.memory_space<vmem>>, %arg8: memref<32x32xbf16, #tpu.memory_space<vmem>>, %arg9: memref<1x32xf32, #tpu.memory_space<vmem>>, %arg10: memref<1x32xf32, #tpu.memory_space<vmem>>, %arg11: memref<1x1xf32, #tpu.memory_space<vmem>>, %arg12: memref<1x16x16xf32, #tpu.memory_space<vmem>>) attributes {dimension_semantics = [#tpu.dimension_semantics<parallel>, #tpu.dimension_semantics<parallel>, #tpu.dimension_semantics<parallel>], iteration_bounds = array<i64: 2, 1, 1>, scalar_prefetch = 0 : i64, scratch_operands = 0 : i64, tpu.core_type = #tpu.core_type<tc>, window_params = [{transform_indices = @transform_0, window_bounds = array<i64: 1, 16, 32>}, {transform_indices = @transform_1, window_bounds = array<i64: 1, 16, 32>}, {pipeline_mode = #tpu.pipeline_mode<synchronous>, transform_indices = @transform_2, window_bounds = array<i64: 32, 32>}, {pipeline_mode = #tpu.pipeline_mode<synchronous>, transform_indices = @transform_3, window_bounds = array<i64: 32, 32>}, {pipeline_mode = #tpu.pipeline_mode<synchronous>, transform_indices = @transform_4, window_bounds = array<i64: 1, 32>}, {pipeline_mode = #tpu.pipeline_mode<synchronous>, transform_indices = @transform_5, window_bounds = array<i64: 32, 32>}, {pipeline_mode = #tpu.pipeline_mode<synchronous>, transform_indices = @transform_6, window_bounds = array<i64: 1, 32>}, {pipeline_mode = #tpu.pipeline_mode<synchronous>, transform_indices = @transform_7, window_bounds = array<i64: 1, 32>}, {pipeline_mode = #tpu.pipeline_mode<synchronous>, transform_indices = @transform_8, window_bounds = array<i64: 1, 1>}, {transform_indices = @transform_9, window_bounds = array<i64: 1, 16, 16>}]} {
    %c0 = arith.constant 0 : index
    %c0_0 = arith.constant 0 : index
    %c0_1 = arith.constant 0 : index
    %0 = vector.load %arg3[%c0, %c0_0, %c0_1] : memref<1x16x32xbf16, #tpu.memory_space<vmem>>, vector<1x16x32xbf16>
    %1 = vector.shape_cast %0 : vector<1x16x32xbf16> to vector<16x32xbf16>
    %c0_2 = arith.constant 0 : index
    %c0_3 = arith.constant 0 : index
    %c0_4 = arith.constant 0 : index
    %2 = vector.load %arg4[%c0_2, %c0_3, %c0_4] : memref<1x16x32xbf16, #tpu.memory_space<vmem>>, vector<1x16x32xbf16>
    %3 = vector.shape_cast %2 : vector<1x16x32xbf16> to vector<16x32xbf16>
    %c0_5 = arith.constant 0 : index
    %c0_6 = arith.constant 0 : index
    %4 = vector.load %arg5[%c0_5, %c0_6] : memref<32x32xbf16, #tpu.memory_space<vmem>>, vector<32x32xbf16>
    %cst = arith.constant dense<0.000000e+00> : vector<16x32xf32>
    %5 = tpu.matmul %1, %4, %cst {dimension_numbers = #tpu.dot_dimension_numbers<[1], [0], [0], [1], [0, 0, 1, 1], [], []>} : vector<16x32xbf16>, vector<32x32xbf16>, vector<16x32xf32> -> vector<16x32xf32>
    %c0_7 = arith.constant 0 : index
    %c0_8 = arith.constant 0 : index
    %6 = vector.load %arg7[%c0_7, %c0_8] : memref<1x32xf32, #tpu.memory_space<vmem>>, vector<1x32xf32>
    %7 = vector.broadcast %6 : vector<1x32xf32> to vector<16x32xf32>
    %8 = arith.addf %5, %7 : vector<16x32xf32>
    %c0_9 = arith.constant 0 : index
    %c0_10 = arith.constant 0 : index
    %9 = vector.load %arg6[%c0_9, %c0_10] : memref<32x32xbf16, #tpu.memory_space<vmem>>, vector<32x32xbf16>
    %cst_11 = arith.constant dense<0.000000e+00> : vector<16x32xf32>
    %10 = tpu.matmul %3, %9, %cst_11 {dimension_numbers = #tpu.dot_dimension_numbers<[1], [0], [0], [1], [0, 0, 1, 1], [], []>} : vector<16x32xbf16>, vector<32x32xbf16>, vector<16x32xf32> -> vector<16x32xf32>
    %11 = vector.shape_cast %8 : vector<16x32xf32> to vector<16x1x32xf32>
    %12 = vector.shape_cast %10 : vector<16x32xf32> to vector<1x16x32xf32>
    %13 = vector.broadcast %11 : vector<16x1x32xf32> to vector<16x16x32xf32>
    %14 = vector.broadcast %12 : vector<1x16x32xf32> to vector<16x16x32xf32>
    %15 = arith.addf %13, %14 : vector<16x16x32xf32>
    %cst_12 = arith.constant 0.000000e+00 : f32
    %16 = vector.broadcast %cst_12 : f32 to vector<16x16x32xf32>
    %17 = arith.maximumf %15, %16 : vector<16x16x32xf32>
    %18 = vector.shape_cast %17 : vector<16x16x32xf32> to vector<256x32xf32>
    %19 = arith.truncf %18 : vector<256x32xf32> to vector<256x32xbf16>
    %c0_13 = arith.constant 0 : index
    %c0_14 = arith.constant 0 : index
    %20 = vector.load %arg8[%c0_13, %c0_14] : memref<32x32xbf16, #tpu.memory_space<vmem>>, vector<32x32xbf16>
    %cst_15 = arith.constant dense<0.000000e+00> : vector<256x32xf32>
    %21 = tpu.matmul %19, %20, %cst_15 {dimension_numbers = #tpu.dot_dimension_numbers<[1], [0], [0], [1], [0, 0, 1, 1], [], []>} : vector<256x32xbf16>, vector<32x32xbf16>, vector<256x32xf32> -> vector<256x32xf32>
    %c0_16 = arith.constant 0 : index
    %c0_17 = arith.constant 0 : index
    %22 = vector.load %arg9[%c0_16, %c0_17] : memref<1x32xf32, #tpu.memory_space<vmem>>, vector<1x32xf32>
    %23 = vector.broadcast %22 : vector<1x32xf32> to vector<256x32xf32>
    %24 = arith.addf %21, %23 : vector<256x32xf32>
    %cst_18 = arith.constant 0.000000e+00 : f32
    %25 = vector.broadcast %cst_18 : f32 to vector<256x32xf32>
    %26 = arith.maximumf %24, %25 : vector<256x32xf32>
    %27 = vector.shape_cast %26 : vector<256x32xf32> to vector<16x16x32xf32>
    %c0_19 = arith.constant 0 : index
    %c0_20 = arith.constant 0 : index
    %28 = vector.load %arg10[%c0_19, %c0_20] : memref<1x32xf32, #tpu.memory_space<vmem>>, vector<1x32xf32>
    %29 = vector.shape_cast %28 : vector<1x32xf32> to vector<1x1x32xf32>
    %30 = vector.broadcast %29 : vector<1x1x32xf32> to vector<16x16x32xf32>
    %31 = arith.mulf %27, %30 : vector<16x16x32xf32>
    %cst_21 = arith.constant dense<0.000000e+00> : vector<16x16xf32>
    %32 = vector.multi_reduction <add>, %31, %cst_21 [2] : vector<16x16x32xf32> to vector<16x16xf32>
    %c0_22 = arith.constant 0 : index
    %c0_23 = arith.constant 0 : index
    %33 = vector.load %arg11[%c0_22, %c0_23] : memref<1x1xf32, #tpu.memory_space<vmem>>, vector<1x1xf32>
    %34 = vector.broadcast %33 : vector<1x1xf32> to vector<16x16xf32>
    %35 = arith.addf %32, %34 : vector<16x16xf32>
    %c0_24 = arith.constant 0 : index
    %c0_25 = arith.constant 0 : index
    %c0_26 = arith.constant 0 : index
    %36 = vector.load %arg12[%c0_24, %c0_25, %c0_26] : memref<1x16x16xf32, #tpu.memory_space<vmem>>, vector<1x16x16xf32>
    %37 = vector.shape_cast %36 : vector<1x16x16xf32> to vector<16x16xf32>
    %38 = vector.shape_cast %35 : vector<16x16xf32> to vector<1x16x16xf32>
    tpu.vector_store %arg12[%c0_24, %c0_25, %c0_26], %38 {strides = array<i32>} : memref<1x16x16xf32, #tpu.memory_space<vmem>>, vector<1x16x16xf32>,
    return
  }
  func.func @transform_0(%arg0: i32, %arg1: i32, %arg2: i32) -> (i32, i32, i32) {
    %c0_i32 = arith.constant 0 : i32
    %c0_i32_0 = arith.constant 0 : i32
    return %arg0, %arg1, %c0_i32 : i32, i32, i32
  }
  func.func @transform_1(%arg0: i32, %arg1: i32, %arg2: i32) -> (i32, i32, i32) {
    %c0_i32 = arith.constant 0 : i32
    %c0_i32_0 = arith.constant 0 : i32
    return %arg0, %arg2, %c0_i32 : i32, i32, i32
  }
  func.func @transform_2(%arg0: i32, %arg1: i32, %arg2: i32) -> (i32, i32) {
    %c0_i32 = arith.constant 0 : i32
    %c0_i32_0 = arith.constant 0 : i32
    %c0_i32_1 = arith.constant 0 : i32
    return %c0_i32, %c0_i32_0 : i32, i32
  }
  func.func @transform_3(%arg0: i32, %arg1: i32, %arg2: i32) -> (i32, i32) {
    %c0_i32 = arith.constant 0 : i32
    %c0_i32_0 = arith.constant 0 : i32
    %c0_i32_1 = arith.constant 0 : i32
    return %c0_i32, %c0_i32_0 : i32, i32
  }
  func.func @transform_4(%arg0: i32, %arg1: i32, %arg2: i32) -> (i32, i32) {
    %c0_i32 = arith.constant 0 : i32
    %c0_i32_0 = arith.constant 0 : i32
    %c0_i32_1 = arith.constant 0 : i32
    return %c0_i32, %c0_i32_0 : i32, i32
  }
  func.func @transform_5(%arg0: i32, %arg1: i32, %arg2: i32) -> (i32, i32) {
    %c0_i32 = arith.constant 0 : i32
    %c0_i32_0 = arith.constant 0 : i32
    %c0_i32_1 = arith.constant 0 : i32
    return %c0_i32, %c0_i32_0 : i32, i32
  }
  func.func @transform_6(%arg0: i32, %arg1: i32, %arg2: i32) -> (i32, i32) {
    %c0_i32 = arith.constant 0 : i32
    %c0_i32_0 = arith.constant 0 : i32
    %c0_i32_1 = arith.constant 0 : i32
    return %c0_i32, %c0_i32_0 : i32, i32
  }
  func.func @transform_7(%arg0: i32, %arg1: i32, %arg2: i32) -> (i32, i32) {
    %c0_i32 = arith.constant 0 : i32
    %c0_i32_0 = arith.constant 0 : i32
    %c0_i32_1 = arith.constant 0 : i32
    return %c0_i32, %c0_i32_0 : i32, i32
  }
  func.func @transform_8(%arg0: i32, %arg1: i32, %arg2: i32) -> (i32, i32) {
    %c0_i32 = arith.constant 0 : i32
    %c0_i32_0 = arith.constant 0 : i32
    %c0_i32_1 = arith.constant 0 : i32
    return %c0_i32, %c0_i32_0 : i32, i32
  }
  func.func @transform_9(%arg0: i32, %arg1: i32, %arg2: i32) -> (i32, i32, i32) {
    %c0_i32 = arith.constant 0 : i32
    return %arg0, %arg1, %arg2 : i32, i32, i32
  }
}

module attributes {stable_mosaic.version = 11 : i64} {
  func.func @kernel(%arg0: i32, %arg1: memref<1x16x3xf32, #tpu.memory_space<vmem>>, %arg2: memref<1x16x3xf32, #tpu.memory_space<vmem>>, %arg3: memref<1x1x32xf32, #tpu.memory_space<vmem>>, %arg4: memref<2x3x64xf32, #tpu.memory_space<vmem>>, %arg5: memref<2x1x64xf32, #tpu.memory_space<vmem>>, %arg6: memref<2x64x64xbf16, #tpu.memory_space<vmem>>, %arg7: memref<2x1x64xf32, #tpu.memory_space<vmem>>, %arg8: memref<2x64x32xbf16, #tpu.memory_space<vmem>>, %arg9: memref<2x1x32xf32, #tpu.memory_space<vmem>>, %arg10: memref<8x32x32xbf16, #tpu.memory_space<vmem>>, %arg11: memref<8x32x32xbf16, #tpu.memory_space<vmem>>, %arg12: memref<8x32x32xbf16, #tpu.memory_space<vmem>>, %arg13: memref<8x32x32xbf16, #tpu.memory_space<vmem>>, %arg14: memref<8x32x64xbf16, #tpu.memory_space<vmem>>, %arg15: memref<8x1x64xf32, #tpu.memory_space<vmem>>, %arg16: memref<8x64x32xbf16, #tpu.memory_space<vmem>>, %arg17: memref<8x1x32xf32, #tpu.memory_space<vmem>>, %arg18: memref<8x1x32xf32, #tpu.memory_space<vmem>>, %arg19: memref<8x1x32xf32, #tpu.memory_space<vmem>>, %arg20: memref<8x1x32xf32, #tpu.memory_space<vmem>>, %arg21: memref<8x1x32xf32, #tpu.memory_space<vmem>>, %arg22: memref<1x16x32xbf16, #tpu.memory_space<vmem>>, %arg23: memref<1x16x32xbf16, #tpu.memory_space<vmem>>, %arg24: memref<16x32xf32, #tpu.memory_space<vmem>>, %arg25: memref<16x32xf32, #tpu.memory_space<vmem>>) attributes {dimension_semantics = [#tpu.dimension_semantics<parallel>], iteration_bounds = array<i64: 2>, scalar_prefetch = 0 : i64, scratch_operands = 2 : i64, tpu.core_type = #tpu.core_type<tc>, window_params = [{transform_indices = @transform_0, window_bounds = array<i64: 1, 16, 3>}, {transform_indices = @transform_1, window_bounds = array<i64: 1, 16, 3>}, {transform_indices = @transform_2, window_bounds = array<i64: 1, 1, 32>}, {pipeline_mode = #tpu.pipeline_mode<synchronous>, transform_indices = @transform_3, window_bounds = array<i64: 2, 3, 64>}, {pipeline_mode = #tpu.pipeline_mode<synchronous>, transform_indices = @transform_4, window_bounds = array<i64: 2, 1, 64>}, {pipeline_mode = #tpu.pipeline_mode<synchronous>, transform_indices = @transform_5, window_bounds = array<i64: 2, 64, 64>}, {pipeline_mode = #tpu.pipeline_mode<synchronous>, transform_indices = @transform_6, window_bounds = array<i64: 2, 1, 64>}, {pipeline_mode = #tpu.pipeline_mode<synchronous>, transform_indices = @transform_7, window_bounds = array<i64: 2, 64, 32>}, {pipeline_mode = #tpu.pipeline_mode<synchronous>, transform_indices = @transform_8, window_bounds = array<i64: 2, 1, 32>}, {pipeline_mode = #tpu.pipeline_mode<synchronous>, transform_indices = @transform_9, window_bounds = array<i64: 8, 32, 32>}, {pipeline_mode = #tpu.pipeline_mode<synchronous>, transform_indices = @transform_10, window_bounds = array<i64: 8, 32, 32>}, {pipeline_mode = #tpu.pipeline_mode<synchronous>, transform_indices = @transform_11, window_bounds = array<i64: 8, 32, 32>}, {pipeline_mode = #tpu.pipeline_mode<synchronous>, transform_indices = @transform_12, window_bounds = array<i64: 8, 32, 32>}, {pipeline_mode = #tpu.pipeline_mode<synchronous>, transform_indices = @transform_13, window_bounds = array<i64: 8, 32, 64>}, {pipeline_mode = #tpu.pipeline_mode<synchronous>, transform_indices = @transform_14, window_bounds = array<i64: 8, 1, 64>}, {pipeline_mode = #tpu.pipeline_mode<synchronous>, transform_indices = @transform_15, window_bounds = array<i64: 8, 64, 32>}, {pipeline_mode = #tpu.pipeline_mode<synchronous>, transform_indices = @transform_16, window_bounds = array<i64: 8, 1, 32>}, {pipeline_mode = #tpu.pipeline_mode<synchronous>, transform_indices = @transform_17, window_bounds = array<i64: 8, 1, 32>}, {pipeline_mode = #tpu.pipeline_mode<synchronous>, transform_indices = @transform_18, window_bounds = array<i64: 8, 1, 32>}, {pipeline_mode = #tpu.pipeline_mode<synchronous>, transform_indices = @transform_19, window_bounds = array<i64: 8, 1, 32>}, {pipeline_mode = #tpu.pipeline_mode<synchronous>, transform_indices = @transform_20, window_bounds = array<i64: 8, 1, 32>}, {transform_indices = @transform_21, window_bounds = array<i64: 1, 16, 32>}, {transform_indices = @transform_22, window_bounds = array<i64: 1, 16, 32>}]} {
    %c0 = arith.constant 0 : index
    %c0_0 = arith.constant 0 : index
    %c0_1 = arith.constant 0 : index
    %0 = vector.load %arg3[%c0, %c0_0, %c0_1] : memref<1x1x32xf32, #tpu.memory_space<vmem>>, vector<1x1x32xf32>
    %1 = vector.shape_cast %0 : vector<1x1x32xf32> to vector<1x32xf32>
    %c0_2 = arith.constant 0 : index
    %c0_3 = arith.constant 0 : index
    %c0_4 = arith.constant 0 : index
    %2 = vector.load %arg1[%c0_2, %c0_3, %c0_4] : memref<1x16x3xf32, #tpu.memory_space<vmem>>, vector<1x16x3xf32>
    %3 = vector.shape_cast %2 : vector<1x16x3xf32> to vector<16x3xf32>
    %cst = arith.constant dense<0.000000e+00> : vector<3xf32>
    %4 = vector.multi_reduction <add>, %3, %cst [0] : vector<16x3xf32> to vector<3xf32>
    %5 = vector.shape_cast %4 : vector<3xf32> to vector<1x3xf32>
    %cst_5 = arith.constant 1.600000e+01 : f32
    %6 = vector.broadcast %cst_5 : f32 to vector<1x3xf32>
    %7 = arith.divf %5, %6 : vector<1x3xf32>
    %8 = vector.broadcast %7 : vector<1x3xf32> to vector<16x3xf32>
    %9 = arith.subf %3, %8 : vector<16x3xf32>
    %c0_6 = arith.constant 0 : index
    %c0_7 = arith.constant 0 : index
    %c0_8 = arith.constant 0 : index
    %10 = vector.load %arg2[%c0_6, %c0_7, %c0_8] : memref<1x16x3xf32, #tpu.memory_space<vmem>>, vector<1x16x3xf32>
    %11 = vector.shape_cast %10 : vector<1x16x3xf32> to vector<16x3xf32>
    %c0_9 = arith.constant 0 : index
    %c0_10 = arith.constant 0 : index
    %c0_11 = arith.constant 0 : index
    %12 = vector.load %arg4[%c0_9, %c0_10, %c0_11] : memref<2x3x64xf32, #tpu.memory_space<vmem>>, vector<1x3x64xf32>
    %13 = vector.shape_cast %12 : vector<1x3x64xf32> to vector<3x64xf32>
    %c0_12 = arith.constant 0 : index
    %c0_13 = arith.constant 0 : index
    %c0_14 = arith.constant 0 : index
    %14 = vector.load %arg5[%c0_12, %c0_13, %c0_14] : memref<2x1x64xf32, #tpu.memory_space<vmem>>, vector<1x1x64xf32>
    %15 = vector.shape_cast %14 : vector<1x1x64xf32> to vector<1x64xf32>
    %16 = vector.extract_strided_slice %9 {offsets = [0, 0], sizes = [16, 1], strides = [1, 1]} : vector<16x3xf32> to vector<16x1xf32>
    %17 = vector.extract_strided_slice %13 {offsets = [0, 0], sizes = [1, 64], strides = [1, 1]} : vector<3x64xf32> to vector<1x64xf32>
    %18 = vector.broadcast %16 : vector<16x1xf32> to vector<16x64xf32>
    %19 = vector.broadcast %17 : vector<1x64xf32> to vector<16x64xf32>
    %20 = arith.mulf %18, %19 : vector<16x64xf32>
    %21 = vector.broadcast %15 : vector<1x64xf32> to vector<16x64xf32>
    %22 = arith.addf %21, %20 : vector<16x64xf32>
    %23 = vector.extract_strided_slice %9 {offsets = [0, 1], sizes = [16, 1], strides = [1, 1]} : vector<16x3xf32> to vector<16x1xf32>
    %24 = vector.extract_strided_slice %13 {offsets = [1, 0], sizes = [1, 64], strides = [1, 1]} : vector<3x64xf32> to vector<1x64xf32>
    %25 = vector.broadcast %23 : vector<16x1xf32> to vector<16x64xf32>
    %26 = vector.broadcast %24 : vector<1x64xf32> to vector<16x64xf32>
    %27 = arith.mulf %25, %26 : vector<16x64xf32>
    %28 = arith.addf %22, %27 : vector<16x64xf32>
    %29 = vector.extract_strided_slice %9 {offsets = [0, 2], sizes = [16, 1], strides = [1, 1]} : vector<16x3xf32> to vector<16x1xf32>
    %30 = vector.extract_strided_slice %13 {offsets = [2, 0], sizes = [1, 64], strides = [1, 1]} : vector<3x64xf32> to vector<1x64xf32>
    %31 = vector.broadcast %29 : vector<16x1xf32> to vector<16x64xf32>
    %32 = vector.broadcast %30 : vector<1x64xf32> to vector<16x64xf32>
    %33 = arith.mulf %31, %32 : vector<16x64xf32>
    %34 = arith.addf %28, %33 : vector<16x64xf32>
    %cst_15 = arith.constant 0.000000e+00 : f32
    %35 = vector.broadcast %cst_15 : f32 to vector<16x64xf32>
    %36 = arith.maximumf %34, %35 : vector<16x64xf32>
    %37 = arith.truncf %36 : vector<16x64xf32> to vector<16x64xbf16>
    %c0_16 = arith.constant 0 : index
    %c0_17 = arith.constant 0 : index
    %c0_18 = arith.constant 0 : index
    %38 = vector.load %arg6[%c0_16, %c0_17, %c0_18] : memref<2x64x64xbf16, #tpu.memory_space<vmem>>, vector<1x64x64xbf16>
    %39 = vector.shape_cast %38 : vector<1x64x64xbf16> to vector<64x64xbf16>
    %cst_19 = arith.constant dense<0.000000e+00> : vector<16x64xf32>
    %40 = tpu.matmul %37, %39, %cst_19 {dimension_numbers = #tpu.dot_dimension_numbers<[1], [0], [0], [1], [0, 0, 1, 1], [], []>} : vector<16x64xbf16>, vector<64x64xbf16>, vector<16x64xf32> -> vector<16x64xf32>
    %c0_20 = arith.constant 0 : index
    %c0_21 = arith.constant 0 : index
    %c0_22 = arith.constant 0 : index
    %41 = vector.load %arg7[%c0_20, %c0_21, %c0_22] : memref<2x1x64xf32, #tpu.memory_space<vmem>>, vector<1x1x64xf32>
    %42 = vector.shape_cast %41 : vector<1x1x64xf32> to vector<1x64xf32>
    %43 = vector.broadcast %42 : vector<1x64xf32> to vector<16x64xf32>
    %44 = arith.addf %40, %43 : vector<16x64xf32>
    %cst_23 = arith.constant 0.000000e+00 : f32
    %45 = vector.broadcast %cst_23 : f32 to vector<16x64xf32>
    %46 = arith.maximumf %44, %45 : vector<16x64xf32>
    %47 = arith.truncf %46 : vector<16x64xf32> to vector<16x64xbf16>
    %c0_24 = arith.constant 0 : index
    %c0_25 = arith.constant 0 : index
    %c0_26 = arith.constant 0 : index
    %48 = vector.load %arg8[%c0_24, %c0_25, %c0_26] : memref<2x64x32xbf16, #tpu.memory_space<vmem>>, vector<1x64x32xbf16>
    %49 = vector.shape_cast %48 : vector<1x64x32xbf16> to vector<64x32xbf16>
    %cst_27 = arith.constant dense<0.000000e+00> : vector<16x32xf32>
    %50 = tpu.matmul %47, %49, %cst_27 {dimension_numbers = #tpu.dot_dimension_numbers<[1], [0], [0], [1], [0, 0, 1, 1], [], []>} : vector<16x64xbf16>, vector<64x32xbf16>, vector<16x32xf32> -> vector<16x32xf32>
    %c0_28 = arith.constant 0 : index
    %c0_29 = arith.constant 0 : index
    %c0_30 = arith.constant 0 : index
    %51 = vector.load %arg9[%c0_28, %c0_29, %c0_30] : memref<2x1x32xf32, #tpu.memory_space<vmem>>, vector<1x1x32xf32>
    %52 = vector.shape_cast %51 : vector<1x1x32xf32> to vector<1x32xf32>
    %53 = vector.broadcast %52 : vector<1x32xf32> to vector<16x32xf32>
    %54 = arith.addf %50, %53 : vector<16x32xf32>
    %55 = vector.broadcast %1 : vector<1x32xf32> to vector<16x32xf32>
    %56 = arith.addf %54, %55 : vector<16x32xf32>
    %c1 = arith.constant 1 : index
    %c0_31 = arith.constant 0 : index
    %c0_32 = arith.constant 0 : index
    %57 = vector.load %arg4[%c1, %c0_31, %c0_32] : memref<2x3x64xf32, #tpu.memory_space<vmem>>, vector<1x3x64xf32>
    %58 = vector.shape_cast %57 : vector<1x3x64xf32> to vector<3x64xf32>
    %c1_33 = arith.constant 1 : index
    %c0_34 = arith.constant 0 : index
    %c0_35 = arith.constant 0 : index
    %59 = vector.load %arg5[%c1_33, %c0_34, %c0_35] : memref<2x1x64xf32, #tpu.memory_space<vmem>>, vector<1x1x64xf32>
    %60 = vector.shape_cast %59 : vector<1x1x64xf32> to vector<1x64xf32>
    %61 = vector.extract_strided_slice %11 {offsets = [0, 0], sizes = [16, 1], strides = [1, 1]} : vector<16x3xf32> to vector<16x1xf32>
    %62 = vector.extract_strided_slice %58 {offsets = [0, 0], sizes = [1, 64], strides = [1, 1]} : vector<3x64xf32> to vector<1x64xf32>
    %63 = vector.broadcast %61 : vector<16x1xf32> to vector<16x64xf32>
    %64 = vector.broadcast %62 : vector<1x64xf32> to vector<16x64xf32>
    %65 = arith.mulf %63, %64 : vector<16x64xf32>
    %66 = vector.broadcast %60 : vector<1x64xf32> to vector<16x64xf32>
    %67 = arith.addf %66, %65 : vector<16x64xf32>
    %68 = vector.extract_strided_slice %11 {offsets = [0, 1], sizes = [16, 1], strides = [1, 1]} : vector<16x3xf32> to vector<16x1xf32>
    %69 = vector.extract_strided_slice %58 {offsets = [1, 0], sizes = [1, 64], strides = [1, 1]} : vector<3x64xf32> to vector<1x64xf32>
    %70 = vector.broadcast %68 : vector<16x1xf32> to vector<16x64xf32>
    %71 = vector.broadcast %69 : vector<1x64xf32> to vector<16x64xf32>
    %72 = arith.mulf %70, %71 : vector<16x64xf32>
    %73 = arith.addf %67, %72 : vector<16x64xf32>
    %74 = vector.extract_strided_slice %11 {offsets = [0, 2], sizes = [16, 1], strides = [1, 1]} : vector<16x3xf32> to vector<16x1xf32>
    %75 = vector.extract_strided_slice %58 {offsets = [2, 0], sizes = [1, 64], strides = [1, 1]} : vector<3x64xf32> to vector<1x64xf32>
    %76 = vector.broadcast %74 : vector<16x1xf32> to vector<16x64xf32>
    %77 = vector.broadcast %75 : vector<1x64xf32> to vector<16x64xf32>
    %78 = arith.mulf %76, %77 : vector<16x64xf32>
    %79 = arith.addf %73, %78 : vector<16x64xf32>
    %cst_36 = arith.constant 0.000000e+00 : f32
    %80 = vector.broadcast %cst_36 : f32 to vector<16x64xf32>
    %81 = arith.maximumf %79, %80 : vector<16x64xf32>
    %82 = arith.truncf %81 : vector<16x64xf32> to vector<16x64xbf16>
    %c1_37 = arith.constant 1 : index
    %c0_38 = arith.constant 0 : index
    %c0_39 = arith.constant 0 : index
    %83 = vector.load %arg6[%c1_37, %c0_38, %c0_39] : memref<2x64x64xbf16, #tpu.memory_space<vmem>>, vector<1x64x64xbf16>
    %84 = vector.shape_cast %83 : vector<1x64x64xbf16> to vector<64x64xbf16>
    %cst_40 = arith.constant dense<0.000000e+00> : vector<16x64xf32>
    %85 = tpu.matmul %82, %84, %cst_40 {dimension_numbers = #tpu.dot_dimension_numbers<[1], [0], [0], [1], [0, 0, 1, 1], [], []>} : vector<16x64xbf16>, vector<64x64xbf16>, vector<16x64xf32> -> vector<16x64xf32>
    %c1_41 = arith.constant 1 : index
    %c0_42 = arith.constant 0 : index
    %c0_43 = arith.constant 0 : index
    %86 = vector.load %arg7[%c1_41, %c0_42, %c0_43] : memref<2x1x64xf32, #tpu.memory_space<vmem>>, vector<1x1x64xf32>
    %87 = vector.shape_cast %86 : vector<1x1x64xf32> to vector<1x64xf32>
    %88 = vector.broadcast %87 : vector<1x64xf32> to vector<16x64xf32>
    %89 = arith.addf %85, %88 : vector<16x64xf32>
    %cst_44 = arith.constant 0.000000e+00 : f32
    %90 = vector.broadcast %cst_44 : f32 to vector<16x64xf32>
    %91 = arith.maximumf %89, %90 : vector<16x64xf32>
    %92 = arith.truncf %91 : vector<16x64xf32> to vector<16x64xbf16>
    %c1_45 = arith.constant 1 : index
    %c0_46 = arith.constant 0 : index
    %c0_47 = arith.constant 0 : index
    %93 = vector.load %arg8[%c1_45, %c0_46, %c0_47] : memref<2x64x32xbf16, #tpu.memory_space<vmem>>, vector<1x64x32xbf16>
    %94 = vector.shape_cast %93 : vector<1x64x32xbf16> to vector<64x32xbf16>
    %cst_48 = arith.constant dense<0.000000e+00> : vector<16x32xf32>
    %95 = tpu.matmul %92, %94, %cst_48 {dimension_numbers = #tpu.dot_dimension_numbers<[1], [0], [0], [1], [0, 0, 1, 1], [], []>} : vector<16x64xbf16>, vector<64x32xbf16>, vector<16x32xf32> -> vector<16x32xf32>
    %c1_49 = arith.constant 1 : index
    %c0_50 = arith.constant 0 : index
    %c0_51 = arith.constant 0 : index
    %96 = vector.load %arg9[%c1_49, %c0_50, %c0_51] : memref<2x1x32xf32, #tpu.memory_space<vmem>>, vector<1x1x32xf32>
    %97 = vector.shape_cast %96 : vector<1x1x32xf32> to vector<1x32xf32>
    %98 = vector.broadcast %97 : vector<1x32xf32> to vector<16x32xf32>
    %99 = arith.addf %95, %98 : vector<16x32xf32>
    %100 = vector.broadcast %1 : vector<1x32xf32> to vector<16x32xf32>
    %101 = arith.addf %99, %100 : vector<16x32xf32>
    %c0_52 = arith.constant 0 : index
    %c0_53 = arith.constant 0 : index
    %102 = vector.load %arg24[%c0_52, %c0_53] : memref<16x32xf32, #tpu.memory_space<vmem>>, vector<16x32xf32>
    tpu.vector_store %arg24[%c0_52, %c0_53], %56 {strides = array<i32>} : memref<16x32xf32, #tpu.memory_space<vmem>>, vector<16x32xf32>,
    %c0_54 = arith.constant 0 : index
    %c0_55 = arith.constant 0 : index
    %103 = vector.load %arg25[%c0_54, %c0_55] : memref<16x32xf32, #tpu.memory_space<vmem>>, vector<16x32xf32>
    tpu.vector_store %arg25[%c0_54, %c0_55], %101 {strides = array<i32>} : memref<16x32xf32, #tpu.memory_space<vmem>>, vector<16x32xf32>,
    %c0_i32 = arith.constant 0 : i32
    %c4_i32 = arith.constant 4 : i32
    %104 = arith.addi %c0_i32, %c4_i32 : i32
    %c1_i32 = arith.constant 1 : i32
    %105 = scf.for %arg26 = %c0_i32 to %104 step %c1_i32 iter_args(%arg27 = %56) -> (vector<16x32xf32>)  : i32 {
      %c0_i32_67 = arith.constant 0 : i32
      %118 = arith.addi %c0_i32_67, %arg26 : i32
      %119 = arith.index_cast %118 : i32 to index
      %c0_68 = arith.constant 0 : index
      %c0_69 = arith.constant 0 : index
      %120 = vector.load %arg10[%119, %c0_68, %c0_69] : memref<8x32x32xbf16, #tpu.memory_space<vmem>>, vector<1x32x32xbf16>
      %121 = vector.shape_cast %120 : vector<1x32x32xbf16> to vector<32x32xbf16>
      %122 = arith.index_cast %118 : i32 to index
      %c0_70 = arith.constant 0 : index
      %c0_71 = arith.constant 0 : index
      %123 = vector.load %arg11[%122, %c0_70, %c0_71] : memref<8x32x32xbf16, #tpu.memory_space<vmem>>, vector<1x32x32xbf16>
      %124 = vector.shape_cast %123 : vector<1x32x32xbf16> to vector<32x32xbf16>
      %125 = arith.index_cast %118 : i32 to index
      %c0_72 = arith.constant 0 : index
      %c0_73 = arith.constant 0 : index
      %126 = vector.load %arg12[%125, %c0_72, %c0_73] : memref<8x32x32xbf16, #tpu.memory_space<vmem>>, vector<1x32x32xbf16>
      %127 = vector.shape_cast %126 : vector<1x32x32xbf16> to vector<32x32xbf16>
      %128 = arith.index_cast %118 : i32 to index
      %c0_74 = arith.constant 0 : index
      %c0_75 = arith.constant 0 : index
      %129 = vector.load %arg13[%128, %c0_74, %c0_75] : memref<8x32x32xbf16, #tpu.memory_space<vmem>>, vector<1x32x32xbf16>
      %130 = vector.shape_cast %129 : vector<1x32x32xbf16> to vector<32x32xbf16>
      %131 = arith.truncf %arg27 : vector<16x32xf32> to vector<16x32xbf16>
      %cst_76 = arith.constant dense<0.000000e+00> : vector<16x32xf32>
      %132 = tpu.matmul %131, %121, %cst_76 {dimension_numbers = #tpu.dot_dimension_numbers<[1], [0], [0], [1], [0, 0, 1, 1], [], []>} : vector<16x32xbf16>, vector<32x32xbf16>, vector<16x32xf32> -> vector<16x32xf32>
      %133 = arith.truncf %132 : vector<16x32xf32> to vector<16x32xbf16>
      %cst_77 = arith.constant 0xFF800000 : f32
      %134 = vector.broadcast %cst_77 : f32 to vector<16x1xf32>
      %cst_78 = arith.constant 0.000000e+00 : f32
      %135 = vector.broadcast %cst_78 : f32 to vector<16x1xf32>
      %cst_79 = arith.constant 0.000000e+00 : f32
      %136 = vector.broadcast %cst_79 : f32 to vector<16x32xf32>
      %c0_i32_80 = arith.constant 0 : i32
      %c16_i32 = arith.constant 16 : i32
      %137 = arith.muli %c0_i32_80, %c16_i32 : i32
      %138 = tpu.assume_multiple %137, 16 : i32
      %139 = arith.index_cast %138 : i32 to index
      %c0_81 = arith.constant 0 : index
      %140 = vector.load %arg25[%139, %c0_81] : memref<16x32xf32, #tpu.memory_space<vmem>>, vector<16x32xf32>
      %141 = arith.truncf %140 : vector<16x32xf32> to vector<16x32xbf16>
      %cst_82 = arith.constant dense<0.000000e+00> : vector<16x32xf32>
      %142 = tpu.matmul %141, %124, %cst_82 {dimension_numbers = #tpu.dot_dimension_numbers<[1], [0], [0], [1], [0, 0, 1, 1], [], []>} : vector<16x32xbf16>, vector<32x32xbf16>, vector<16x32xf32> -> vector<16x32xf32>
      %cst_83 = arith.constant dense<0.000000e+00> : vector<16x32xf32>
      %143 = tpu.matmul %141, %127, %cst_83 {dimension_numbers = #tpu.dot_dimension_numbers<[1], [0], [0], [1], [0, 0, 1, 1], [], []>} : vector<16x32xbf16>, vector<32x32xbf16>, vector<16x32xf32> -> vector<16x32xf32>
      %144 = arith.truncf %142 : vector<16x32xf32> to vector<16x32xbf16>
      %cst_84 = arith.constant dense<0.000000e+00> : vector<16x16xf32>
      %145 = tpu.matmul %133, %144, %cst_84 {dimension_numbers = #tpu.dot_dimension_numbers<[1], [1], [0], [0], [0, 0, 1, 0], [], []>} : vector<16x32xbf16>, vector<16x32xbf16>, vector<16x16xf32> -> vector<16x16xf32>
      %cst_85 = arith.constant 0.176776692 : f32
      %146 = vector.broadcast %cst_85 : f32 to vector<16x16xf32>
      %147 = arith.mulf %145, %146 : vector<16x16xf32>
      %cst_86 = arith.constant dense<0xFF800000> : vector<16xf32>
      %148 = vector.multi_reduction <maximumf>, %147, %cst_86 [1] : vector<16x16xf32> to vector<16xf32>
      %149 = vector.shape_cast %148 : vector<16xf32> to vector<16x1xf32>
      %150 = arith.maximumf %134, %149 : vector<16x1xf32>
      %151 = arith.subf %134, %150 : vector<16x1xf32>
      %152 = math.exp %151 : vector<16x1xf32>
      %153 = vector.broadcast %150 : vector<16x1xf32> to vector<16x16xf32>
      %154 = arith.subf %147, %153 : vector<16x16xf32>
      %155 = math.exp %154 : vector<16x16xf32>
      %156 = arith.mulf %152, %135 : vector<16x1xf32>
      %cst_87 = arith.constant dense<0.000000e+00> : vector<16xf32>
      %157 = vector.multi_reduction <add>, %155, %cst_87 [1] : vector<16x16xf32> to vector<16xf32>
      %158 = vector.shape_cast %157 : vector<16xf32> to vector<16x1xf32>
      %159 = arith.addf %156, %158 : vector<16x1xf32>
      %160 = vector.broadcast %152 : vector<16x1xf32> to vector<16x32xf32>
      %161 = arith.mulf %160, %136 : vector<16x32xf32>
      %162 = arith.truncf %155 : vector<16x16xf32> to vector<16x16xbf16>
      %163 = arith.truncf %143 : vector<16x32xf32> to vector<16x32xbf16>
      %cst_88 = arith.constant dense<0.000000e+00> : vector<16x32xf32>
      %164 = tpu.matmul %162, %163, %cst_88 {dimension_numbers = #tpu.dot_dimension_numbers<[1], [0], [0], [1], [0, 0, 1, 1], [], []>} : vector<16x16xbf16>, vector<16x32xbf16>, vector<16x32xf32> -> vector<16x32xf32>
      %165 = arith.addf %161, %164 : vector<16x32xf32>
      %c1_i32_89 = arith.constant 1 : i32
      %166 = tpu.reciprocal %159 {approx = true} : vector<16x1xf32> -> vector<16x1xf32>
      %167 = vector.broadcast %166 : vector<16x1xf32> to vector<16x32xf32>
      %168 = arith.mulf %165, %167 : vector<16x32xf32>
      %169 = arith.truncf %168 : vector<16x32xf32> to vector<16x32xbf16>
      %cst_90 = arith.constant dense<0.000000e+00> : vector<16x32xf32>
      %170 = tpu.matmul %169, %130, %cst_90 {dimension_numbers = #tpu.dot_dimension_numbers<[1], [0], [0], [1], [0, 0, 1, 1], [], []>} : vector<16x32xbf16>, vector<32x32xbf16>, vector<16x32xf32> -> vector<16x32xf32>
      %171 = arith.addf %arg27, %170 : vector<16x32xf32>
      %cst_91 = arith.constant dense<0.000000e+00> : vector<16xf32>
      %172 = vector.multi_reduction <add>, %171, %cst_91 [1] : vector<16x32xf32> to vector<16xf32>
      %173 = vector.shape_cast %172 : vector<16xf32> to vector<16x1xf32>
      %cst_92 = arith.constant 3.200000e+01 : f32
      %174 = vector.broadcast %cst_92 : f32 to vector<16x1xf32>
      %175 = arith.divf %173, %174 : vector<16x1xf32>
      %176 = vector.broadcast %175 : vector<16x1xf32> to vector<16x32xf32>
      %177 = arith.subf %171, %176 : vector<16x32xf32>
      %178 = arith.mulf %177, %177 : vector<16x32xf32>
      %cst_93 = arith.constant dense<0.000000e+00> : vector<16xf32>
      %179 = vector.multi_reduction <add>, %178, %cst_93 [1] : vector<16x32xf32> to vector<16xf32>
      %180 = vector.shape_cast %179 : vector<16xf32> to vector<16x1xf32>
      %cst_94 = arith.constant 3.200000e+01 : f32
      %181 = vector.broadcast %cst_94 : f32 to vector<16x1xf32>
      %182 = arith.divf %180, %181 : vector<16x1xf32>
      %183 = vector.broadcast %175 : vector<16x1xf32> to vector<16x32xf32>
      %184 = arith.subf %171, %183 : vector<16x32xf32>
      %cst_95 = arith.constant 9.99999974E-6 : f32
      %185 = vector.broadcast %cst_95 : f32 to vector<16x1xf32>
      %186 = arith.addf %182, %185 : vector<16x1xf32>
      %187 = math.rsqrt %186 : vector<16x1xf32>
      %188 = vector.broadcast %187 : vector<16x1xf32> to vector<16x32xf32>
      %189 = arith.mulf %184, %188 : vector<16x32xf32>
      %190 = arith.index_cast %118 : i32 to index
      %c0_96 = arith.constant 0 : index
      %c0_97 = arith.constant 0 : index
      %191 = vector.load %arg18[%190, %c0_96, %c0_97] : memref<8x1x32xf32, #tpu.memory_space<vmem>>, vector<1x1x32xf32>
      %192 = vector.shape_cast %191 : vector<1x1x32xf32> to vector<1x32xf32>
      %193 = vector.broadcast %192 : vector<1x32xf32> to vector<16x32xf32>
      %194 = arith.mulf %189, %193 : vector<16x32xf32>
      %195 = arith.index_cast %118 : i32 to index
      %c0_98 = arith.constant 0 : index
      %c0_99 = arith.constant 0 : index
      %196 = vector.load %arg19[%195, %c0_98, %c0_99] : memref<8x1x32xf32, #tpu.memory_space<vmem>>, vector<1x1x32xf32>
      %197 = vector.shape_cast %196 : vector<1x1x32xf32> to vector<1x32xf32>
      %198 = vector.broadcast %197 : vector<1x32xf32> to vector<16x32xf32>
      %199 = arith.addf %194, %198 : vector<16x32xf32>
      %200 = arith.truncf %199 : vector<16x32xf32> to vector<16x32xbf16>
      %201 = arith.index_cast %118 : i32 to index
      %c0_100 = arith.constant 0 : index
      %c0_101 = arith.constant 0 : index
      %202 = vector.load %arg14[%201, %c0_100, %c0_101] : memref<8x32x64xbf16, #tpu.memory_space<vmem>>, vector<1x32x64xbf16>
      %203 = vector.shape_cast %202 : vector<1x32x64xbf16> to vector<32x64xbf16>
      %cst_102 = arith.constant dense<0.000000e+00> : vector<16x64xf32>
      %204 = tpu.matmul %200, %203, %cst_102 {dimension_numbers = #tpu.dot_dimension_numbers<[1], [0], [0], [1], [0, 0, 1, 1], [], []>} : vector<16x32xbf16>, vector<32x64xbf16>, vector<16x64xf32> -> vector<16x64xf32>
      %205 = arith.index_cast %118 : i32 to index
      %c0_103 = arith.constant 0 : index
      %c0_104 = arith.constant 0 : index
      %206 = vector.load %arg15[%205, %c0_103, %c0_104] : memref<8x1x64xf32, #tpu.memory_space<vmem>>, vector<1x1x64xf32>
      %207 = vector.shape_cast %206 : vector<1x1x64xf32> to vector<1x64xf32>
      %208 = vector.broadcast %207 : vector<1x64xf32> to vector<16x64xf32>
      %209 = arith.addf %204, %208 : vector<16x64xf32>
      %cst_105 = arith.constant 0.000000e+00 : f32
      %210 = vector.broadcast %cst_105 : f32 to vector<16x64xf32>
      %211 = arith.maximumf %209, %210 : vector<16x64xf32>
      %212 = arith.truncf %211 : vector<16x64xf32> to vector<16x64xbf16>
      %213 = arith.index_cast %118 : i32 to index
      %c0_106 = arith.constant 0 : index
      %c0_107 = arith.constant 0 : index
      %214 = vector.load %arg16[%213, %c0_106, %c0_107] : memref<8x64x32xbf16, #tpu.memory_space<vmem>>, vector<1x64x32xbf16>
      %215 = vector.shape_cast %214 : vector<1x64x32xbf16> to vector<64x32xbf16>
      %cst_108 = arith.constant dense<0.000000e+00> : vector<16x32xf32>
      %216 = tpu.matmul %212, %215, %cst_108 {dimension_numbers = #tpu.dot_dimension_numbers<[1], [0], [0], [1], [0, 0, 1, 1], [], []>} : vector<16x64xbf16>, vector<64x32xbf16>, vector<16x32xf32> -> vector<16x32xf32>
      %217 = arith.index_cast %118 : i32 to index
      %c0_109 = arith.constant 0 : index
      %c0_110 = arith.constant 0 : index
      %218 = vector.load %arg17[%217, %c0_109, %c0_110] : memref<8x1x32xf32, #tpu.memory_space<vmem>>, vector<1x1x32xf32>
      %219 = vector.shape_cast %218 : vector<1x1x32xf32> to vector<1x32xf32>
      %220 = vector.broadcast %219 : vector<1x32xf32> to vector<16x32xf32>
      %221 = arith.addf %216, %220 : vector<16x32xf32>
      %222 = arith.addf %199, %221 : vector<16x32xf32>
      %cst_111 = arith.constant dense<0.000000e+00> : vector<16xf32>
      %223 = vector.multi_reduction <add>, %222, %cst_111 [1] : vector<16x32xf32> to vector<16xf32>
      %224 = vector.shape_cast %223 : vector<16xf32> to vector<16x1xf32>
      %cst_112 = arith.constant 3.200000e+01 : f32
      %225 = vector.broadcast %cst_112 : f32 to vector<16x1xf32>
      %226 = arith.divf %224, %225 : vector<16x1xf32>
      %227 = vector.broadcast %226 : vector<16x1xf32> to vector<16x32xf32>
      %228 = arith.subf %222, %227 : vector<16x32xf32>
      %229 = arith.mulf %228, %228 : vector<16x32xf32>
      %cst_113 = arith.constant dense<0.000000e+00> : vector<16xf32>
      %230 = vector.multi_reduction <add>, %229, %cst_113 [1] : vector<16x32xf32> to vector<16xf32>
      %231 = vector.shape_cast %230 : vector<16xf32> to vector<16x1xf32>
      %cst_114 = arith.constant 3.200000e+01 : f32
      %232 = vector.broadcast %cst_114 : f32 to vector<16x1xf32>
      %233 = arith.divf %231, %232 : vector<16x1xf32>
      %234 = vector.broadcast %226 : vector<16x1xf32> to vector<16x32xf32>
      %235 = arith.subf %222, %234 : vector<16x32xf32>
      %cst_115 = arith.constant 9.99999974E-6 : f32
      %236 = vector.broadcast %cst_115 : f32 to vector<16x1xf32>
      %237 = arith.addf %233, %236 : vector<16x1xf32>
      %238 = math.rsqrt %237 : vector<16x1xf32>
      %239 = vector.broadcast %238 : vector<16x1xf32> to vector<16x32xf32>
      %240 = arith.mulf %235, %239 : vector<16x32xf32>
      %241 = arith.index_cast %118 : i32 to index
      %c0_116 = arith.constant 0 : index
      %c0_117 = arith.constant 0 : index
      %242 = vector.load %arg20[%241, %c0_116, %c0_117] : memref<8x1x32xf32, #tpu.memory_space<vmem>>, vector<1x1x32xf32>
      %243 = vector.shape_cast %242 : vector<1x1x32xf32> to vector<1x32xf32>
      %244 = vector.broadcast %243 : vector<1x32xf32> to vector<16x32xf32>
      %245 = arith.mulf %240, %244 : vector<16x32xf32>
      %246 = arith.index_cast %118 : i32 to index
      %c0_118 = arith.constant 0 : index
      %c0_119 = arith.constant 0 : index
      %247 = vector.load %arg21[%246, %c0_118, %c0_119] : memref<8x1x32xf32, #tpu.memory_space<vmem>>, vector<1x1x32xf32>
      %248 = vector.shape_cast %247 : vector<1x1x32xf32> to vector<1x32xf32>
      %249 = vector.broadcast %248 : vector<1x32xf32> to vector<16x32xf32>
      %250 = arith.addf %245, %249 : vector<16x32xf32>
      scf.yield %250 : vector<16x32xf32>
    }
    %c4_i32_56 = arith.constant 4 : i32
    %c0_i32_57 = arith.constant 0 : i32
    %c4_i32_58 = arith.constant 4 : i32
    %106 = arith.addi %c0_i32_57, %c4_i32_58 : i32
    %c1_i32_59 = arith.constant 1 : i32
    %107 = scf.for %arg26 = %c0_i32_57 to %106 step %c1_i32_59 iter_args(%arg27 = %101) -> (vector<16x32xf32>)  : i32 {
      %c4_i32_67 = arith.constant 4 : i32
      %118 = arith.addi %c4_i32_67, %arg26 : i32
      %119 = arith.index_cast %118 : i32 to index
      %c0_68 = arith.constant 0 : index
      %c0_69 = arith.constant 0 : index
      %120 = vector.load %arg10[%119, %c0_68, %c0_69] : memref<8x32x32xbf16, #tpu.memory_space<vmem>>, vector<1x32x32xbf16>
      %121 = vector.shape_cast %120 : vector<1x32x32xbf16> to vector<32x32xbf16>
      %122 = arith.index_cast %118 : i32 to index
      %c0_70 = arith.constant 0 : index
      %c0_71 = arith.constant 0 : index
      %123 = vector.load %arg11[%122, %c0_70, %c0_71] : memref<8x32x32xbf16, #tpu.memory_space<vmem>>, vector<1x32x32xbf16>
      %124 = vector.shape_cast %123 : vector<1x32x32xbf16> to vector<32x32xbf16>
      %125 = arith.index_cast %118 : i32 to index
      %c0_72 = arith.constant 0 : index
      %c0_73 = arith.constant 0 : index
      %126 = vector.load %arg12[%125, %c0_72, %c0_73] : memref<8x32x32xbf16, #tpu.memory_space<vmem>>, vector<1x32x32xbf16>
      %127 = vector.shape_cast %126 : vector<1x32x32xbf16> to vector<32x32xbf16>
      %128 = arith.index_cast %118 : i32 to index
      %c0_74 = arith.constant 0 : index
      %c0_75 = arith.constant 0 : index
      %129 = vector.load %arg13[%128, %c0_74, %c0_75] : memref<8x32x32xbf16, #tpu.memory_space<vmem>>, vector<1x32x32xbf16>
      %130 = vector.shape_cast %129 : vector<1x32x32xbf16> to vector<32x32xbf16>
      %131 = arith.truncf %arg27 : vector<16x32xf32> to vector<16x32xbf16>
      %cst_76 = arith.constant dense<0.000000e+00> : vector<16x32xf32>
      %132 = tpu.matmul %131, %121, %cst_76 {dimension_numbers = #tpu.dot_dimension_numbers<[1], [0], [0], [1], [0, 0, 1, 1], [], []>} : vector<16x32xbf16>, vector<32x32xbf16>, vector<16x32xf32> -> vector<16x32xf32>
      %133 = arith.truncf %132 : vector<16x32xf32> to vector<16x32xbf16>
      %cst_77 = arith.constant 0xFF800000 : f32
      %134 = vector.broadcast %cst_77 : f32 to vector<16x1xf32>
      %cst_78 = arith.constant 0.000000e+00 : f32
      %135 = vector.broadcast %cst_78 : f32 to vector<16x1xf32>
      %cst_79 = arith.constant 0.000000e+00 : f32
      %136 = vector.broadcast %cst_79 : f32 to vector<16x32xf32>
      %c0_i32_80 = arith.constant 0 : i32
      %c16_i32 = arith.constant 16 : i32
      %137 = arith.muli %c0_i32_80, %c16_i32 : i32
      %138 = tpu.assume_multiple %137, 16 : i32
      %139 = arith.index_cast %138 : i32 to index
      %c0_81 = arith.constant 0 : index
      %140 = vector.load %arg24[%139, %c0_81] : memref<16x32xf32, #tpu.memory_space<vmem>>, vector<16x32xf32>
      %141 = arith.truncf %140 : vector<16x32xf32> to vector<16x32xbf16>
      %cst_82 = arith.constant dense<0.000000e+00> : vector<16x32xf32>
      %142 = tpu.matmul %141, %124, %cst_82 {dimension_numbers = #tpu.dot_dimension_numbers<[1], [0], [0], [1], [0, 0, 1, 1], [], []>} : vector<16x32xbf16>, vector<32x32xbf16>, vector<16x32xf32> -> vector<16x32xf32>
      %cst_83 = arith.constant dense<0.000000e+00> : vector<16x32xf32>
      %143 = tpu.matmul %141, %127, %cst_83 {dimension_numbers = #tpu.dot_dimension_numbers<[1], [0], [0], [1], [0, 0, 1, 1], [], []>} : vector<16x32xbf16>, vector<32x32xbf16>, vector<16x32xf32> -> vector<16x32xf32>
      %144 = arith.truncf %142 : vector<16x32xf32> to vector<16x32xbf16>
      %cst_84 = arith.constant dense<0.000000e+00> : vector<16x16xf32>
      %145 = tpu.matmul %133, %144, %cst_84 {dimension_numbers = #tpu.dot_dimension_numbers<[1], [1], [0], [0], [0, 0, 1, 0], [], []>} : vector<16x32xbf16>, vector<16x32xbf16>, vector<16x16xf32> -> vector<16x16xf32>
      %cst_85 = arith.constant 0.176776692 : f32
      %146 = vector.broadcast %cst_85 : f32 to vector<16x16xf32>
      %147 = arith.mulf %145, %146 : vector<16x16xf32>
      %cst_86 = arith.constant dense<0xFF800000> : vector<16xf32>
      %148 = vector.multi_reduction <maximumf>, %147, %cst_86 [1] : vector<16x16xf32> to vector<16xf32>
      %149 = vector.shape_cast %148 : vector<16xf32> to vector<16x1xf32>
      %150 = arith.maximumf %134, %149 : vector<16x1xf32>
      %151 = arith.subf %134, %150 : vector<16x1xf32>
      %152 = math.exp %151 : vector<16x1xf32>
      %153 = vector.broadcast %150 : vector<16x1xf32> to vector<16x16xf32>
      %154 = arith.subf %147, %153 : vector<16x16xf32>
      %155 = math.exp %154 : vector<16x16xf32>
      %156 = arith.mulf %152, %135 : vector<16x1xf32>
      %cst_87 = arith.constant dense<0.000000e+00> : vector<16xf32>
      %157 = vector.multi_reduction <add>, %155, %cst_87 [1] : vector<16x16xf32> to vector<16xf32>
      %158 = vector.shape_cast %157 : vector<16xf32> to vector<16x1xf32>
      %159 = arith.addf %156, %158 : vector<16x1xf32>
      %160 = vector.broadcast %152 : vector<16x1xf32> to vector<16x32xf32>
      %161 = arith.mulf %160, %136 : vector<16x32xf32>
      %162 = arith.truncf %155 : vector<16x16xf32> to vector<16x16xbf16>
      %163 = arith.truncf %143 : vector<16x32xf32> to vector<16x32xbf16>
      %cst_88 = arith.constant dense<0.000000e+00> : vector<16x32xf32>
      %164 = tpu.matmul %162, %163, %cst_88 {dimension_numbers = #tpu.dot_dimension_numbers<[1], [0], [0], [1], [0, 0, 1, 1], [], []>} : vector<16x16xbf16>, vector<16x32xbf16>, vector<16x32xf32> -> vector<16x32xf32>
      %165 = arith.addf %161, %164 : vector<16x32xf32>
      %c1_i32_89 = arith.constant 1 : i32
      %166 = tpu.reciprocal %159 {approx = true} : vector<16x1xf32> -> vector<16x1xf32>
      %167 = vector.broadcast %166 : vector<16x1xf32> to vector<16x32xf32>
      %168 = arith.mulf %165, %167 : vector<16x32xf32>
      %169 = arith.truncf %168 : vector<16x32xf32> to vector<16x32xbf16>
      %cst_90 = arith.constant dense<0.000000e+00> : vector<16x32xf32>
      %170 = tpu.matmul %169, %130, %cst_90 {dimension_numbers = #tpu.dot_dimension_numbers<[1], [0], [0], [1], [0, 0, 1, 1], [], []>} : vector<16x32xbf16>, vector<32x32xbf16>, vector<16x32xf32> -> vector<16x32xf32>
      %171 = arith.addf %arg27, %170 : vector<16x32xf32>
      %cst_91 = arith.constant dense<0.000000e+00> : vector<16xf32>
      %172 = vector.multi_reduction <add>, %171, %cst_91 [1] : vector<16x32xf32> to vector<16xf32>
      %173 = vector.shape_cast %172 : vector<16xf32> to vector<16x1xf32>
      %cst_92 = arith.constant 3.200000e+01 : f32
      %174 = vector.broadcast %cst_92 : f32 to vector<16x1xf32>
      %175 = arith.divf %173, %174 : vector<16x1xf32>
      %176 = vector.broadcast %175 : vector<16x1xf32> to vector<16x32xf32>
      %177 = arith.subf %171, %176 : vector<16x32xf32>
      %178 = arith.mulf %177, %177 : vector<16x32xf32>
      %cst_93 = arith.constant dense<0.000000e+00> : vector<16xf32>
      %179 = vector.multi_reduction <add>, %178, %cst_93 [1] : vector<16x32xf32> to vector<16xf32>
      %180 = vector.shape_cast %179 : vector<16xf32> to vector<16x1xf32>
      %cst_94 = arith.constant 3.200000e+01 : f32
      %181 = vector.broadcast %cst_94 : f32 to vector<16x1xf32>
      %182 = arith.divf %180, %181 : vector<16x1xf32>
      %183 = vector.broadcast %175 : vector<16x1xf32> to vector<16x32xf32>
      %184 = arith.subf %171, %183 : vector<16x32xf32>
      %cst_95 = arith.constant 9.99999974E-6 : f32
      %185 = vector.broadcast %cst_95 : f32 to vector<16x1xf32>
      %186 = arith.addf %182, %185 : vector<16x1xf32>
      %187 = math.rsqrt %186 : vector<16x1xf32>
      %188 = vector.broadcast %187 : vector<16x1xf32> to vector<16x32xf32>
      %189 = arith.mulf %184, %188 : vector<16x32xf32>
      %190 = arith.index_cast %118 : i32 to index
      %c0_96 = arith.constant 0 : index
      %c0_97 = arith.constant 0 : index
      %191 = vector.load %arg18[%190, %c0_96, %c0_97] : memref<8x1x32xf32, #tpu.memory_space<vmem>>, vector<1x1x32xf32>
      %192 = vector.shape_cast %191 : vector<1x1x32xf32> to vector<1x32xf32>
      %193 = vector.broadcast %192 : vector<1x32xf32> to vector<16x32xf32>
      %194 = arith.mulf %189, %193 : vector<16x32xf32>
      %195 = arith.index_cast %118 : i32 to index
      %c0_98 = arith.constant 0 : index
      %c0_99 = arith.constant 0 : index
      %196 = vector.load %arg19[%195, %c0_98, %c0_99] : memref<8x1x32xf32, #tpu.memory_space<vmem>>, vector<1x1x32xf32>
      %197 = vector.shape_cast %196 : vector<1x1x32xf32> to vector<1x32xf32>
      %198 = vector.broadcast %197 : vector<1x32xf32> to vector<16x32xf32>
      %199 = arith.addf %194, %198 : vector<16x32xf32>
      %200 = arith.truncf %199 : vector<16x32xf32> to vector<16x32xbf16>
      %201 = arith.index_cast %118 : i32 to index
      %c0_100 = arith.constant 0 : index
      %c0_101 = arith.constant 0 : index
      %202 = vector.load %arg14[%201, %c0_100, %c0_101] : memref<8x32x64xbf16, #tpu.memory_space<vmem>>, vector<1x32x64xbf16>
      %203 = vector.shape_cast %202 : vector<1x32x64xbf16> to vector<32x64xbf16>
      %cst_102 = arith.constant dense<0.000000e+00> : vector<16x64xf32>
      %204 = tpu.matmul %200, %203, %cst_102 {dimension_numbers = #tpu.dot_dimension_numbers<[1], [0], [0], [1], [0, 0, 1, 1], [], []>} : vector<16x32xbf16>, vector<32x64xbf16>, vector<16x64xf32> -> vector<16x64xf32>
      %205 = arith.index_cast %118 : i32 to index
      %c0_103 = arith.constant 0 : index
      %c0_104 = arith.constant 0 : index
      %206 = vector.load %arg15[%205, %c0_103, %c0_104] : memref<8x1x64xf32, #tpu.memory_space<vmem>>, vector<1x1x64xf32>
      %207 = vector.shape_cast %206 : vector<1x1x64xf32> to vector<1x64xf32>
      %208 = vector.broadcast %207 : vector<1x64xf32> to vector<16x64xf32>
      %209 = arith.addf %204, %208 : vector<16x64xf32>
      %cst_105 = arith.constant 0.000000e+00 : f32
      %210 = vector.broadcast %cst_105 : f32 to vector<16x64xf32>
      %211 = arith.maximumf %209, %210 : vector<16x64xf32>
      %212 = arith.truncf %211 : vector<16x64xf32> to vector<16x64xbf16>
      %213 = arith.index_cast %118 : i32 to index
      %c0_106 = arith.constant 0 : index
      %c0_107 = arith.constant 0 : index
      %214 = vector.load %arg16[%213, %c0_106, %c0_107] : memref<8x64x32xbf16, #tpu.memory_space<vmem>>, vector<1x64x32xbf16>
      %215 = vector.shape_cast %214 : vector<1x64x32xbf16> to vector<64x32xbf16>
      %cst_108 = arith.constant dense<0.000000e+00> : vector<16x32xf32>
      %216 = tpu.matmul %212, %215, %cst_108 {dimension_numbers = #tpu.dot_dimension_numbers<[1], [0], [0], [1], [0, 0, 1, 1], [], []>} : vector<16x64xbf16>, vector<64x32xbf16>, vector<16x32xf32> -> vector<16x32xf32>
      %217 = arith.index_cast %118 : i32 to index
      %c0_109 = arith.constant 0 : index
      %c0_110 = arith.constant 0 : index
      %218 = vector.load %arg17[%217, %c0_109, %c0_110] : memref<8x1x32xf32, #tpu.memory_space<vmem>>, vector<1x1x32xf32>
      %219 = vector.shape_cast %218 : vector<1x1x32xf32> to vector<1x32xf32>
      %220 = vector.broadcast %219 : vector<1x32xf32> to vector<16x32xf32>
      %221 = arith.addf %216, %220 : vector<16x32xf32>
      %222 = arith.addf %199, %221 : vector<16x32xf32>
      %cst_111 = arith.constant dense<0.000000e+00> : vector<16xf32>
      %223 = vector.multi_reduction <add>, %222, %cst_111 [1] : vector<16x32xf32> to vector<16xf32>
      %224 = vector.shape_cast %223 : vector<16xf32> to vector<16x1xf32>
      %cst_112 = arith.constant 3.200000e+01 : f32
      %225 = vector.broadcast %cst_112 : f32 to vector<16x1xf32>
      %226 = arith.divf %224, %225 : vector<16x1xf32>
      %227 = vector.broadcast %226 : vector<16x1xf32> to vector<16x32xf32>
      %228 = arith.subf %222, %227 : vector<16x32xf32>
      %229 = arith.mulf %228, %228 : vector<16x32xf32>
      %cst_113 = arith.constant dense<0.000000e+00> : vector<16xf32>
      %230 = vector.multi_reduction <add>, %229, %cst_113 [1] : vector<16x32xf32> to vector<16xf32>
      %231 = vector.shape_cast %230 : vector<16xf32> to vector<16x1xf32>
      %cst_114 = arith.constant 3.200000e+01 : f32
      %232 = vector.broadcast %cst_114 : f32 to vector<16x1xf32>
      %233 = arith.divf %231, %232 : vector<16x1xf32>
      %234 = vector.broadcast %226 : vector<16x1xf32> to vector<16x32xf32>
      %235 = arith.subf %222, %234 : vector<16x32xf32>
      %cst_115 = arith.constant 9.99999974E-6 : f32
      %236 = vector.broadcast %cst_115 : f32 to vector<16x1xf32>
      %237 = arith.addf %233, %236 : vector<16x1xf32>
      %238 = math.rsqrt %237 : vector<16x1xf32>
      %239 = vector.broadcast %238 : vector<16x1xf32> to vector<16x32xf32>
      %240 = arith.mulf %235, %239 : vector<16x32xf32>
      %241 = arith.index_cast %118 : i32 to index
      %c0_116 = arith.constant 0 : index
      %c0_117 = arith.constant 0 : index
      %242 = vector.load %arg20[%241, %c0_116, %c0_117] : memref<8x1x32xf32, #tpu.memory_space<vmem>>, vector<1x1x32xf32>
      %243 = vector.shape_cast %242 : vector<1x1x32xf32> to vector<1x32xf32>
      %244 = vector.broadcast %243 : vector<1x32xf32> to vector<16x32xf32>
      %245 = arith.mulf %240, %244 : vector<16x32xf32>
      %246 = arith.index_cast %118 : i32 to index
      %c0_118 = arith.constant 0 : index
      %c0_119 = arith.constant 0 : index
      %247 = vector.load %arg21[%246, %c0_118, %c0_119] : memref<8x1x32xf32, #tpu.memory_space<vmem>>, vector<1x1x32xf32>
      %248 = vector.shape_cast %247 : vector<1x1x32xf32> to vector<1x32xf32>
      %249 = vector.broadcast %248 : vector<1x32xf32> to vector<16x32xf32>
      %250 = arith.addf %245, %249 : vector<16x32xf32>
      scf.yield %250 : vector<16x32xf32>
    }
    %c4_i32_60 = arith.constant 4 : i32
    %108 = arith.addf %56, %105 : vector<16x32xf32>
    %109 = arith.truncf %108 : vector<16x32xf32> to vector<16x32xbf16>
    %c0_61 = arith.constant 0 : index
    %c0_62 = arith.constant 0 : index
    %c0_63 = arith.constant 0 : index
    %110 = vector.load %arg22[%c0_61, %c0_62, %c0_63] : memref<1x16x32xbf16, #tpu.memory_space<vmem>>, vector<1x16x32xbf16>
    %111 = vector.shape_cast %110 : vector<1x16x32xbf16> to vector<16x32xbf16>
    %112 = vector.shape_cast %109 : vector<16x32xbf16> to vector<1x16x32xbf16>
    tpu.vector_store %arg22[%c0_61, %c0_62, %c0_63], %112 {strides = array<i32>} : memref<1x16x32xbf16, #tpu.memory_space<vmem>>, vector<1x16x32xbf16>,
    %113 = arith.addf %101, %107 : vector<16x32xf32>
    %114 = arith.truncf %113 : vector<16x32xf32> to vector<16x32xbf16>
    %c0_64 = arith.constant 0 : index
    %c0_65 = arith.constant 0 : index
    %c0_66 = arith.constant 0 : index
    %115 = vector.load %arg23[%c0_64, %c0_65, %c0_66] : memref<1x16x32xbf16, #tpu.memory_space<vmem>>, vector<1x16x32xbf16>
    %116 = vector.shape_cast %115 : vector<1x16x32xbf16> to vector<16x32xbf16>
    %117 = vector.shape_cast %114 : vector<16x32xbf16> to vector<1x16x32xbf16>
    tpu.vector_store %arg23[%c0_64, %c0_65, %c0_66], %117 {strides = array<i32>} : memref<1x16x32xbf16, #tpu.memory_space<vmem>>, vector<1x16x32xbf16>,
    return
  }
  func.func @transform_0(%arg0: i32) -> (i32, i32, i32) {
    %c0_i32 = arith.constant 0 : i32
    %c0_i32_0 = arith.constant 0 : i32
    %c0_i32_1 = arith.constant 0 : i32
    return %arg0, %c0_i32, %c0_i32_0 : i32, i32, i32
  }
  func.func @transform_1(%arg0: i32) -> (i32, i32, i32) {
    %c0_i32 = arith.constant 0 : i32
    %c0_i32_0 = arith.constant 0 : i32
    %c0_i32_1 = arith.constant 0 : i32
    return %arg0, %c0_i32, %c0_i32_0 : i32, i32, i32
  }
  func.func @transform_2(%arg0: i32) -> (i32, i32, i32) {
    %c0_i32 = arith.constant 0 : i32
    %c0_i32_0 = arith.constant 0 : i32
    %c0_i32_1 = arith.constant 0 : i32
    return %arg0, %c0_i32, %c0_i32_0 : i32, i32, i32
  }
  func.func @transform_3(%arg0: i32) -> (i32, i32, i32) {
    %c0_i32 = arith.constant 0 : i32
    %c0_i32_0 = arith.constant 0 : i32
    %c0_i32_1 = arith.constant 0 : i32
    %c0_i32_2 = arith.constant 0 : i32
    return %c0_i32, %c0_i32_0, %c0_i32_1 : i32, i32, i32
  }
  func.func @transform_4(%arg0: i32) -> (i32, i32, i32) {
    %c0_i32 = arith.constant 0 : i32
    %c0_i32_0 = arith.constant 0 : i32
    %c0_i32_1 = arith.constant 0 : i32
    %c0_i32_2 = arith.constant 0 : i32
    return %c0_i32, %c0_i32_0, %c0_i32_1 : i32, i32, i32
  }
  func.func @transform_5(%arg0: i32) -> (i32, i32, i32) {
    %c0_i32 = arith.constant 0 : i32
    %c0_i32_0 = arith.constant 0 : i32
    %c0_i32_1 = arith.constant 0 : i32
    %c0_i32_2 = arith.constant 0 : i32
    return %c0_i32, %c0_i32_0, %c0_i32_1 : i32, i32, i32
  }
  func.func @transform_6(%arg0: i32) -> (i32, i32, i32) {
    %c0_i32 = arith.constant 0 : i32
    %c0_i32_0 = arith.constant 0 : i32
    %c0_i32_1 = arith.constant 0 : i32
    %c0_i32_2 = arith.constant 0 : i32
    return %c0_i32, %c0_i32_0, %c0_i32_1 : i32, i32, i32
  }
  func.func @transform_7(%arg0: i32) -> (i32, i32, i32) {
    %c0_i32 = arith.constant 0 : i32
    %c0_i32_0 = arith.constant 0 : i32
    %c0_i32_1 = arith.constant 0 : i32
    %c0_i32_2 = arith.constant 0 : i32
    return %c0_i32, %c0_i32_0, %c0_i32_1 : i32, i32, i32
  }
  func.func @transform_8(%arg0: i32) -> (i32, i32, i32) {
    %c0_i32 = arith.constant 0 : i32
    %c0_i32_0 = arith.constant 0 : i32
    %c0_i32_1 = arith.constant 0 : i32
    %c0_i32_2 = arith.constant 0 : i32
    return %c0_i32, %c0_i32_0, %c0_i32_1 : i32, i32, i32
  }
  func.func @transform_9(%arg0: i32) -> (i32, i32, i32) {
    %c0_i32 = arith.constant 0 : i32
    %c0_i32_0 = arith.constant 0 : i32
    %c0_i32_1 = arith.constant 0 : i32
    %c0_i32_2 = arith.constant 0 : i32
    return %c0_i32, %c0_i32_0, %c0_i32_1 : i32, i32, i32
  }
  func.func @transform_10(%arg0: i32) -> (i32, i32, i32) {
    %c0_i32 = arith.constant 0 : i32
    %c0_i32_0 = arith.constant 0 : i32
    %c0_i32_1 = arith.constant 0 : i32
    %c0_i32_2 = arith.constant 0 : i32
    return %c0_i32, %c0_i32_0, %c0_i32_1 : i32, i32, i32
  }
  func.func @transform_11(%arg0: i32) -> (i32, i32, i32) {
    %c0_i32 = arith.constant 0 : i32
    %c0_i32_0 = arith.constant 0 : i32
    %c0_i32_1 = arith.constant 0 : i32
    %c0_i32_2 = arith.constant 0 : i32
    return %c0_i32, %c0_i32_0, %c0_i32_1 : i32, i32, i32
  }
  func.func @transform_12(%arg0: i32) -> (i32, i32, i32) {
    %c0_i32 = arith.constant 0 : i32
    %c0_i32_0 = arith.constant 0 : i32
    %c0_i32_1 = arith.constant 0 : i32
    %c0_i32_2 = arith.constant 0 : i32
    return %c0_i32, %c0_i32_0, %c0_i32_1 : i32, i32, i32
  }
  func.func @transform_13(%arg0: i32) -> (i32, i32, i32) {
    %c0_i32 = arith.constant 0 : i32
    %c0_i32_0 = arith.constant 0 : i32
    %c0_i32_1 = arith.constant 0 : i32
    %c0_i32_2 = arith.constant 0 : i32
    return %c0_i32, %c0_i32_0, %c0_i32_1 : i32, i32, i32
  }
  func.func @transform_14(%arg0: i32) -> (i32, i32, i32) {
    %c0_i32 = arith.constant 0 : i32
    %c0_i32_0 = arith.constant 0 : i32
    %c0_i32_1 = arith.constant 0 : i32
    %c0_i32_2 = arith.constant 0 : i32
    return %c0_i32, %c0_i32_0, %c0_i32_1 : i32, i32, i32
  }
  func.func @transform_15(%arg0: i32) -> (i32, i32, i32) {
    %c0_i32 = arith.constant 0 : i32
    %c0_i32_0 = arith.constant 0 : i32
    %c0_i32_1 = arith.constant 0 : i32
    %c0_i32_2 = arith.constant 0 : i32
    return %c0_i32, %c0_i32_0, %c0_i32_1 : i32, i32, i32
  }
  func.func @transform_16(%arg0: i32) -> (i32, i32, i32) {
    %c0_i32 = arith.constant 0 : i32
    %c0_i32_0 = arith.constant 0 : i32
    %c0_i32_1 = arith.constant 0 : i32
    %c0_i32_2 = arith.constant 0 : i32
    return %c0_i32, %c0_i32_0, %c0_i32_1 : i32, i32, i32
  }
  func.func @transform_17(%arg0: i32) -> (i32, i32, i32) {
    %c0_i32 = arith.constant 0 : i32
    %c0_i32_0 = arith.constant 0 : i32
    %c0_i32_1 = arith.constant 0 : i32
    %c0_i32_2 = arith.constant 0 : i32
    return %c0_i32, %c0_i32_0, %c0_i32_1 : i32, i32, i32
  }
  func.func @transform_18(%arg0: i32) -> (i32, i32, i32) {
    %c0_i32 = arith.constant 0 : i32
    %c0_i32_0 = arith.constant 0 : i32
    %c0_i32_1 = arith.constant 0 : i32
    %c0_i32_2 = arith.constant 0 : i32
    return %c0_i32, %c0_i32_0, %c0_i32_1 : i32, i32, i32
  }
  func.func @transform_19(%arg0: i32) -> (i32, i32, i32) {
    %c0_i32 = arith.constant 0 : i32
    %c0_i32_0 = arith.constant 0 : i32
    %c0_i32_1 = arith.constant 0 : i32
    %c0_i32_2 = arith.constant 0 : i32
    return %c0_i32, %c0_i32_0, %c0_i32_1 : i32, i32, i32
  }
  func.func @transform_20(%arg0: i32) -> (i32, i32, i32) {
    %c0_i32 = arith.constant 0 : i32
    %c0_i32_0 = arith.constant 0 : i32
    %c0_i32_1 = arith.constant 0 : i32
    %c0_i32_2 = arith.constant 0 : i32
    return %c0_i32, %c0_i32_0, %c0_i32_1 : i32, i32, i32
  }
  func.func @transform_21(%arg0: i32) -> (i32, i32, i32) {
    %c0_i32 = arith.constant 0 : i32
    %c0_i32_0 = arith.constant 0 : i32
    %c0_i32_1 = arith.constant 0 : i32
    return %arg0, %c0_i32, %c0_i32_0 : i32, i32, i32
  }
  func.func @transform_22(%arg0: i32) -> (i32, i32, i32) {
    %c0_i32 = arith.constant 0 : i32
    %c0_i32_0 = arith.constant 0 : i32
    %c0_i32_1 = arith.constant 0 : i32
    return %arg0, %c0_i32, %c0_i32_0 : i32, i32, i32
  }
}

</mosaic_0001>

<bundles_post_ra>
// kernel: _lambda_.3
= control target key start
LH: loop header
LB: loop body
LE: loop exit
PB: predicated region body
PF: predicated region fallthrough
CT: control target
= control target key end

     0   :  { %s2349_s0 = inlined_call_operand.vmem [shape: bf16[2,16,32], index: 0, kind: input, shape index: {}]   ;;  %s2350_s1 = inlined_call_operand.vmem [shape: bf16[2,16,32], index: 1, kind: input, shape index: {}]   ;;  %s2351_s2 = inlined_call_operand.vmem [shape: bf16[32,32], index: 2, kind: input, shape index: {}]   ;;  %s2352_s3 = inlined_call_operand.vmem [shape: bf16[32,32], index: 3, kind: input, shape index: {}]   ;;  %s2353_s4 = inlined_call_operand.vmem [shape: f32[1,32], index: 4, kind: input, shape index: {}]   ;;  %s2354_s5 = inlined_call_operand.vmem [shape: bf16[32,32], index: 5, kind: input, shape index: {}]   ;;  %s2355_s6 = inlined_call_operand.vmem [shape: f32[1,32], index: 6, kind: input, shape index: {}]   ;;  %s2356_s7 = inlined_call_operand.vmem [shape: f32[1,32], index: 7, kind: input, shape index: {}]   ;;  %s2357_s8 = inlined_call_operand.<no memory space> [shape: f32[1,1], index: 8, kind: input, shape index: {}]   ;;  %s2358_s9 = inlined_call_operand.hbm [shape: f32[2,16,16], index: 9, kind: output, shape index: {}]  }
   0x1   :  { %v14_v0 = vstv %s2357_s8 }
   0x2   :  { %15 = vst [vmem:[#allocation2] sm:$0x1] %v14_v0 }
   0x3   :  { %16 = vsyncpa [#allocation4], 0 }
   0x4   :  { %18 = vsyncpa [#allocation4 + $0x1], 0  ;;  %s1915_s11 = smov 0   ;;  %s1917_s12 = smov 0  }
   0x5   :  { %s1919_s13 = smov 0   ;;  %s1921_s14 = smov 0  }
   0x6   :  { %s1923_s15 = smov 0   ;;  %s1925_s16 = smov 0  }
   0x7 LB: > { %s1577_s8 = sadd.s32 4294967295, %s1853_s16   ;;  %s1578_s17 = sadd.s32 4294967294, %s1853_s16   ;;  %s1853_s16 = sphi %s1925_s16, %s24_s16   ;;  %s1849_s15 = sphi %s1923_s15, %s2365_s15   ;;  %s1845_s14 = sphi %s1921_s14, %s2364_s14   ;;  %s1841_s13 = sphi %s1919_s13, %s2363_s13   ;;  %s1837_s12 = sphi %s1917_s12, %s2362_s12   ;;  %s1833_s11 = sphi %s1915_s11, %s2361_s11  }
   0x8   : > { %s43_s18 = sadd.s32 1, %s1849_s15  ;;  %s257_s19 = sadd.s32 1, %s1841_s13 }
   0x9   : > { %p45_p0 = scmp.ge.s32.totalorder %s43_s18, 2  ;;  %p267_p1 = scmp.ne.s32.totalorder %s1841_s13, %s1837_s12 }
   0xa   : > { %p268_p2 = scmp.eq.s32.totalorder %s1577_s8, 1  ;;  %p273_p3 = scmp.ne.s32.totalorder %s1837_s12, %s1833_s11 }
   0xb   : > { %s2367_s18 = smov (%p45_p0, %s43_s18), 0  ;;  %p274_p5 = scmp.eq.s32.totalorder %s1578_s17, 1 }
   0xc   : > { %p1955_p4 = por %p268_p2, %p267_p1  ;;  %s250_s21 = ssub.s32 %s1849_s15, %s2367_s18 }
   0xd   : > { %p1581_p6 = scmp.ge.s32.totalorder %s1853_s16, 1  ;;  %p255_p7 = scmp.eq.s32.totalorder %s250_s21, 0 }
   0xe   : > { %p1962_p8 = por %p274_p5, %p273_p3  ;;  %p339_p9 = scmp.lt.s32.totalorder %s1853_s16, 3 }
   0xf   : > { %s1968_s23 = scalar_select %p255_p7, %s1841_s13, %s257_s19  }
  0x10   : > { %p340_p10 = pnand %p1581_p6, %p339_p9 }
  0x11   : > { %v1767_v1 = vld [vmem:[%s2351_s2] sm:$0xff] (!%p340_p10)   ;;  %v1855_v2 = vmov (!%p340_p10), 0.0   ;;  %v1768_v3 = vld [vmem:[%s2351_s2 + $0x8] sm:$0xff] (!%p340_p10)   ;;  %vm1856_vm0 = vmmov (!%p340_p10), 0   ;;  %p389_p11 = scmp.lt.s32.totalorder (!%p340_p10), %s1845_s14, 1  ;;  %vm442_vm1 = vcmask (!%p340_p10), 261120   ;;  %v558_v8 = vlaneseq (!%p340_p10) }
  0x12   : > { %343 = sbr.rel (%p340_p10) target bundleno = 734 (0x2de), region = 56  ;;  %1649 = vmatprep.subr.bf16.mxu0 (!%p340_p10), %v1855_v2  ;;  %1657 = vmatprep.subr.bf16.mxu1 (!%p340_p10), %v1855_v2  ;;  %v1769_v4 = vld [vmem:[%s2352_s3] sm:$0xff] (!%p340_p10)   ;;  %v1771_v5 = vld [vmem:[%s2352_s3 + $0x8] sm:$0xff] (!%p340_p10)   ;;  %v1857_v16 = vmov (!%p340_p10), 1966171168   ;;  %vm1296_vm2 = vcmask (!%p340_p10), 130112  }
  0x13   : > { %1650 = vmatpush3.bf16.msra.mxu0 (!%p340_p10), %v1767_v1  ;;  %1653 = vmatprep.mubr.msk.bf16.mxu0 (!%p340_p10), %vm1856_vm0, %v1855_v2  ;;  %v559_v9 = vshrl.u32 (!%p340_p10), %v558_v8, 7  ;;  %v1286_v10 = vand.u32 (!%p340_p10), 127, %v558_v8  ;;  %v1773_v11 = vld [vmem:[%s2354_s5] sm:$0xff] (!%p340_p10)   ;;  %v1774_v15 = vld [vmem:[%s2354_s5 + $0x8] sm:$0xff] (!%p340_p10)   ;;  %v556_v17 = vunpack.c.l.s4 (!%p340_p10), %v1857_v16  ;;  %vm1433_vm3 = vcmask (!%p340_p10), 1041409   ;;  %s385_s26 = sand.u32 (!%p340_p10), 1, %s1837_s12  }
  0x14   : > { %1651 = vmatprep.subr.bf16.mxu0 (!%p340_p10), %v1855_v2  ;;  %1661 = vmatprep.mubr.msk.bf16.mxu1 (!%p340_p10), %vm1856_vm0, %v1855_v2  ;;  %v1587_v19 = vld [vmem:[%s2353_s4] ss:$0 sm:$0xff] (!%p340_p10)  ;;  %vm1435_vm4 = vcmask (!%p340_p10), 1042434   ;;  %vm1437_vm5 = vcmask (!%p340_p10), 1043459   ;;  %vm1439_vm6 = vcmask (!%p340_p10), 1044484   ;;  %vm1441_vm7 = vcmask (!%p340_p10), 1045509  }
  0x15   : > { %1658 = vmatpush3.bf16.msra.mxu1 (!%p340_p10), %v1769_v4  ;;  %v1995_v12 = vsub.s32 (!%p340_p10), %v1286_v10, %v559_v9  ;;  %v1291_v13 = vadd.s32 (!%p340_p10), 4294967288, %v1286_v10  ;;  %v557_v18 = vunpack.c.0.s8 (!%p340_p10), %v556_v17  ;;  %v2009_v32 = vsub.s32 (!%p340_p10), 0, %v559_v9  ;;  %s1624_s28 = sshll.u32 (!%p340_p10), %s1845_s14, 8  ;;  %s1859_s21 = smov (!%p340_p10), [#allocation3]  }
  0x16   : > { %1659 = vmatprep.subr.bf16.mxu1 (!%p340_p10), %v1855_v2  ;;  %vm1443_vm8 = vcmask (!%p340_p10), 1046534   ;;  %vm1445_vm9 = vcmask (!%p340_p10), 1047559   ;;  %vm1456_vm10 = vcmask (!%p340_p10), 130048   ;;  %s2297_s8 = scalar_lea.hbm (!%p340_p10), %s2358_s9, %s1624_s28 }
  0x17   : > { %1652 = vmatpush3.bf16.msra.mxu0 (!%p340_p10), %v1768_v3  ;;  %v1997_v14 = vsub.s32 (!%p340_p10), %v1291_v13, %v559_v9  ;;  %v560_v20 = vsub.s32 (!%p340_p10), %v557_v18, %v559_v9 }
  0x18   : > { %1665 = vmatprep.subr.bf16.mxu0 (!%p340_p10), %v1773_v11 }
  0x19   : > { %s390_s30 = scalar_select %p389_p11, %s1845_s14, 1  ;;  %1660 = vmatpush3.bf16.msra.mxu1 %v1771_v5 }
  0x1a   : > { %1701 = vmatprep.subr.bf16.mxu1 %v1773_v11 }
  0x1b   : > { %s1622_s17 = sshll.u32 %s390_s30, 3 }
  0x1c   : > { %s396_s24 = scalar_lea.vmem %s2349_s0, %s1622_s17  ;;  %s406_s27 = scalar_lea.vmem %s2350_s1, %s1622_s17 }
  0x1d   : > { %v1770_v6 = vld [vmem:[%s396_s24] sm:$0xff]   ;;  %s2303_s17 = scalar_lea.sflag [#allocation4], %s385_s26  ;;  %s1779_s24 = sshll.u32 %s1859_s21, 4  ;;  %s1780_s24 = int_to_ptr.vmem [resolvable:$false] %s1779_s24 }
  0x1e   : > { %v1772_v7 = vld [vmem:[%s406_s27] sm:$0xff]   ;;  %1654 = vmatmul.mubr.msk.bf16.vlgmr.msra.gmra.mrb[0].mxu0 %vm442_vm1, %v1770_v6  ;;  %s2256_s27 = sshll.u32 %s385_s26, 4  ;;  %s1781_s25 = scalar_lea.vmem %s1780_s24, 512 }
  0x1f   : > { %1662 = vmatmul.mubr.msk.bf16.vlgmr.msra.gmra.mrb[0].mxu1 %vm442_vm1, %v1772_v7  ;;  %1666 = vmatpush3.bf16.msra.mxu0 %v1773_v11  ;;  %s387_s29 = scalar_lea.vmem [#allocation3], %s2256_s27 }
  0x20   : > { %1703 = vmatpush3.bf16.msra.mxu1 %v1773_v11  ;;  %1667 = vmatprep.subr.bf16.mxu0 %v1774_v15  ;;  %s1476_s30 = sshll.u32 %s387_s29, 4  ;;  %s2299_s30 = int_to_ptr.vmem [resolvable:$true] %s1476_s30 }
  0x21   : > { %1702 = vmatprep.subr.bf16.mxu1 %v1774_v15  ;;  %s1775_s19 = scalar_lea.vmem %s2299_s30, 256  ;;  %p1782_p1 = scmp.lt.s32.totalorder %s2299_s30, %s1780_s24 }
  0x22   : > { %p1776_p12 = scmp.ne.s32.totalorder %s2299_s30, %s1775_s19  ;;  %p1783_p2 = scmp.lt.s32.totalorder %s1781_s25, %s1775_s19 }
  0x23   : > { %1668 = vmatpush3.bf16.msra.mxu0 %v1774_v15 }
  0x24   : > { %1704 = vmatpush3.bf16.msra.mxu1 %v1774_v15  ;;  %p1777_p13 = pnand %p1776_p12, %p1955_p4  ;;  %p1784_p3 = por %p1783_p2, %p1782_p1 }
  0x26   : > { %p1778_p0 = pneg %p1777_p13 }
  0x28   : > { %p1785_p5 = pnand %p1784_p3, %p1778_p0 }
  0xf1   : > { %v480_v21 = vpop.f32.mrb[0].mxu0 }
  0xf2   : > { %v481_v22 = vadd.f32 %v1587_v19, %v480_v21  ;;  %v1655_v23 = vpop.f32.mrb[1].mxu0  ;;  %v2005_v24 = vpop.f32.mrb[0].mxu1 }
  0xf3   : > { %v483_v25 = vpop.f32.mrb[2].mxu0  ;;  %v1663_v26 = vpop.f32.mrb[1].mxu1 }
  0xf4   : > { %v554_v27 = vcombine.high %v481_v22, %v481_v22  ;;  %v561_v28 = vrot.slane %v481_v22, %v560_v20  ;;  %v484_v29 = vadd.f32 %v1587_v19, %v483_v25  ;;  %v1656_v30 = vpop.f32.mrb[3].mxu0  ;;  %v2007_v31 = vpop.f32.mrb[2].mxu1 }
  0xf5   : > { %v1664_v33 = vpop.f32.mrb[3].mxu1 }
  0xf6   : > { %v568_v34 = vrot.slane %v554_v27, %v560_v20  ;;  %v569_v35 = vcombine.high %v561_v28, %v561_v28  ;;  %v577_v36 = vrot.slane %v561_v28, %v560_v20  ;;  %v603_v37 = vcombine.high %v484_v29, %v484_v29 }
  0xf7   : > { %v610_v38 = vrot.slane %v484_v29, %v560_v20 }
  0xf8   : > { %v570_v39 = vcombine.high %v568_v34, %v568_v34  ;;  %v584_v40 = vrot.slane %v568_v34, %v560_v20  ;;  %v591_v41 = vrot.slane %v569_v35, %v560_v20  ;;  %v599_v42 = vcombine.high %v577_v36, %v577_v36 }
  0xf9   : > { %v655_v43 = vrot.slane %v577_v36, %v2009_v32  ;;  %v617_v44 = vrot.slane %v603_v37, %v560_v20  ;;  %v618_v45 = vcombine.high %v610_v38, %v610_v38  ;;  %v626_v46 = vrot.slane %v610_v38, %v560_v20 }
  0xfa   : > { %v2012_v47 = vrot.slane %v570_v39, %v560_v20  ;;  %v600_v48 = vcombine.high %v584_v40, %v584_v40  ;;  %v601_v49 = vcombine.high %v591_v41, %v591_v41  ;;  %v659_v50 = vrot.slane %v591_v41, %v2009_v32 }
  0xfb   : > { %v663_v51 = vrot.slane %v599_v42, %v2009_v32  ;;  %v671_v52 = vrot.slane %v584_v40, %v2009_v32  ;;  %v619_v53 = vcombine.high %v617_v44, %v617_v44  ;;  %v633_v54 = vrot.slane %v617_v44, %v560_v20 }
  0xfc   : > { %v602_v55 = vcombine.high %v2012_v47, %v2012_v47  ;;  %v667_v56 = vrot.slane %v601_v49, %v2009_v32  ;;  %v2022_v57 = vrot.slane %v2012_v47, %v2009_v32  ;;  %v2025_v58 = vrot.slane %v600_v48, %v2009_v32 }
  0xfd   : > { %v640_v59 = vrot.slane %v618_v45, %v560_v20  ;;  %v2027_v60 = vrot.slane %v619_v53, %v560_v20  ;;  %v648_v61 = vcombine.high %v626_v46, %v626_v46  ;;  %v649_v62 = vcombine.high %v633_v54, %v633_v54 }
  0xfe   : > { %v687_v63 = vrot.slane %v626_v46, %v2009_v32  ;;  %v703_v0 = vrot.slane %v633_v54, %v2009_v32  ;;  %v732_v1 = vadd.f32 %v655_v43, %v2005_v24  ;;  %v733_v2 = vadd.f32 %v655_v43, %v2007_v31 }
  0xff   : > { %v650_v3 = vcombine.high %v640_v59, %v640_v59  ;;  %v651_v4 = vcombine.high %v2027_v60, %v2027_v60  ;;  %v691_v5 = vrot.slane %v640_v59, %v2009_v32  ;;  %v695_v6 = vrot.slane %v648_v61, %v2009_v32 }
 0x100   : > { %v2039_v7 = vrot.slane %v2027_v60, %v2009_v32  ;;  %v2042_v8 = vrot.slane %v649_v62, %v2009_v32  ;;  %v764_v9 = vmax.f32 %v732_v1, 0.0  ;;  %v765_v10 = vmax.f32 %v733_v2, 0.0 }
 0x101   : > { %v699_v11 = vrot.slane %v650_v3, %v2009_v32  ;;  %v734_v13 = vadd.f32 %v659_v50, %v2005_v24  ;;  %v735_v15 = vadd.f32 %v659_v50, %v2007_v31  ;;  %v748_v16 = vadd.f32 %v687_v63, %v2005_v24 }
 0x102   : > { %v796_v17 = vpack.c.bf16 %v765_v10, %v764_v9  ;;  %v749_v18 = vadd.f32 %v687_v63, %v2007_v31  ;;  %v736_v19 = vadd.f32 %v663_v51, %v2005_v24  ;;  %v737_v20 = vadd.f32 %v663_v51, %v2007_v31 }
 0x103   : > { %v766_v21 = vmax.f32 %v734_v13, 0.0  ;;  %v767_v22 = vmax.f32 %v735_v15, 0.0  ;;  %v780_v23 = vmax.f32 %v748_v16, 0.0  ;;  %v750_v25 = vadd.f32 %v691_v5, %v2005_v24 }
 0x104   : > { %1669 = vmatprep.mubr.msk.bf16.mxu0 %vm442_vm1, %v796_v17  ;;  %v781_v26 = vmax.f32 %v749_v18, 0.0  ;;  %v768_v27 = vmax.f32 %v736_v19, 0.0  ;;  %v769_v28 = vmax.f32 %v737_v20, 0.0  ;;  %v751_v29 = vadd.f32 %v691_v5, %v2007_v31 }
 0x105   : > { %v797_v30 = vpack.c.bf16 %v767_v22, %v766_v21  ;;  %v782_v33 = vmax.f32 %v750_v25, 0.0  ;;  %v752_v34 = vadd.f32 %v695_v6, %v2005_v24  ;;  %v753_v35 = vadd.f32 %v695_v6, %v2007_v31 }
 0x106   : > { %v804_v36 = vpack.c.bf16 %v781_v26, %v780_v23  ;;  %v798_v37 = vpack.c.bf16 %v769_v28, %v768_v27  ;;  %v783_v38 = vmax.f32 %v751_v29, 0.0  ;;  %v738_v39 = vadd.f32 %v667_v56, %v2005_v24 }
 0x107   : > { %1670 = vmatmul.mubr.msk.bf16.vlgmr.msra.gmra.mrb[4].mxu0 %vm442_vm1, %v797_v30  ;;  %v784_v40 = vmax.f32 %v752_v34, 0.0  ;;  %v785_v41 = vmax.f32 %v753_v35, 0.0  ;;  %v739_v42 = vadd.f32 %v667_v56, %v2007_v31  ;;  %v740_v43 = vadd.f32 %v671_v52, %v2005_v24 }
 0x108   : > { %1685 = vmatprep.mubr.msk.bf16.mxu1 %vm442_vm1, %v804_v36  ;;  %1673 = vmatprep.mubr.msk.bf16.mxu0 %vm442_vm1, %v798_v37  ;;  %v805_v44 = vpack.c.bf16 %v783_v38, %v782_v33  ;;  %v770_v45 = vmax.f32 %v738_v39, 0.0  ;;  %v741_v46 = vadd.f32 %v671_v52, %v2007_v31  ;;  %v754_v48 = vadd.f32 %v699_v11, %v2005_v24 }
 0x109   : > { %v806_v49 = vpack.c.bf16 %v785_v41, %v784_v40  ;;  %v771_v50 = vmax.f32 %v739_v42, 0.0  ;;  %v772_v51 = vmax.f32 %v740_v43, 0.0  ;;  %v755_v53 = vadd.f32 %v699_v11, %v2007_v31  ;;  %v2117_v40 = vld [vmem:[%s2356_s7] ss:$0 sm:$0xff] }
 0x10a   : > { %1686 = vmatmul.mubr.msk.bf16.vlgmr.msra.gmra.mrb[4].mxu1 %vm442_vm1, %v805_v44  ;;  %v773_v54 = vmax.f32 %v741_v46, 0.0  ;;  %v786_v56 = vmax.f32 %v754_v48, 0.0  ;;  %v756_v59 = vadd.f32 %v703_v0, %v2005_v24  ;;  %v757_v61 = vadd.f32 %v703_v0, %v2007_v31 }
 0x10b   : > { %1689 = vmatprep.mubr.msk.bf16.mxu1 %vm442_vm1, %v806_v49  ;;  %v799_v62 = vpack.c.bf16 %v771_v50, %v770_v45  ;;  %v787_v63 = vmax.f32 %v755_v53, 0.0  ;;  %v742_v52 = vadd.f32 %v2022_v57, %v2005_v24  ;;  %v743_v1 = vadd.f32 %v2022_v57, %v2007_v31 }
 0x10c   : > { %v800_v2 = vpack.c.bf16 %v773_v54, %v772_v51  ;;  %v788_v3 = vmax.f32 %v756_v59, 0.0  ;;  %v789_v5 = vmax.f32 %v757_v61, 0.0  ;;  %v744_v6 = vadd.f32 %v2025_v58, %v2005_v24 }
 0x10d   : > { %v807_v9 = vpack.c.bf16 %v787_v63, %v786_v56  ;;  %v774_v10 = vmax.f32 %v742_v52, 0.0  ;;  %v775_v11 = vmax.f32 %v743_v1, 0.0  ;;  %v745_v0 = vadd.f32 %v2025_v58, %v2007_v31 }
 0x10e   : > { %v808_v13 = vpack.c.bf16 %v789_v5, %v788_v3  ;;  %v776_v15 = vmax.f32 %v744_v6, 0.0  ;;  %v758_v16 = vadd.f32 %v2039_v7, %v2005_v24  ;;  %v759_v57 = vadd.f32 %v2039_v7, %v2007_v31 }
 0x10f   : > { %1674 = vmatmul.mubr.msk.bf16.gmra.mrb[8].mxu0 %vm442_vm1, %v799_v62  ;;  %v801_v17 = vpack.c.bf16 %v775_v11, %v774_v10  ;;  %v777_v18 = vmax.f32 %v745_v0, 0.0  ;;  %v760_v19 = vadd.f32 %v2042_v8, %v2005_v24  ;;  %v761_v20 = vadd.f32 %v2042_v8, %v2007_v31 }
 0x110   : > { %1677 = vmatprep.mubr.msk.bf16.mxu0 %vm442_vm1, %v800_v2  ;;  %v790_v58 = vmax.f32 %v758_v16, 0.0  ;;  %v791_v21 = vmax.f32 %v759_v57, 0.0  ;;  %v683_v22 = vrot.slane %v602_v55, %v2009_v32  ;;  %v715_v7 = vrot.slane %v651_v4, %v2009_v32 }
 0x111   : > { %v802_v23 = vpack.c.bf16 %v777_v18, %v776_v15  ;;  %v792_v25 = vmax.f32 %v760_v19, 0.0  ;;  %v793_v26 = vmax.f32 %v761_v20, 0.0 }
 0x112   : > { %1690 = vmatmul.mubr.msk.bf16.gmra.mrb[8].mxu1 %vm442_vm1, %v807_v9  ;;  %v809_v8 = vpack.c.bf16 %v791_v21, %v790_v58  ;;  %v746_v27 = vadd.f32 %v683_v22, %v2005_v24  ;;  %v747_v28 = vadd.f32 %v683_v22, %v2007_v31  ;;  %v762_v29 = vadd.f32 %v715_v7, %v2005_v24 }
 0x113   : > { %1693 = vmatprep.mubr.msk.bf16.mxu1 %vm442_vm1, %v808_v13  ;;  %v810_v47 = vpack.c.bf16 %v793_v26, %v792_v25  ;;  %v763_v55 = vadd.f32 %v715_v7, %v2007_v31  ;;  %v1858_v24 = vmov 0   ;;  %v2110_v31 = vld [vmem:[%s2355_s6] ss:$0 sm:$0xff] }
 0x114   : > { %v778_v30 = vmax.f32 %v746_v27, 0.0  ;;  %v779_v60 = vmax.f32 %v747_v28, 0.0  ;;  %v794_v32 = vmax.f32 %v762_v29, 0.0  ;;  %1766 = vset.pattern.permute.xlu0 %v1858_v24 }
 0x115   : > { %v795_v4 = vmax.f32 %v763_v55, 0.0 }
 0x116   : > { %v803_v33 = vpack.c.bf16 %v779_v60, %v778_v30 }
 0x117   : > { %1678 = vmatmul.mubr.msk.bf16.gmra.mrb[12].mxu0 %vm442_vm1, %v801_v17  ;;  %v811_v34 = vpack.c.bf16 %v795_v4, %v794_v32 }
 0x118   : > { %1681 = vmatprep.mubr.msk.bf16.mxu0 %vm442_vm1, %v802_v23 }
 0x11a   : > { %1694 = vmatmul.mubr.msk.bf16.gmra.mrb[12].mxu1 %vm442_vm1, %v809_v8 }
 0x11b   : > { %1697 = vmatprep.mubr.msk.bf16.mxu1 %vm442_vm1, %v810_v47 }
 0x11f   : > { %1682 = vmatmul.mubr.msk.bf16.gmra.mrb[16].mxu0 %vm442_vm1, %v803_v33 }
 0x122   : > { %1698 = vmatmul.mubr.msk.bf16.gmra.mrb[16].mxu1 %vm442_vm1, %v811_v34 }
 0x1da   : > { %v1671_v35 = vpop.f32.mrb[4].mxu0 }
 0x1db   : > { %v926_v36 = vadd.f32 %v1671_v35, %v2110_v31  ;;  %v917_v37 = vpop.f32.mrb[5].mxu0 }
 0x1dc   : > { %v918_v38 = vadd.f32 %v2110_v31, %v917_v37  ;;  %v1672_v39 = vpop.f32.mrb[6].mxu0 }
 0x1dd   : > { %v1046_v41 = vmax.f32 %v926_v36, 0.0  ;;  %v929_v42 = vadd.f32 %v1672_v39, %v2110_v31  ;;  %v1687_v43 = vpop.f32.mrb[4].mxu1  ;;  %v920_v44 = vpop.f32.mrb[7].mxu0 }
 0x1de   : > { %v1044_v45 = vmax.f32 %v918_v38, 0.0  ;;  %v990_v46 = vadd.f32 %v1687_v43, %v2110_v31  ;;  %v921_v48 = vadd.f32 %v2110_v31, %v920_v44  ;;  %v981_v49 = vpop.f32.mrb[5].mxu1 }
 0x1df   : > { %v1047_v50 = vmax.f32 %v929_v42, 0.0  ;;  %v1688_v51 = vpop.f32.mrb[6].mxu1  ;;  %v1085_v53 = vmul.f32 %v2117_v40, %v1046_v41  ;;  %v982_v62 = vadd.f32 %v2110_v31, %v981_v49 }
 0x1e0   : > { %v1062_v54 = vmax.f32 %v990_v46, 0.0  ;;  %v993_v56 = vadd.f32 %v1688_v51, %v2110_v31  ;;  %v984_v59 = vpop.f32.mrb[7].mxu1  ;;  %v1083_v61 = vmul.f32 %v2117_v40, %v1044_v45  ;;  %v1045_v2 = vmax.f32 %v921_v48, 0.0 }
 0x1e1   : > { %v985_v63 = vadd.f32 %v2110_v31, %v984_v59  ;;  %v1121_v52 = vsel %vm442_vm1, %v1085_v53, 0.0  ;;  %v1086_v1 = vmul.f32 %v2117_v40, %v1047_v50  ;;  %v1060_v18 = vmax.f32 %v982_v62, 0.0 }
 0x1e2   : > { %v1063_v3 = vmax.f32 %v993_v56, 0.0  ;;  %1122 = vadd.xlane.f32.xlu1 %v1121_v52  ;;  %v1675_v5 = vpop.f32.mrb[8].mxu0  ;;  %v1115_v6 = vsel %vm442_vm1, %v1083_v61, 0.0  ;;  %v1101_v9 = vmul.f32 %v2117_v40, %v1062_v54  ;;  %v1084_v21 = vmul.f32 %v2117_v40, %v1045_v2 }
 0x1e3   : > { %v933_v10 = vpop.f32.mrb[9].mxu0  ;;  %1116 = vadd.xlane.f32.xlu0 %v1115_v6  ;;  %v1061_v0 = vmax.f32 %v985_v63, 0.0  ;;  %v1124_v57 = vsel %vm442_vm1, %v1086_v1, 0.0  ;;  %v942_v19 = vadd.f32 %v1675_v5, %v2110_v31  ;;  %v1099_v55 = vmul.f32 %v2117_v40, %v1060_v18 }
 0x1e4   : > { %v1676_v11 = vpop.f32.mrb[10].mxu0  ;;  %v1102_v17 = vmul.f32 %v2117_v40, %v1063_v3  ;;  %v1169_v58 = vsel %vm442_vm1, %v1101_v9, 0.0  ;;  %v934_v28 = vadd.f32 %v2110_v31, %v933_v10  ;;  %v1118_v47 = vsel %vm442_vm1, %v1084_v21, 0.0 }
 0x1e5   : > { %v945_v13 = vadd.f32 %v1676_v11, %v2110_v31  ;;  %v1691_v15 = vpop.f32.mrb[8].mxu1  ;;  %v936_v16 = vpop.f32.mrb[11].mxu0  ;;  %v1100_v8 = vmul.f32 %v2117_v40, %v1061_v0  ;;  %v1050_v27 = vmax.f32 %v942_v19, 0.0  ;;  %v1163_v39 = vsel %vm442_vm1, %v1099_v55, 0.0 }
 0x1e6   : > { %v997_v20 = vpop.f32.mrb[9].mxu1  ;;  %1125 = vadd.xlane.f32.xlu1 %v1124_v57  ;;  %v937_v25 = vadd.f32 %v2110_v31, %v936_v16  ;;  %v1172_v26 = vsel %vm442_vm1, %v1102_v17, 0.0  ;;  %v1048_v36 = vmax.f32 %v934_v28, 0.0  ;;  %v1006_v37 = vadd.f32 %v1691_v15, %v2110_v31 }
 0x1e7   : > { %v1692_v22 = vpop.f32.mrb[10].mxu1  ;;  %1170 = vadd.xlane.f32.xlu0 %v1169_v58  ;;  %v1051_v23 = vmax.f32 %v945_v13, 0.0  ;;  %v1166_v24 = vsel %vm442_vm1, %v1100_v8, 0.0  ;;  %v1089_v41 = vmul.f32 %v2117_v40, %v1050_v27  ;;  %v998_v50 = vadd.f32 %v2110_v31, %v997_v20 }
 0x1e8   : > { %v1000_v7 = vpop.f32.mrb[11].mxu1  ;;  %v1049_v32 = vmax.f32 %v937_v25, 0.0  ;;  %v1009_v4 = vadd.f32 %v1692_v22, %v2110_v31  ;;  %v1066_v49 = vmax.f32 %v1006_v37, 0.0  ;;  %v1087_v54 = vmul.f32 %v2117_v40, %v1048_v36 }
 0x1e9   : > { %v1090_v35 = vmul.f32 %v2117_v40, %v1051_v23  ;;  %v1001_v45 = vadd.f32 %v2110_v31, %v1000_v7  ;;  %v1133_v53 = vsel %vm442_vm1, %v1089_v41, 0.0  ;;  %v1064_v3 = vmax.f32 %v998_v50, 0.0 }
 0x1ea   : > { %1173 = vadd.xlane.f32.xlu1 %v1172_v26  ;;  %v1679_v29 = vpop.f32.mrb[12].mxu0  ;;  %v1067_v44 = vmax.f32 %v1009_v4, 0.0  ;;  %v1088_v48 = vmul.f32 %v2117_v40, %v1049_v32  ;;  %v1127_v9 = vsel %vm442_vm1, %v1087_v54, 0.0  ;;  %v1105_v10 = vmul.f32 %v2117_v40, %v1066_v49 }
 0x1eb   : > { %v949_v30 = vpop.f32.mrb[13].mxu0  ;;  %1119 = vadd.xlane.f32.xlu0 %v1118_v47  ;;  %v1136_v46 = vsel %vm442_vm1, %v1090_v35, 0.0  ;;  %v1065_v61 = vmax.f32 %v1001_v45, 0.0  ;;  %v958_v5 = vadd.f32 %v1679_v29, %v2110_v31  ;;  %v1103_v20 = vmul.f32 %v2117_v40, %v1064_v3 }
 0x1ec   : > { %v1680_v60 = vpop.f32.mrb[14].mxu0  ;;  %v1130_v1 = vsel %vm442_vm1, %v1088_v48, 0.0  ;;  %v1106_v2 = vmul.f32 %v2117_v40, %v1067_v44  ;;  %v950_v18 = vadd.f32 %v2110_v31, %v949_v30  ;;  %v1181_v19 = vsel %vm442_vm1, %v1105_v10, 0.0 }
 0x1ed   : > { %v1695_v33 = vpop.f32.mrb[12].mxu1  ;;  %v952_v34 = vpop.f32.mrb[15].mxu0  ;;  %v961_v62 = vadd.f32 %v1680_v60, %v2110_v31  ;;  %v1104_v57 = vmul.f32 %v2117_v40, %v1065_v61  ;;  %v1054_v17 = vmax.f32 %v958_v5, 0.0  ;;  %v1175_v26 = vsel %vm442_vm1, %v1103_v20, 0.0  ;;  %v1616_v20 = vld [vmem:[#allocation2] ss:$0 sm:$0xff] }
 0x1ee   : > { %v1013_v38 = vpop.f32.mrb[13].mxu1  ;;  %1167 = vadd.xlane.f32.xlu1 %v1166_v24  ;;  %v953_v15 = vadd.f32 %v2110_v31, %v952_v34  ;;  %v1184_v16 = vsel %vm442_vm1, %v1106_v2, 0.0  ;;  %v1052_v23 = vmax.f32 %v950_v18, 0.0  ;;  %v1022_v25 = vadd.f32 %v1695_v33, %v2110_v31 }
 0x1ef   : > { %v1696_v42 = vpop.f32.mrb[14].mxu1  ;;  %1164 = vadd.xlane.f32.xlu0 %v1163_v39  ;;  %v1055_v13 = vmax.f32 %v961_v62, 0.0  ;;  %v1178_v22 = vsel %vm442_vm1, %v1104_v57, 0.0  ;;  %v1093_v8 = vmul.f32 %v2117_v40, %v1054_v17  ;;  %v1014_v30 = vadd.f32 %v2110_v31, %v1013_v38 }
 0x1f0   : > { %v1016_v43 = vpop.f32.mrb[15].mxu1  ;;  %v1053_v58 = vmax.f32 %v953_v15, 0.0  ;;  %v1025_v21 = vadd.f32 %v1696_v42, %v2110_v31  ;;  %v1070_v55 = vmax.f32 %v1022_v25, 0.0  ;;  %v1091_v32 = vmul.f32 %v2117_v40, %v1052_v23 }
 0x1f1   : > { %v1094_v7 = vmul.f32 %v2117_v40, %v1055_v13  ;;  %v1017_v28 = vadd.f32 %v2110_v31, %v1016_v43  ;;  %v1145_v60 = vsel %vm442_vm1, %v1093_v8, 0.0  ;;  %v1068_v35 = vmax.f32 %v1014_v30, 0.0 }
 0x1f2   : > { %1137 = vadd.xlane.f32.xlu1 %v1136_v46  ;;  %v1683_v51 = vpop.f32.mrb[16].mxu0  ;;  %v1071_v27 = vmax.f32 %v1025_v21, 0.0  ;;  %v1092_v47 = vmul.f32 %v2117_v40, %v1053_v58  ;;  %v1139_v37 = vsel %vm442_vm1, %v1091_v32, 0.0  ;;  %v1109_v38 = vmul.f32 %v2117_v40, %v1070_v55 }
 0x1f3   : > { %v2155_v56 = vpop.f32.mrb[17].mxu0  ;;  %1134 = vadd.xlane.f32.xlu0 %v1133_v53  ;;  %v1148_v29 = vsel %vm442_vm1, %v1094_v7, 0.0  ;;  %v1069_v4 = vmax.f32 %v1017_v28, 0.0  ;;  %v974_v36 = vadd.f32 %v1683_v51, %v2110_v31  ;;  %v1107_v48 = vmul.f32 %v2117_v40, %v1068_v35 }
 0x1f4   : > { %v1684_v59 = vpop.f32.mrb[18].mxu0  ;;  %v1142_v34 = vsel %vm442_vm1, %v1092_v47, 0.0  ;;  %v1110_v24 = vmul.f32 %v2117_v40, %v1071_v27  ;;  %v966_v45 = vadd.f32 %v2110_v31, %v2155_v56  ;;  %v1193_v46 = vsel %vm442_vm1, %v1109_v38, 0.0 }
 0x1f5   : > { %v2158_v63 = vpop.f32.mrb[16].mxu1  ;;  %v968_v52 = vpop.f32.mrb[19].mxu0  ;;  %v977_v33 = vadd.f32 %v1684_v59, %v2110_v31  ;;  %v1108_v43 = vmul.f32 %v2117_v40, %v1069_v4  ;;  %v1058_v44 = vmax.f32 %v974_v36, 0.0  ;;  %v1187_v56 = vsel %vm442_vm1, %v1107_v48, 0.0 }
 0x1f6   : > { %v2163_v6 = vpop.f32.mrb[17].mxu1  ;;  %1131 = vadd.xlane.f32.xlu1 %v1130_v1  ;;  %v969_v41 = vadd.f32 %v2110_v31, %v968_v52  ;;  %v1196_v42 = vsel %vm442_vm1, %v1110_v24, 0.0  ;;  %v1056_v54 = vmax.f32 %v966_v45, 0.0  ;;  %v1038_v59 = vadd.f32 %v2158_v63, %v2110_v31 }
 0x1f7   : > { %v2167_v11 = vpop.f32.mrb[18].mxu1  ;;  %1128 = vadd.xlane.f32.xlu0 %v1127_v9  ;;  %v1059_v39 = vmax.f32 %v977_v33, 0.0  ;;  %v1190_v51 = vsel %vm442_vm1, %v1108_v43, 0.0  ;;  %v1097_v61 = vmul.f32 %v2117_v40, %v1058_v44  ;;  %v1030_v5 = vadd.f32 %v2110_v31, %v2163_v6 }
 0x1f8   : > { %v1032_v0 = vpop.f32.mrb[19].mxu1  ;;  %v1057_v49 = vmax.f32 %v969_v41, 0.0  ;;  %v1041_v62 = vadd.f32 %v2167_v11, %v2110_v31  ;;  %v1074_v3 = vmax.f32 %v1038_v59, 0.0  ;;  %v1095_v9 = vmul.f32 %v2117_v40, %v1056_v54 }
 0x1f9   : > { %v1033_v50 = vadd.f32 %v2110_v31, %v1032_v0  ;;  %v1098_v53 = vmul.f32 %v2117_v40, %v1059_v39  ;;  %v1157_v63 = vsel %vm442_vm1, %v1097_v61, 0.0  ;;  %v1072_v13 = vmax.f32 %v1030_v5, 0.0 }
 0x1fa   : > { %1185 = vadd.xlane.f32.xlu1 %v1184_v16  ;;  %v1096_v2 = vmul.f32 %v2117_v40, %v1057_v49  ;;  %v1075_v10 = vmax.f32 %v1041_v62, 0.0  ;;  %v1151_v15 = vsel %vm442_vm1, %v1095_v9, 0.0  ;;  %v1113_v16 = vmul.f32 %v2117_v40, %v1074_v3 }
 0x1fb   : > { %1182 = vadd.xlane.f32.xlu0 %v1181_v19  ;;  %v1073_v52 = vmax.f32 %v1033_v50, 0.0  ;;  %v1160_v1 = vsel %vm442_vm1, %v1098_v53, 0.0  ;;  %v1111_v17 = vmul.f32 %v2117_v40, %v1072_v13 }
 0x1fc   : > { %v1154_v0 = vsel %vm442_vm1, %v1096_v2, 0.0  ;;  %v1114_v6 = vmul.f32 %v2117_v40, %v1075_v10  ;;  %v1205_v57 = vsel %vm442_vm1, %v1113_v16, 0.0 }
 0x1fd   : > { %v1112_v11 = vmul.f32 %v2117_v40, %v1073_v52  ;;  %v1199_v19 = vsel %vm442_vm1, %v1111_v17, 0.0 }
 0x1fe   : > { %1179 = vadd.xlane.f32.xlu1 %v1178_v22  ;;  %v1208_v18 = vsel %vm442_vm1, %v1114_v6, 0.0 }
 0x1ff   : > { %1176 = vadd.xlane.f32.xlu0 %v1175_v26  ;;  %v1202_v31 = vsel %vm442_vm1, %v1112_v11, 0.0 }
 0x202   : > { %1149 = vadd.xlane.f32.xlu1 %v1148_v29 }
 0x203   : > { %1146 = vadd.xlane.f32.xlu0 %v1145_v60 }
 0x206   : > { %1143 = vadd.xlane.f32.xlu1 %v1142_v34 }
 0x207   : > { %1140 = vadd.xlane.f32.xlu0 %v1139_v37 }
 0x20a   : > { %1197 = vadd.xlane.f32.xlu1 %v1196_v42 }
 0x20b   : > { %1194 = vadd.xlane.f32.xlu0 %v1193_v46 }
 0x20e   : > { %1191 = vadd.xlane.f32.xlu1 %v1190_v51 }
 0x20f   : > { %1188 = vadd.xlane.f32.xlu0 %v1187_v56 }
 0x212   : > { %1161 = vadd.xlane.f32.xlu1 %v1160_v1 }
 0x213   : > { %1158 = vadd.xlane.f32.xlu0 %v1157_v63 }
 0x216   : > { %1155 = vadd.xlane.f32.xlu1 %v1154_v0 }
 0x217   : > { %1152 = vadd.xlane.f32.xlu0 %v1151_v15 }
 0x21a   : > { %1203 = vadd.xlane.f32.xlu1 %v1202_v31 }
 0x21b   : > { %1206 = vadd.xlane.f32.xlu0 %v1205_v57 }
 0x21e   : > { %1209 = vadd.xlane.f32.xlu1 %v1208_v18 }
 0x21f   : > { %1200 = vadd.xlane.f32.xlu0 %v1199_v19 }
 0x235   : > { %1218 = vperm.xlu0 %1766, %v1616_v20  }
 0x26f   : > { %v1123_v58 = vpop.xlane.xlu1 %1122 }
 0x270   : > { %v1117_v21 = vpop.xlane.xlu0 %1116 }
 0x273   : > { %v1126_v22 = vpop.xlane.xlu1 %1125 }
 0x274   : > { %v1171_v7 = vpop.xlane.xlu0 %1170 }
 0x277   : > { %v1174_v23 = vpop.xlane.xlu1 %1173 }
 0x278   : > { %v1120_v25 = vpop.xlane.xlu0 %1119 }
 0x27b   : > { %v1168_v26 = vpop.xlane.xlu1 %1167 }
 0x27c   : > { %v1165_v8 = vpop.xlane.xlu0 %1164 }
 0x27f   : > { %v1138_v27 = vpop.xlane.xlu1 %1137 }
 0x280   : > { %v1135_v28 = vpop.xlane.xlu0 %1134 }
 0x283   : > { %v1132_v40 = vpop.xlane.xlu1 %1131 }
 0x284   : > { %v1129_v29 = vpop.xlane.xlu0 %1128 }
 0x287   : > { %v1186_v47 = vpop.xlane.xlu1 %1185 }
 0x288   : > { %v1183_v55 = vpop.xlane.xlu0 %1182 }
 0x28b   : > { %v1180_v30 = vpop.xlane.xlu1 %1179 }
 0x28c   : > { %v1177_v60 = vpop.xlane.xlu0 %1176 }
 0x28f   : > { %v1150_v4 = vpop.xlane.xlu1 %1149 }
 0x290   : > { %v1147_v32 = vpop.xlane.xlu0 %1146 }
 0x293   : > { %v1144_v34 = vpop.xlane.xlu1 %1143 }
 0x294   : > { %v1141_v33 = vpop.xlane.xlu0 %1140 }
 0x297   : > { %v1198_v36 = vpop.xlane.xlu1 %1197 }
 0x298   : > { %v1195_v24 = vpop.xlane.xlu0 %1194 }
 0x29b   : > { %v1192_v38 = vpop.xlane.xlu1 %1191 }
 0x29c   : > { %v1189_v35 = vpop.xlane.xlu0 %1188 }
 0x29f   : > { %v1162_v41 = vpop.xlane.xlu1 %1161 }
 0x2a0   : > { %v1159_v37 = vpop.xlane.xlu0 %1158 }
 0x2a3   : > { %v1156_v43 = vpop.xlane.xlu1 %1155 }
 0x2a4   : > { %v1153_v39 = vpop.xlane.xlu0 %1152 }
 0x2a7   : > { %v1204_v46 = vpop.xlane.xlu1 %1203 }
 0x2a8   : > { %v1207_v42 = vpop.xlane.xlu0 %1206 }
 0x2ab   : > { %v1210_v6 = vpop.xlane.xlu1 %1209 }
 0x2ac   : > { %v1201_v44 = vpop.xlane.xlu0 %1200 }
 0x2b4   : > { %v1219_v45 = vpop.permute.xlu0 %1218 }
 0x2b5   : > { %v1221_v48 = vadd.f32 %v1219_v45, %v1117_v21  ;;  %v1222_v49 = vadd.f32 %v1219_v45, %v1120_v25  ;;  %v1223_v50 = vadd.f32 %v1219_v45, %v1123_v58  ;;  %v1224_v51 = vadd.f32 %v1219_v45, %v1126_v22 }
 0x2b6   : > { %v1225_v53 = vadd.f32 %v1219_v45, %v1129_v29  ;;  %v1226_v54 = vadd.f32 %v1219_v45, %v1132_v40  ;;  %v1227_v59 = vadd.f32 %v1219_v45, %v1135_v28  ;;  %v1228_v56 = vadd.f32 %v1219_v45, %v1138_v27 }
 0x2b7   : > { %v1229_v61 = vadd.f32 %v1219_v45, %v1141_v33  ;;  %v1230_v62 = vadd.f32 %v1219_v45, %v1144_v34  ;;  %v1231_v52 = vadd.f32 %v1219_v45, %v1147_v32  ;;  %v1232_v1 = vadd.f32 %v1219_v45, %v1150_v4 }
 0x2b8   : > { %v1233_v2 = vadd.f32 %v1219_v45, %v1153_v39  ;;  %v1234_v3 = vadd.f32 %v1219_v45, %v1156_v43  ;;  %v1235_v5 = vadd.f32 %v1219_v45, %v1159_v37  ;;  %v1236_v63 = vadd.f32 %v1219_v45, %v1162_v41 }
 0x2b9   : > { %v1237_v9 = vadd.f32 %v1219_v45, %v1165_v8  ;;  %v1238_v10 = vadd.f32 %v1219_v45, %v1168_v26  ;;  %v1239_v0 = vadd.f32 %v1219_v45, %v1171_v7  ;;  %v1240_v11 = vadd.f32 %v1219_v45, %v1174_v23 }
 0x2ba   : > { %v1241_v13 = vadd.f32 %v1219_v45, %v1177_v60  ;;  %v1242_v15 = vadd.f32 %v1219_v45, %v1180_v30  ;;  %v1243_v16 = vadd.f32 %v1219_v45, %v1183_v55  ;;  %v1244_v31 = vadd.f32 %v1219_v45, %v1186_v47 }
 0x2bb   : > { %v1245_v57 = vadd.f32 %v1219_v45, %v1189_v35  ;;  %v1246_v17 = vadd.f32 %v1219_v45, %v1192_v38  ;;  %v1247_v18 = vadd.f32 %v1219_v45, %v1195_v24  ;;  %v1248_v19 = vadd.f32 %v1219_v45, %v1198_v36 }
 0x2bc   : > { %v1249_v20 = vadd.f32 %v1219_v45, %v1201_v44  ;;  %v1250_v58 = vadd.f32 %v1219_v45, %v1204_v46  ;;  %v2225_v21 = vadd.f32 %v1219_v45, %v1207_v42  ;;  %v2227_v22 = vadd.f32 %v1219_v45, %v1210_v6 }
 0x2bd   : > { %v1290_v25 = vrot.slane %v1221_v48, %v1995_v12  ;;  %v1295_v7 = vrot.slane %v1222_v49, %v1997_v14  ;;  %v1301_v23 = vrot.slane %v1223_v50, %v1995_v12  ;;  %v1305_v26 = vrot.slane %v1224_v51, %v1997_v14 }
 0x2be   : > { %v1310_v8 = vrot.slane %v1225_v53, %v1995_v12  ;;  %v1314_v27 = vrot.slane %v1226_v54, %v1997_v14  ;;  %v1319_v28 = vrot.slane %v1227_v59, %v1995_v12  ;;  %v1323_v40 = vrot.slane %v1228_v56, %v1997_v14 }
 0x2bf   : > { %v1297_v29 = vsel %vm1296_vm2, %v1295_v7, %v1290_v25  ;;  %v1306_v47 = vsel %vm1296_vm2, %v1305_v26, %v1301_v23  ;;  %v1328_v55 = vrot.slane %v1229_v61, %v1995_v12  ;;  %v1332_v30 = vrot.slane %v1230_v62, %v1997_v14 }
 0x2c0   : > { %v1315_v60 = vsel %vm1296_vm2, %v1314_v27, %v1310_v8  ;;  %v1324_v32 = vsel %vm1296_vm2, %v1323_v40, %v1319_v28  ;;  %v1337_v4 = vrot.slane %v1231_v52, %v1995_v12  ;;  %v1341_v33 = vrot.slane %v1232_v1, %v1997_v14 }
 0x2c1   : > { %v1333_v34 = vsel %vm1296_vm2, %v1332_v30, %v1328_v55  ;;  %v1346_v24 = vrot.slane %v1233_v2, %v1995_v12  ;;  %v1350_v35 = vrot.slane %v1234_v3, %v1997_v14  ;;  %v1355_v36 = vrot.slane %v1235_v5, %v1995_v12 }
 0x2c2   : > { %v1342_v37 = vsel %vm1296_vm2, %v1341_v33, %v1337_v4  ;;  %v1359_v38 = vrot.slane %v1236_v63, %v1997_v14  ;;  %v1364_v39 = vrot.slane %v1237_v9, %v1995_v12  ;;  %v1368_v41 = vrot.slane %v1238_v10, %v1997_v14 }
 0x2c3   : > { %v1351_v42 = vsel %vm1296_vm2, %v1350_v35, %v1346_v24  ;;  %v1373_v43 = vrot.slane %v1239_v0, %v1995_v12  ;;  %v1377_v44 = vrot.slane %v1240_v11, %v1997_v14  ;;  %v1382_v45 = vrot.slane %v1241_v13, %v1995_v12 }
 0x2c4   : > { %v1360_v46 = vsel %vm1296_vm2, %v1359_v38, %v1355_v36  ;;  %v1369_v48 = vsel %vm1296_vm2, %v1368_v41, %v1364_v39  ;;  %v1386_v49 = vrot.slane %v1242_v15, %v1997_v14  ;;  %v1391_v50 = vrot.slane %v1243_v16, %v1995_v12 }
 0x2c5   : > { %v1378_v51 = vsel %vm1296_vm2, %v1377_v44, %v1373_v43  ;;  %v1395_v53 = vrot.slane %v1244_v31, %v1997_v14  ;;  %v1400_v54 = vrot.slane %v1245_v57, %v1995_v12  ;;  %v1404_v59 = vrot.slane %v1246_v17, %v1997_v14 }
 0x2c6   : > { %v1387_v56 = vsel %vm1296_vm2, %v1386_v49, %v1382_v45  ;;  %v1409_v61 = vrot.slane %v1247_v18, %v1995_v12  ;;  %v1413_v62 = vrot.slane %v1248_v19, %v1997_v14  ;;  %v1418_v52 = vrot.slane %v1249_v20, %v1995_v12 }
 0x2c7   : > { %v1396_v1 = vsel %vm1296_vm2, %v1395_v53, %v1391_v50  ;;  %v1405_v2 = vsel %vm1296_vm2, %v1404_v59, %v1400_v54  ;;  %v1422_v3 = vrot.slane %v1250_v58, %v1997_v14  ;;  %v1427_v5 = vrot.slane %v2225_v21, %v1995_v12 }
 0x2c8   : > { %v1414_v63 = vsel %vm1296_vm2, %v1413_v62, %v1409_v61  ;;  %v1431_v9 = vrot.slane %v2227_v22, %v1997_v14  ;;  %v1434_v10 = vsel %vm1433_vm3, %v1306_v47, %v1297_v29  ;;  %v1447_v0 = vsel %vm1433_vm3, %v1378_v51, %v1369_v48 }
 0x2c9   : > { %v1423_v11 = vsel %vm1296_vm2, %v1422_v3, %v1418_v52  ;;  %v1436_v13 = vsel %vm1435_vm4, %v1315_v60, %v1434_v10  ;;  %v1448_v15 = vsel %vm1435_vm4, %v1387_v56, %v1447_v0 }
 0x2ca   : > { %v1432_v12 = vsel %vm1296_vm2, %v1431_v9, %v1427_v5  ;;  %v1438_v16 = vsel %vm1437_vm5, %v1324_v32, %v1436_v13  ;;  %v1449_v14 = vsel %vm1437_vm5, %v1396_v1, %v1448_v15 }
 0x2cb   : > { %v1440_v31 = vsel %vm1439_vm6, %v1333_v34, %v1438_v16  ;;  %v1450_v6 = vsel %vm1439_vm6, %v1405_v2, %v1449_v14 }
 0x2cc   : > { %v1442_v57 = vsel %vm1441_vm7, %v1342_v37, %v1440_v31  ;;  %v1451_v17 = vsel %vm1441_vm7, %v1414_v63, %v1450_v6 }
 0x2cd   : > { %v1444_v18 = vsel %vm1443_vm8, %v1351_v42, %v1442_v57  ;;  %v1452_v19 = vsel %vm1443_vm8, %v1423_v11, %v1451_v17 }
 0x2ce   : > { %v1446_v20 = vsel %vm1445_vm9, %v1360_v46, %v1444_v18  ;;  %v1453_v58 = vsel %vm1445_vm9, %v1432_v12, %v1452_v19 }
 0x2cf   : > { %1457 = vst.msk [vmem:[%s387_s29] sm:$0xff] %vm1456_vm10, %v1446_v20  ;;  %1458 = vst.msk [vmem:[%s387_s29 + $0x8] sm:$0xff] %vm1456_vm10, %v1453_v58 }
 0x2d0   : > { %1788 = shalt.err (!%p1785_p5)
}
 0x2d1   : > { %s1789_s26 = scalar_lea.hbm %s2297_s8, 256  ;;  %s1793_s29 = scalar_lea.hbm %s2358_s9, 512 }
 0x2d2   : > { %p1790_p6 = scmp.ne.s32.totalorder %s2297_s8, %s1789_s26  ;;  %p1794_p10 = scmp.lt.u32.totalorder %s2297_s8, %s2358_s9 }
 0x2d3   : > { %p1795_p11 = scmp.lt.u32.totalorder %s1793_s29, %s1789_s26  ;;  %p1797_p13 = scmp.lt.u32.totalorder %s1789_s26, %s2297_s8 }
 0x2d4   : > { %p1791_p7 = pnand %p1790_p6, %p1955_p4 }
 0x2d5   : > { %p1796_p12 = por %p1795_p11, %p1794_p10 }
 0x2d6   : > { %p1792_p9 = pneg %p1791_p7 }
 0x2d7   : > { %p1798_p0 = por %p1797_p13, %p1796_p12 }
 0x2d9   : > { %p1799_p1 = pnand %p1798_p0, %p1792_p9 }
 0x2db   : > { %1802 = shalt.err (!%p1799_p1)
}
 0x2dc   : > { %s1860_s19 = smov 128   ;;  %s1861_s21 = smov 8  }
 0x2dd   : > { %1705 = dma.vmem_to_hbm [thread:$0]  (%p1955_p4), %s2299_s30, 256, %s2297_s8, %s2303_s17, %s1860_s19, %s1860_s19, %s1861_s21  }
 0x2de PF: > { %p1711_p2 = scmp.ge.s32.totalorder %s1853_s16, 2  ;;  %s1491_s24 = sand.u32 1, %s1833_s11  }
 0x2df   : > { %s1492_s25 = scalar_lea.sflag [#allocation4], %s1491_s24 }
 0x2e0   : > { %p1708_p3 = pnand %p1711_p2, %p1962_p8 }
 0x2e2   : > { %1828 = dma.done.wait (!%p1708_p3), %s1492_s25, 256  }
 0x2e3   : > { %1830 = vsyncadd (!%p1708_p3), %s1492_s25, 4294967040  ;;  %s24_s16 = sadd.s32 1, %s1853_s16   ;;  %s2361_s11 = smov %s1837_s12 }
 0x2e4   : > { %p21_p5 = scmp.ge.s32.totalorder %s24_s16, 4   ;;  %s2362_s12 = smov %s1841_s13 }
 0x2e5   : > { %s2363_s13 = smov %s1968_s23  ;;  %s2364_s14 = smov %s1849_s15 }
 0x2e6   : > { %s2365_s15 = smov %s2367_s18  ;;  %23 = sbr.rel (!%p21_p5) target bundleno = 7 (0x7), region = 94 }
 0x2ed   :  { %1497 = vsyncpa [#allocation4], 1 }
 0x2ee   :  { %1499 = vsyncpa [#allocation4 + $0x1], 1 }

// kernel: _lambda_.2
= control target key start
LH: loop header
LB: loop body
LE: loop exit
PB: predicated region body
PF: predicated region fallthrough
CT: control target
= control target key end

     0   :  { %s4523_s0 = inlined_call_operand.vmem [shape: f32[2,16,3], index: 0, kind: input, shape index: {}]   ;;  %s4524_s1 = inlined_call_operand.vmem [shape: f32[2,16,3], index: 1, kind: input, shape index: {}]   ;;  %s4525_s2 = inlined_call_operand.vmem [shape: f32[2,1,32], index: 2, kind: input, shape index: {}]   ;;  %s4526_s3 = inlined_call_operand.vmem [shape: f32[2,3,64], index: 3, kind: input, shape index: {}]   ;;  %s4527_s4 = inlined_call_operand.vmem [shape: f32[2,1,64], index: 4, kind: input, shape index: {}]   ;;  %s4528_s5 = inlined_call_operand.vmem [shape: bf16[2,64,64], index: 5, kind: input, shape index: {}]   ;;  %s4529_s6 = inlined_call_operand.vmem [shape: f32[2,1,64], index: 6, kind: input, shape index: {}]   ;;  %s4530_s7 = inlined_call_operand.vmem [shape: bf16[2,64,32], index: 7, kind: input, shape index: {}]   ;;  %s4531_s8 = inlined_call_operand.hbm [shape: f32[2,1,32], index: 8, kind: input, shape index: {}]   ;;  %s4532_s9 = inlined_call_operand.vmem [shape: bf16[8,32,32], index: 9, kind: input, shape index: {}]   ;;  %s4533_s10 = inlined_call_operand.vmem [shape: bf16[8,32,32], index: 10, kind: input, shape index: {}]   ;;  %s4534_s11 = inlined_call_operand.vmem [shape: bf16[8,32,32], index: 11, kind: input, shape index: {}]   ;;  %s4535_s12 = inlined_call_operand.vmem [shape: bf16[8,32,32], index: 12, kind: input, shape index: {}]   ;;  %s4536_s13 = inlined_call_operand.hbm [shape: bf16[8,32,64], index: 13, kind: input, shape index: {}]   ;;  %s4537_s14 = inlined_call_operand.vmem [shape: f32[8,1,64], index: 14, kind: input, shape index: {}]   ;;  %s4538_s15 = inlined_call_operand.vmem [shape: bf16[8,64,32], index: 15, kind: input, shape index: {}]   ;;  %s4539_s16 = inlined_call_operand.vmem [shape: f32[8,1,32], index: 16, kind: input, shape index: {}]   ;;  %s4540_s17 = inlined_call_operand.hbm [shape: f32[8,1,32], index: 17, kind: input, shape index: {}]   ;;  %s4541_s18 = inlined_call_operand.hbm [shape: f32[8,1,32], index: 18, kind: input, shape index: {}]   ;;  %s4542_s19 = inlined_call_operand.hbm [shape: f32[8,1,32], index: 19, kind: input, shape index: {}]   ;;  %s4543_s20 = inlined_call_operand.hbm [shape: f32[8,1,32], index: 20, kind: input, shape index: {}]   ;;  %s4544_s21 = inlined_call_operand.vmem [shape: bf16[2,16,32], index: 21, kind: output, shape index: {0}]   ;;  %s4545_s22 = inlined_call_operand.vmem [shape: bf16[2,16,32], index: 22, kind: output, shape index: {1}]  }
   0x1   :  { %4553 = sst [smem:[#allocation19_spill]] %s4523_s0 }
   0x2   :  { %4554 = sst [smem:[#allocation20_spill]] %s4524_s1 }
   0x3   :  { %4555 = sst [smem:[#allocation21_spill]] %s4525_s2 }
   0x4   :  { %4556 = sst [smem:[#allocation22_spill]] %s4526_s3 }
   0x5   :  { %4557 = sst [smem:[#allocation23_spill]] %s4527_s4 }
   0x6   :  { %4558 = sst [smem:[#allocation24_spill]] %s4528_s5 }
   0x7   :  { %4559 = sst [smem:[#allocation25_spill]] %s4529_s6 }
   0x8   :  { %4560 = sst [smem:[#allocation26_spill]] %s4537_s14 }
   0x9   :  { %4561 = sst [smem:[#allocation27_spill]] %s4538_s15 }
   0xa   :  { %4562 = sst [smem:[#allocation28_spill]] %s4539_s16 }
   0xb   :  { %28 = vsyncpa [#allocation5], 0 }
   0xc   :  { %29 = vsyncpa [#allocation7], 0 }
   0xd   :  { %30 = vsyncpa [#allocation10], 0 }
   0xe   :  { %31 = vsyncpa [#allocation13], 0  ;;  %s3920_s3 = smov 0  }
   0xf LB: > { %4563 = sst [smem:[#allocation18_spill]] %s3760_s3  ;;  %s3786_s28 = smov [#allocation6]   ;;  %s3760_s3 = sphi %s3920_s3, %s37_s3  }
  0x10   : > { %s602_s29 = sshll.u32 %s3786_s28, 4  ;;  %s3926_s30 = sadd.s32 4294967295, %s3760_s3   ;;  %s3931_s29 = int_to_ptr.vmem [resolvable:$true] %s602_s29 }
  0x11   : > { %p2886_p0 = scmp.ge.s32.totalorder %s3760_s3, 1  ;;  %p550_p1 = scmp.lt.s32.totalorder %s3760_s3, 3 }
  0x12   : > { %p4551_p2 = scmp.eq.s32.totalorder %s3926_s30, 0  ;;  %s3787_s23 = smov [#allocation9]  }
  0x13   : > { %p3933_p3 = pnand %p2886_p0, %p550_p1  ;;  %s637_s1 = sshll.u32 %s3787_s23, 4  ;;  %s3945_s1 = int_to_ptr.vmem [resolvable:$true] %s637_s1 }
  0x14   : > { %s3788_s5 = smov [#allocation4]   ;;  %s3546_s26 = scalar_lea.hbm %s4536_s13, 2048 }
  0x15   : > { %s4564_s4 = scalar_select %p3933_p3, 1, 0 }
  0x16   : > { %p3347_p4 = pneg %p3933_p3  ;;  %s577_s24 = sshll.u32 %s3788_s5, 4  ;;  %s3947_s24 = int_to_ptr.vmem [resolvable:$true] %s577_s24 }
  0x17   : > { %p3547_p6 = scmp.ne.s32.totalorder %s4536_s13, %s3546_s26  ;;  %p3553_p10 = scmp.lt.u32.totalorder %s3546_s26, %s4536_s13 }
  0x18   : > { %p3941_p5 = pnand %p4551_p2, %p3347_p4 }
  0x1a   : > { %p3957_p7 = pneg %p3941_p5 }
  0x1c   : > { %p3549_p8 = pnand %p3957_p7, %p3547_p6 }
  0x1e   : > { %p3550_p9 = pneg %p3549_p8 }
  0x20   : > { %p3555_p11 = pnand %p3553_p10, %p3550_p9 }
  0x22   : > { %3558 = shalt.err (!%p3555_p11)
}
  0x23   : > { %s3559_s6 = scalar_lea.vmem %s3931_s29, 2048  ;;  %p3567_p1 = scmp.lt.s32.totalorder %s3931_s29, %s3931_s29 }
  0x24   : > { %p3560_p12 = scmp.ne.s32.totalorder %s3931_s29, %s3559_s6  ;;  %p3568_p4 = scmp.lt.s32.totalorder %s3559_s6, %s3559_s6 }
  0x26   : > { %p3562_p13 = pnand %p3560_p12, %p3957_p7  ;;  %p3569_p6 = por %p3568_p4, %p3567_p1 }
  0x28   : > { %p3563_p0 = pneg %p3562_p13 }
  0x2a   : > { %p3570_p8 = pnand %p3569_p6, %p3563_p0 }
  0x2c   : > { %3573 = shalt.err (!%p3570_p8)
}
  0x2d   : > { %s3789_s25 = smov 64   ;;  %s3790_s26 = smov 4  }
  0x2e   : > { %3353 = dma.hbm_to_vmem [thread:$0]  (!%p3941_p5), %s4536_s13, 2048, %s3931_s29, [#allocation7], %s3789_s25, %s3789_s25, %s3790_s26  }
  0x2f   : > { %s3574_s3 = scalar_lea.hbm %s4541_s18, 128 }
  0x30   : > { %p3575_p9 = scmp.ne.s32.totalorder %s4541_s18, %s3574_s3  ;;  %p3581_p12 = scmp.lt.u32.totalorder %s3574_s3, %s4541_s18 }
  0x32   : > { %p3577_p10 = pnand %p3575_p9, %p3957_p7 }
  0x34   : > { %p3578_p11 = pneg %p3577_p10 }
  0x36   : > { %p3583_p13 = pnand %p3581_p12, %p3578_p11 }
  0x38   : > { %3586 = shalt.err (!%p3583_p13)
}
  0x39   : > { %s3587_s29 = scalar_lea.vmem %s3945_s1, 128  ;;  %p3595_p6 = scmp.lt.s32.totalorder %s3945_s1, %s3945_s1 }
  0x3a   : > { %p3588_p0 = scmp.ne.s32.totalorder %s3945_s1, %s3587_s29  ;;  %p3596_p8 = scmp.lt.s32.totalorder %s3587_s29, %s3587_s29 }
  0x3c   : > { %p3590_p1 = pnand %p3588_p0, %p3957_p7  ;;  %p3597_p9 = por %p3596_p8, %p3595_p6 }
  0x3e   : > { %p3591_p4 = pneg %p3590_p1 }
  0x40   : > { %p3598_p10 = pnand %p3597_p9, %p3591_p4 }
  0x42   : > { %3601 = shalt.err (!%p3598_p10)
}
  0x43   : > { %s3791_s14 = smov 16   ;;  %s3792_s15 = smov 1  }
  0x44   : > { %3359 = dma.hbm_to_vmem [thread:$0]  (!%p3941_p5), %s4541_s18, 128, %s3945_s1, [#allocation10], %s3791_s14, %s3791_s14, %s3792_s15  }
  0x45   : > { %s3602_s2 = scalar_lea.hbm %s4531_s8, 32 }
  0x46   : > { %p3603_p11 = scmp.ne.s32.totalorder %s4531_s8, %s3602_s2  ;;  %p3609_p0 = scmp.lt.u32.totalorder %s3602_s2, %s4531_s8 }
  0x48   : > { %p3605_p12 = pnand %p3603_p11, %p3957_p7 }
  0x4a   : > { %p3606_p13 = pneg %p3605_p12 }
  0x4c   : > { %p3611_p1 = pnand %p3609_p0, %p3606_p13 }
  0x4e   : > { %3614 = shalt.err (!%p3611_p1)
}
  0x4f   : > { %s3615_s1 = scalar_lea.vmem %s3947_s24, 32  ;;  %p3623_p9 = scmp.lt.s32.totalorder %s3947_s24, %s3947_s24 }
  0x50   : > { %p3616_p4 = scmp.ne.s32.totalorder %s3947_s24, %s3615_s1  ;;  %p3624_p10 = scmp.lt.s32.totalorder %s3615_s1, %s3615_s1 }
  0x52   : > { %p3618_p6 = pnand %p3616_p4, %p3957_p7  ;;  %p3625_p11 = por %p3624_p10, %p3623_p9 }
  0x54   : > { %p3619_p8 = pneg %p3618_p6 }
  0x56   : > { %p3626_p12 = pnand %p3625_p11, %p3619_p8 }
  0x58   : > { %3629 = shalt.err (!%p3626_p12)
}
  0x59   : > { %3350 = dma.hbm_to_vmem [thread:$0]  (!%p3941_p5), %s4531_s8, 32, %s3947_s24, [#allocation5], %s3791_s14, %s3791_s14, %s3792_s15  }
  0x5a   : > { %s3793_s3 = smov [#allocation8]   ;;  %s3794_s26 = smov [#allocation11]  }
  0x5b   : > { %s624_s25 = sshll.u32 %s3793_s3, 4  ;;  %s650_s2 = sshll.u32 %s3794_s26, 4  ;;  %s625_s25 = int_to_ptr.vmem [resolvable:$true] %s624_s25  ;;  %s4030_s2 = int_to_ptr.vmem [resolvable:$true] %s650_s2 }
  0x5c   : > { %s3630_s5 = scalar_lea.hbm %s4540_s17, 128 }
  0x5d   : > { %p3631_p13 = scmp.ne.s32.totalorder %s4540_s17, %s3630_s5  ;;  %p3637_p4 = scmp.lt.u32.totalorder %s3630_s5, %s4540_s17 }
  0x5f   : > { %p3633_p0 = pnand %p3631_p13, %p3957_p7 }
  0x61   : > { %p3634_p1 = pneg %p3633_p0 }
  0x63   : > { %p3639_p6 = pnand %p3637_p4, %p3634_p1 }
  0x65   : > { %3642 = shalt.err (!%p3639_p6)
}
  0x66   : > { %s3643_s16 = scalar_lea.vmem %s625_s25, 128  ;;  %p3651_p11 = scmp.lt.s32.totalorder %s625_s25, %s625_s25 }
  0x67   : > { %p3644_p8 = scmp.ne.s32.totalorder %s625_s25, %s3643_s16  ;;  %p3652_p12 = scmp.lt.s32.totalorder %s3643_s16, %s3643_s16 }
  0x69   : > { %p3646_p9 = pnand %p3644_p8, %p3957_p7  ;;  %p3653_p2 = por %p3652_p12, %p3651_p11 }
  0x6b   : > { %p3647_p10 = pneg %p3646_p9 }
  0x6d   : > { %p3654_p3 = pnand %p3653_p2, %p3647_p10 }
  0x6f   : > { %3657 = shalt.err (!%p3654_p3)
}
  0x70   : > { %3356 = dma.hbm_to_vmem [thread:$0]  (!%p3941_p5), %s4540_s17, 128, %s625_s25, [#allocation7], %s3791_s14, %s3791_s14, %s3792_s15  }
  0x71   : > { %s3658_s5 = scalar_lea.hbm %s4542_s19, 128 }
  0x72   : > { %p3659_p13 = scmp.ne.s32.totalorder %s4542_s19, %s3658_s5  ;;  %p3665_p0 = scmp.lt.u32.totalorder %s3658_s5, %s4542_s19 }
  0x74   : > { %p3661_p2 = pnand %p3659_p13, %p3957_p7 }
  0x76   : > { %p3662_p3 = pneg %p3661_p2 }
  0x78   : > { %p3667_p1 = pnand %p3665_p0, %p3662_p3 }
  0x7a   : > { %3670 = shalt.err (!%p3667_p1)
}
  0x7b   : > { %s3671_s25 = scalar_lea.vmem %s4030_s2, 128  ;;  %p3679_p9 = scmp.lt.s32.totalorder %s4030_s2, %s4030_s2 }
  0x7c   : > { %p3672_p4 = scmp.ne.s32.totalorder %s4030_s2, %s3671_s25  ;;  %p3680_p10 = scmp.lt.s32.totalorder %s3671_s25, %s3671_s25 }
  0x7e   : > { %p3674_p6 = pnand %p3672_p4, %p3957_p7  ;;  %p3681_p11 = por %p3680_p10, %p3679_p9 }
  0x80   : > { %p3675_p8 = pneg %p3674_p6 }
  0x82   : > { %p3682_p12 = pnand %p3681_p11, %p3675_p8 }
  0x84   : > { %3685 = shalt.err (!%p3682_p12)
}
  0x85   : > { %3362 = dma.hbm_to_vmem [thread:$0]  (!%p3941_p5), %s4542_s19, 128, %s4030_s2, [#allocation10], %s3791_s14, %s3791_s14, %s3792_s15  }
  0x86   : > { %s3795_s26 = smov [#allocation12]   ;;  %s3686_s6 = scalar_lea.hbm %s4543_s20, 128 }
  0x87   : > { %s663_s27 = sshll.u32 %s3795_s26, 4  ;;  %p3687_p13 = scmp.ne.s32.totalorder %s4543_s20, %s3686_s6  ;;  %s664_s27 = int_to_ptr.vmem [resolvable:$true] %s663_s27 }
  0x88   : > { %p3693_p0 = scmp.lt.u32.totalorder %s3686_s6, %s4543_s20 }
  0x89   : > { %p3689_p2 = pnand %p3687_p13, %p3957_p7 }
  0x8b   : > { %p3690_p3 = pneg %p3689_p2 }
  0x8d   : > { %p3695_p1 = pnand %p3693_p0, %p3690_p3 }
  0x8f   : > { %3698 = shalt.err (!%p3695_p1)
}
  0x90   : > { %s3699_s2 = scalar_lea.vmem %s664_s27, 128  ;;  %p3707_p9 = scmp.lt.s32.totalorder %s664_s27, %s664_s27 }
  0x91   : > { %p3700_p4 = scmp.ne.s32.totalorder %s664_s27, %s3699_s2  ;;  %p3708_p10 = scmp.lt.s32.totalorder %s3699_s2, %s3699_s2 }
  0x93   : > { %p3702_p6 = pnand %p3700_p4, %p3957_p7  ;;  %p3709_p11 = por %p3708_p10, %p3707_p9 }
  0x95   : > { %p3703_p8 = pneg %p3702_p6 }
  0x97   : > { %p3710_p12 = pnand %p3709_p11, %p3703_p8 }
  0x99   : > { %3713 = shalt.err (!%p3710_p12)
}
  0x9a   : > { %3365 = dma.hbm_to_vmem [thread:$0]  (!%p3941_p5), %s4543_s20, 128, %s664_s27, [#allocation13], %s3791_s14, %s3791_s14, %s3792_s15  }
  0x9b   : > { %p4567_p13 = scmp.ne.s32.totalorder %s4564_s4, 0 }
  0x9c   : > { %p4568_p7 = scmp.eq.s32.totalorder (!%p4567_p13), %s3926_s30, 0 }
  0x9d   : > { %701 = sbr.rel (%p4567_p13) target bundleno = 5040 (0x13b0), region = 104 }
  0xa4   : > { %3743 = dma.done.wait (%p4568_p7), [#allocation5], 32   ;;  %p4569_p2 = pmov %p4568_p7 }
  0xa6   : > { %3745 = vsyncadd (%p4569_p2), [#allocation5], 4294967264  ;;  %p4570_p3 = pmov %p4569_p2 }
  0xa7   : > { %p4571_p0 = pmov %p4569_p2 }
  0xa8   : > { %3747 = dma.done.wait (%p4570_p3), [#allocation7], 2176  }
  0xa9   : > { %3749 = vsyncadd (%p4571_p0), [#allocation7], 4294965120  ;;  %p4572_p1 = pmov %p4571_p0 }
  0xaa   : > { %p4573_p5 = pmov %p4571_p0 }
  0xab   : > { %3751 = dma.done.wait (%p4572_p1), [#allocation10], 256  }
  0xac   : > { %3753 = vsyncadd (%p4573_p5), [#allocation10], 4294967040  ;;  %p4574_p4 = pmov %p4571_p0 }
  0xad   : > { %p4575_p6 = pmov %p4571_p0 }
  0xae   : > { %3755 = dma.done.wait (%p4574_p4), [#allocation13], 128  }
  0xaf   : > { %3757 = vsyncadd (%p4575_p6), [#allocation13], 4294967168  ;;  %p796_p8 = scmp.lt.s32.totalorder %s3926_s30, 1  ;;  %v3796_v0 = vmov 1   ;;  %v3797_v1 = vmov 0   ;;  %s4576_s15 = sld [smem:[#allocation19_spill]]  ;;  %v851_v26 = vlaneseq }
  0xb0   : > { %3454 = vset.pattern.permute.xlu1 %v3796_v0  ;;  %3453 = vset.pattern.permute.xlu0 %v3797_v1  ;;  %vm823_vm0 = vcmask 23552   ;;  %s4577_s2 = sld [smem:[#allocation24_spill]]  ;;  %v3798_v17 = vmov 0.0   ;;  %v3799_v19 = vmov 2   ;;  %s4578_s14 = sld [smem:[#allocation20_spill]]  ;;  %vm3800_vm1 = vmmov 0  }
  0xb1   : > { %s4601_s30 = smov (!%p796_p8, %s3926_s30), 1  ;;  %3147 = vmatprep.subr.bf16.mxu0 %v3798_v17  ;;  %3159 = vmatprep.subr.bf16.mxu1 %v3798_v17  ;;  %v3470_v24 = vld [vmem:[%s4530_s7] sm:$0xff]   ;;  %v3471_v25 = vld [vmem:[%s4530_s7 + $0x8] sm:$0xff]   ;;  %v852_v27 = vshrl.u32 %v851_v26, 7  ;;  %vm939_vm2 = vcmask 523264   ;;  %s4581_s24 = sld [smem:[#allocation25_spill]] }
  0xb2   : > { %s3065_s4 = sshll.u32 %s4601_s30, 4  ;;  %s3067_s0 = sshll.u32 %s4601_s30, 3  ;;  %3155 = vmatprep.mubr.msk.bf16.mxu0 %vm3800_vm1, %v3798_v17  ;;  %3167 = vmatprep.mubr.msk.bf16.mxu1 %vm3800_vm1, %v3798_v17  ;;  %vm1316_vm3 = vcmask 261120  }
  0xb3   : > { %s4132_s5 = scalar_lea.vmem %s4544_s21, %s3067_s0  ;;  %s4137_s29 = scalar_lea.vmem %s4545_s22, %s3067_s0  ;;  %3160 = vmatpush3.bf16.msra.mxu1 %v3470_v24  ;;  %v853_v28 = vsub.s32 0, %v852_v27  ;;  %v875_v31 = vsub.s32 1, %v852_v27  ;;  %v891_v35 = vsub.s32 2, %v852_v27  ;;  %v3472_v24 = vld [vmem:[%s4530_s7 + $0x10] sm:$0xff]  }
  0xb4   : > { %3161 = vmatprep.subr.bf16.mxu1 %v3798_v17  ;;  %s4579_s0 = sld [smem:[#allocation22_spill]]  ;;  %s4582_s16 = sld [smem:[#allocation21_spill]] }
  0xb5   : > { %s800_s26 = scalar_lea.vmem %s4576_s15, %s3065_s4 }
  0xb6   : > { %v821_v2 = vld [vmem:[%s800_s26] sm:$0xff]  ;;  %v822_v3 = vld [vmem:[%s800_s26 + $0x8] sm:$0xff]  ;;  %s805_s15 = scalar_lea.vmem %s4578_s14, %s3065_s4  ;;  %v3464_v20 = vld [vmem:[%s4577_s2 + $0x10] sm:$0xff]  }
  0xb7   : > { %v824_v4 = vsel %vm823_vm0, %v821_v2, 0.0  ;;  %v825_v5 = vsel %vm823_vm0, %v822_v3, 0.0  ;;  %v3462_v16 = vld [vmem:[%s4577_s2] sm:$0xff]   ;;  %v3463_v18 = vld [vmem:[%s4577_s2 + $0x8] sm:$0xff]   ;;  %v3465_v23 = vld [vmem:[%s4577_s2 + $0x18] sm:$0xff]   ;;  %3162 = vmatpush3.bf16.msra.mxu1 %v3471_v25 }
  0xb8   : > { %v826_v6 = vadd.f32 %v825_v5, %v824_v4  ;;  %3148 = vmatpush3.bf16.msra.mxu0 %v3462_v16  ;;  %v837_v21 = vld [vmem:[%s805_s15] sm:$0xff]  ;;  %v838_v22 = vld [vmem:[%s805_s15 + $0x8] sm:$0xff]  ;;  %3163 = vmatprep.subr.bf16.mxu1 %v3798_v17  ;;  %s4580_s15 = sld [smem:[#allocation23_spill]]  ;;  %v3473_v25 = vld [vmem:[%s4530_s7 + $0x18] sm:$0xff]  }
  0xb9   : > { %3149 = vmatprep.subr.bf16.mxu0 %v3798_v17  ;;  %v3466_v59 = vld [vmem:[%s4577_s2 + $0x20] sm:$0xff]  }
  0xba   : > { %v827_v7 = vrot.slane %v826_v6, 4  ;;  %v839_v29 = vld [vmem:[%s4579_s0] sm:$0x7]  ;;  %v2923_v54 = vld [vmem:[%s4579_s0 + $0x4] sm:$0x7]  ;;  %s808_s3 = scalar_lea.vmem %s4582_s16, %s4601_s30  ;;  %s4264_s30 = smov 0  }
  0xbb   : > { %v854_v30 = vrot.slane %v839_v29, %v853_v28  ;;  %v876_v37 = vrot.slane %v839_v29, %v875_v31  ;;  %v892_v42 = vrot.slane %v839_v29, %v891_v35  ;;  %v1095_v58 = vrot.slane %v2923_v54, %v853_v28  ;;  %3164 = vmatpush3.bf16.msra.mxu1 %v3472_v24  ;;  %v2910_v26 = vld [vmem:[%s4581_s24] ss:$0 sm:$0xff] }
  0xbc   : > { %v828_v8 = vadd.f32 %v827_v7, %v826_v6  ;;  %3150 = vmatpush3.bf16.msra.mxu0 %v3463_v18  ;;  %v1117_v62 = vrot.slane %v2923_v54, %v875_v31  ;;  %v1133_v5 = vrot.slane %v2923_v54, %v891_v35  ;;  %3165 = vmatprep.subr.bf16.mxu1 %v3798_v17  ;;  %v3474_v35 = vld [vmem:[%s4530_s7 + $0x20] sm:$0xff]  }
  0xbd   : > { %3151 = vmatprep.subr.bf16.mxu0 %v3798_v17 }
  0xbe   : > { %v829_v9 = vrot.slane %v828_v8, 2  ;;  %v2909_v36 = vld [vmem:[%s4580_s15] ss:$0 sm:$0xff] }
  0xbf   : > { %3166 = vmatpush3.bf16.msra.mxu1 %v3473_v25 }
  0xc0   : > { %v830_v10 = vadd.f32 %v829_v9, %v828_v8  ;;  %3152 = vmatpush3.bf16.msra.mxu0 %v3464_v20  ;;  %v3468_v9 = vld [vmem:[%s4577_s2 + $0x30] sm:$0xff]   ;;  %3183 = vmatprep.subr.bf16.mxu1 %v3798_v17 }
  0xc1   : > { %3153 = vmatprep.subr.bf16.mxu0 %v3798_v17 }
  0xc2   : > { %v831_v11 = vrot.slane %v830_v10, 1 }
  0xc4   : > { %v832_v12 = vadd.f32 %v831_v11, %v830_v10  ;;  %3154 = vmatpush3.bf16.msra.mxu0 %v3465_v23 }
  0xc5   : > { %3171 = vmatprep.subr.bf16.mxu0 %v3798_v17 }
  0xc6   : > { %v834_v13 = vmul.f32 0.0625, %v832_v12 }
  0xc8   : > { %v835_v14 = vsub.f32 %v821_v2, %v834_v13  ;;  %v836_v15 = vsub.f32 %v822_v3, %v834_v13  ;;  %v2925_v2 = vld [vmem:[%s4580_s15 + $0x1] ss:$0 sm:$0xff] }
  0xca   : > { %866 = vperm.xlu1 %3454, %v835_v14   ;;  %843 = vperm.xlu0 %3453, %v835_v14  }
  0xce   : > { %870 = vperm.xlu1 %3454, %v836_v15   ;;  %848 = vperm.xlu0 %3453, %v836_v15  }
  0xd2   : > { %3456 = vset.pattern.permute.xlu1 %v3799_v19  ;;  %3455 = vset.pattern.permute.xlu0 %v3799_v19 }
  0xd3   : > { %886 = vperm.xlu1 %3456, %v836_v15   ;;  %882 = vperm.xlu0 %3455, %v835_v14   ;;  %v3469_v14 = vld [vmem:[%s4577_s2 + $0x38] sm:$0xff]  }
  0xd7   : > { %3457 = vset.pattern.permute.xlu1 %v3797_v1  ;;  %3458 = vset.pattern.permute.xlu0 %v3797_v1  ;;  %v3467_v1 = vld [vmem:[%s4577_s2 + $0x28] sm:$0xff]  }
  0xd8   : > { %1084 = vperm.xlu1 %3457, %v837_v21   ;;  %1089 = vperm.xlu0 %3458, %v838_v22  }
  0xdc   : > { %3459 = vset.pattern.permute.xlu1 %v3796_v0  ;;  %3460 = vset.pattern.permute.xlu0 %v3799_v19 }
  0xdd   : > { %1107 = vperm.xlu1 %3459, %v837_v21   ;;  %1123 = vperm.xlu0 %3460, %v837_v21  }
  0xe1   : > { %1111 = vperm.xlu1 %3459, %v838_v22  }
  0xe5   : > { %3461 = vset.pattern.permute.xlu1 %v3799_v19 }
  0xe6   : > { %1127 = vperm.xlu1 %3461, %v838_v22  }
 0x149   : > { %v867_v32 = vpop.permute.xlu1 %866  ;;  %v844_v33 = vpop.permute.xlu0 %843 }
 0x14a   : > { %v855_v34 = vmul.f32 %v854_v30, %v844_v33  ;;  %v877_v45 = vmul.f32 %v876_v37, %v867_v32 }
 0x14c   : > { %v863_v41 = vadd.f32 %v2909_v36, %v855_v34 }
 0x14d   : > { %v871_v38 = vpop.permute.xlu1 %870  ;;  %v849_v39 = vpop.permute.xlu0 %848 }
 0x14e   : > { %v856_v40 = vmul.f32 %v854_v30, %v849_v39  ;;  %v878_v43 = vmul.f32 %v876_v37, %v871_v38  ;;  %v879_v50 = vadd.f32 %v877_v45, %v863_v41  ;;  %v3475_v37 = vld [vmem:[%s4530_s7 + $0x28] sm:$0xff]   ;;  %v3476_v38 = vld [vmem:[%s4530_s7 + $0x30] sm:$0xff]   ;;  %v2935_v39 = vld [vmem:[%s4581_s24 + $0x1] ss:$0 sm:$0xff] }
 0x150   : > { %v864_v44 = vadd.f32 %v2909_v36, %v856_v40  ;;  %v3477_v40 = vld [vmem:[%s4530_s7 + $0x38] sm:$0xff]  }
 0x152   : > { %v887_v46 = vpop.permute.xlu1 %886  ;;  %v880_v47 = vadd.f32 %v878_v43, %v864_v44  ;;  %v883_v48 = vpop.permute.xlu0 %882 }
 0x153   : > { %v894_v49 = vmul.f32 %v892_v42, %v887_v46  ;;  %v893_v51 = vmul.f32 %v892_v42, %v883_v48 }
 0x155   : > { %v896_v52 = vadd.f32 %v894_v49, %v880_v47  ;;  %v895_v53 = vadd.f32 %v893_v51, %v879_v50  ;;  %v2916_v50 = vld [vmem:[#allocation4] ss:$0 sm:$0xff] }
 0x156   : > { %v2922_v51 = vld [vmem:[%s808_s3] ss:$0 sm:$0xff] }
 0x157   : > { %v898_v55 = vmax.f32 %v896_v52, 0.0  ;;  %v897_v56 = vmax.f32 %v895_v53, 0.0  ;;  %v1085_v57 = vpop.permute.xlu1 %1084  ;;  %v1090_v61 = vpop.permute.xlu0 %1089 }
 0x158   : > { %v1096_v63 = vmul.f32 %v1095_v58, %v1085_v57  ;;  %v1097_v3 = vmul.f32 %v1095_v58, %v1090_v61 }
 0x159   : > { %v899_v60 = vpack.c.bf16 %v898_v55, %v897_v56 }
 0x15a   : > { %v1104_v7 = vadd.f32 %v2925_v2, %v1096_v63  ;;  %v1105_v10 = vadd.f32 %v2925_v2, %v1097_v3 }
 0x15b   : > { %3156 = vmatmul.mubr.msk.bf16.vlgmr.msra.gmra.mrb[0].mxu0 %vm939_vm2, %v899_v60 }
 0x15c   : > { %v1108_v0 = vpop.permute.xlu1 %1107  ;;  %3172 = vmatpush3.bf16.msra.mxu0 %v3466_v59  ;;  %3179 = vmatprep.mubr.msk.bf16.mxu0 %vm3800_vm1, %v3798_v17  ;;  %v1124_v6 = vpop.permute.xlu0 %1123  ;;  %v2949_v59 = vld [vmem:[#allocation4 + $0x1] ss:$0 sm:$0xff] }
 0x15d   : > { %3173 = vmatprep.subr.bf16.mxu0 %v3798_v17  ;;  %v1118_v4 = vmul.f32 %v1117_v62, %v1108_v0  ;;  %v1134_v12 = vmul.f32 %v1133_v5, %v1124_v6 }
 0x15f   : > { %v1120_v11 = vadd.f32 %v1118_v4, %v1104_v7 }
 0x160   : > { %v1112_v8 = vpop.permute.xlu1 %1111  ;;  %3174 = vmatpush3.bf16.msra.mxu0 %v3467_v1 }
 0x161   : > { %3175 = vmatprep.subr.bf16.mxu0 %v3798_v17  ;;  %v1119_v13 = vmul.f32 %v1117_v62, %v1112_v8  ;;  %v1136_v16 = vadd.f32 %v1134_v12, %v1120_v11 }
 0x163   : > { %v1121_v18 = vadd.f32 %v1119_v13, %v1105_v10  ;;  %v1138_v21 = vmax.f32 %v1136_v16, 0.0 }
 0x164   : > { %3176 = vmatpush3.bf16.msra.mxu0 %v3468_v9 }
 0x165   : > { %v1128_v15 = vpop.permute.xlu1 %1127  ;;  %3177 = vmatprep.subr.bf16.mxu0 %v3798_v17 }
 0x166   : > { %v1135_v19 = vmul.f32 %v1133_v5, %v1128_v15 }
 0x168   : > { %v1137_v20 = vadd.f32 %v1135_v19, %v1121_v18  ;;  %3178 = vmatpush3.bf16.msra.mxu0 %v3469_v14 }
 0x16a   : > { %v1139_v22 = vmax.f32 %v1137_v20, 0.0 }
 0x16c   : > { %v1140_v23 = vpack.c.bf16 %v1139_v22, %v1138_v21 }
 0x16e   : > { %3180 = vmatmul.mubr.msk.bf16.vlgmr.msra.gmra.mrb[4].mxu0 %vm939_vm2, %v1140_v23 }
 0x22e   : > { %v977_v27 = vpop.f32.mrb[0].mxu0 }
 0x22f   : > { %v978_v28 = vadd.f32 %v2910_v26, %v977_v27  ;;  %v3157_v29 = vpop.f32.mrb[1].mxu0 }
 0x230   : > { %v980_v30 = vpop.f32.mrb[2].mxu0 }
 0x231   : > { %v981_v31 = vadd.f32 %v2910_v26, %v980_v30  ;;  %v3158_v32 = vpop.f32.mrb[3].mxu0  ;;  %v984_v33 = vmax.f32 %v978_v28, 0.0 }
 0x233   : > { %v985_v34 = vmax.f32 %v981_v31, 0.0 }
 0x235   : > { %v986_v36 = vpack.c.bf16 %v985_v34, %v984_v33 }
 0x237   : > { %3168 = vmatmul.mubr.msk.bf16.vlgmr.msra.gmra.mrb[0].mxu1 %vm939_vm2, %v986_v36 }
 0x238   : > { %3184 = vmatpush3.bf16.msra.mxu1 %v3474_v35  ;;  %3191 = vmatprep.mubr.msk.bf16.mxu1 %vm3800_vm1, %v3798_v17 }
 0x239   : > { %3185 = vmatprep.subr.bf16.mxu1 %v3798_v17 }
 0x23c   : > { %3186 = vmatpush3.bf16.msra.mxu1 %v3475_v37 }
 0x23d   : > { %3187 = vmatprep.subr.bf16.mxu1 %v3798_v17 }
 0x240   : > { %3188 = vmatpush3.bf16.msra.mxu1 %v3476_v38 }
 0x241   : > { %v1219_v41 = vpop.f32.mrb[4].mxu0  ;;  %3189 = vmatprep.subr.bf16.mxu1 %v3798_v17 }
 0x242   : > { %v1220_v42 = vadd.f32 %v2935_v39, %v1219_v41  ;;  %v3181_v43 = vpop.f32.mrb[5].mxu0 }
 0x243   : > { %v1222_v44 = vpop.f32.mrb[6].mxu0 }
 0x244   : > { %v1223_v45 = vadd.f32 %v2935_v39, %v1222_v44  ;;  %v3182_v46 = vpop.f32.mrb[7].mxu0  ;;  %3190 = vmatpush3.bf16.msra.mxu1 %v3477_v40  ;;  %v1226_v47 = vmax.f32 %v1220_v42, 0.0 }
 0x246   : > { %v1227_v48 = vmax.f32 %v1223_v45, 0.0 }
 0x248   : > { %v1228_v49 = vpack.c.bf16 %v1227_v48, %v1226_v47 }
 0x24a   : > { %3192 = vmatmul.mubr.msk.bf16.vlgmr.msra.gmra.mrb[4].mxu1 %vm939_vm2, %v1228_v49 }
 0x30a   : > { %v1063_v52 = vpop.f32.mrb[0].mxu1 }
 0x30b   : > { %v1064_v53 = vadd.f32 %v2916_v50, %v1063_v52  ;;  %v3169_v17 = vpop.f32.mrb[1].mxu1 }
 0x30c   : > { %v1066_v54 = vpop.f32.mrb[2].mxu1 }
 0x30d   : > { %v4242_v55 = vadd.f32 %v2922_v51, %v1064_v53   ;;  %v1067_v56 = vadd.f32 %v2916_v50, %v1066_v54  ;;  %v3170_v57 = vpop.f32.mrb[3].mxu1 }
 0x30f   : > { %1317 = vst.msk [vmem:[#allocation2] sm:$0xff] %vm1316_vm3, %v4242_v55  ;;  %v4246_v58 = vadd.f32 %v2922_v51, %v1067_v56   ;;  %v4584_v5 = vmov %v4242_v55 }
 0x311   : > { %1318 = vst.msk [vmem:[#allocation2 + $0x8] sm:$0xff] %vm1316_vm3, %v4246_v58  ;;  %v4583_v4 = vmov %v4246_v58 }
 0x31d   : > { %v1307_v60 = vpop.f32.mrb[4].mxu1 }
 0x31e   : > { %v1308_v61 = vadd.f32 %v2949_v59, %v1307_v60  ;;  %v3193_v62 = vpop.f32.mrb[5].mxu1 }
 0x31f   : > { %v1310_v63 = vpop.f32.mrb[6].mxu1 }
 0x320   : > { %v4250_v0 = vadd.f32 %v2922_v51, %v1308_v61   ;;  %v1311_v1 = vadd.f32 %v2949_v59, %v1310_v63  ;;  %v3194_v2 = vpop.f32.mrb[7].mxu1 }
 0x322   : > { %1319 = vst.msk [vmem:[#allocation3] sm:$0xff] %vm1316_vm3, %v4250_v0  ;;  %v4254_v3 = vadd.f32 %v2922_v51, %v1311_v1  }
 0x324   : > { %1320 = vst.msk [vmem:[#allocation3 + $0x8] sm:$0xff] %vm1316_vm3, %v4254_v3 }
 0x325 LB: >> { %v3801_v6 = vmov 0.0   ;;  %s4278_s28 = sshll.u32 %s3772_s30, 4  ;;  %vm3802_vm4 = vmmov 0   ;;  %v1354_v14 = vpack.c.bf16 %v3764_v4, %v3768_v5  ;;  %vm1574_vm5 = vcmask 130048   ;;  %s3074_s23 = sshll.u32 %s3772_s30, 5  ;;  %s3772_s30 = sphi %s4264_s30, %s1326_s30   ;;  %v3768_v5 = vphi %v4584_v5, %v4591_v5   ;;  %v3764_v4 = vphi %v4583_v4, %v4590_v4  }
 0x326   : >> { %3203 = vmatprep.subr.bf16.mxu1 %v3801_v6  ;;  %3195 = vmatprep.subr.bf16.mxu0 %v3801_v6  ;;  %s1337_s27 = scalar_lea.vmem %s4533_s10, %s4278_s28  ;;  %s1331_s4 = scalar_lea.vmem %s4532_s9, %s4278_s28 }
 0x327   : >> { %3207 = vmatprep.mubr.msk.bf16.mxu1 %vm3802_vm4, %v3801_v6  ;;  %3199 = vmatprep.mubr.msk.bf16.mxu0 %vm3802_vm4, %v3801_v6  ;;  %v3478_v7 = vld [vmem:[%s1337_s27] sm:$0xff]   ;;  %v3479_v10 = vld [vmem:[%s1337_s27 + $0x8] sm:$0xff]   ;;  %s1343_s16 = scalar_lea.vmem %s4534_s11, %s4278_s28  ;;  %s1349_s26 = scalar_lea.vmem %s4535_s12, %s4278_s28 }
 0x328   : >> { %3204 = vmatpush3.bf16.msra.mxu1 %v3478_v7  ;;  %v3480_v11 = vld [vmem:[%s1331_s4] sm:$0xff]   ;;  %v3481_v12 = vld [vmem:[%s1331_s4 + $0x8] sm:$0xff]   ;;  %s1763_s27 = scalar_lea.vmem [#allocation6], %s4278_s28  ;;  %s4585_s1 = sld [smem:[#allocation27_spill]] }
 0x329   : >> { %v1412_v8 = vld [vmem:[#allocation3] sm:$0xff]  ;;  %3205 = vmatprep.subr.bf16.mxu1 %v3801_v6  ;;  %3196 = vmatpush3.bf16.msra.mxu0 %v3480_v11  ;;  %v3482_v15 = vld [vmem:[%s1343_s16] sm:$0xff]   ;;  %v3483_v16 = vld [vmem:[%s1343_s16 + $0x8] sm:$0xff]   ;;  %s1741_s28 = scalar_lea.vmem [#allocation8], %s3772_s30  ;;  %s1751_s16 = scalar_lea.vmem [#allocation9], %s3772_s30 }
 0x32a   : >> { %3197 = vmatprep.subr.bf16.mxu0 %v3801_v6  ;;  %v3484_v53 = vld [vmem:[%s1349_s26] sm:$0xff]   ;;  %v3485_v17 = vld [vmem:[%s1349_s26 + $0x8] sm:$0xff]   ;;  %s4586_s26 = sld [smem:[#allocation26_spill]]  ;;  %s4587_s4 = sld [smem:[#allocation28_spill]] }
 0x32b   : >> { %v1413_v9 = vld [vmem:[#allocation3 + $0x8] sm:$0xff] }
 0x32c   : >> { %v1414_v13 = vpack.c.bf16 %v1413_v9, %v1412_v8  ;;  %3206 = vmatpush3.bf16.msra.mxu1 %v3479_v10 }
 0x32d   : >> { %3219 = vmatprep.subr.bf16.mxu1 %v3801_v6  ;;  %3198 = vmatpush3.bf16.msra.mxu0 %v3481_v12 }
 0x32e   : >> { %3211 = vmatprep.subr.bf16.mxu0 %v3801_v6  ;;  %s4347_s25 = scalar_lea.vmem %s4585_s1, %s3074_s23 }
 0x32f   : >> { %3208 = vmatmul.mubr.msk.bf16.vlgmr.msra.gmra.mrb[0].mxu1 %vm1316_vm3, %v1414_v13 }
 0x330   : >> { %3221 = vmatprep.mubr.msk.bf16.mxu1 %vm3802_vm4, %v3801_v6  ;;  %3200 = vmatmul.mubr.msk.bf16.vlgmr.msra.gmra.mrb[0].mxu0 %vm1316_vm3, %v1354_v14  ;;  %s1846_s1 = scalar_lea.vmem %s4587_s4, %s3772_s30 }
 0x331   : >> { %3215 = vmatprep.mubr.msk.bf16.mxu0 %vm3802_vm4, %v3801_v6  ;;  %3212 = vmatpush3.bf16.msra.mxu0 %v3482_v15 }
 0x332   : >> { %3213 = vmatprep.subr.bf16.mxu0 %v3801_v6 }
 0x335   : >> { %3214 = vmatpush3.bf16.msra.mxu0 %v3483_v16 }
 0x336   : >> { %3225 = vmatprep.subr.bf16.mxu0 %v3801_v6 }
 0x338   : >> { %3216 = vmatmul.mubr.msk.bf16.vlgmr.msra.gmra.mrb[4].mxu0 %vm1316_vm3, %v1414_v13 }
 0x339   : >> { %3227 = vmatprep.mubr.msk.bf16.mxu0 %vm3802_vm4, %v3801_v6 }
 0x402   : >> { %v1464_v18 = vpop.f32.mrb[0].mxu1 }
 0x403   : >> { %v3209_v19 = vpop.f32.mrb[1].mxu1  ;;  %v1404_v21 = vpop.f32.mrb[0].mxu0 }
 0x404   : >> { %v1467_v20 = vpop.f32.mrb[2].mxu1  ;;  %v3201_v24 = vpop.f32.mrb[1].mxu0 }
 0x405   : >> { %v1524_v22 = vpack.c.bf16 %v1467_v20, %v1464_v18  ;;  %v3210_v23 = vpop.f32.mrb[3].mxu1  ;;  %v1407_v25 = vpop.f32.mrb[2].mxu0 }
 0x406   : >> { %v1411_v27 = vpack.c.bf16 %v1407_v25, %v1404_v21  ;;  %v3202_v28 = vpop.f32.mrb[3].mxu0 }
 0x407   : >> { %v1529_v26 = vsel %vm1316_vm3, %v1524_v22, 0 }
 0x408   : >> { %3220 = vmatpush3.bf16.xpose.msra.mxu1 %v1529_v26 }
 0x409   : >> { %3231 = vmatprep.subr.bf16.mxu1 %v3801_v6 }
 0x40b   : >> { %v1517_v37 = vpop.f32.mrb[4].mxu0 }
 0x40c   : >> { %v3217_v38 = vpop.f32.mrb[5].mxu0 }
 0x40d   : >> { %v1520_v39 = vpop.f32.mrb[6].mxu0  ;;  %v3487_v38 = vld [vmem:[%s1763_s27 + $0x8] sm:$0xff]  }
 0x40e   : >> { %v1604_v40 = vpack.c.bf16 %v1520_v39, %v1517_v37  ;;  %v3218_v41 = vpop.f32.mrb[7].mxu0  ;;  %v3486_v37 = vld [vmem:[%s1763_s27] sm:$0xff]   ;;  %s1768_s27 = scalar_lea.vmem %s4586_s26, %s3772_s30 }
 0x40f   : >> { %3222 = vmatmul.mubr.msk.bf16.vlgmr.msra.gmra.mrb[4].mxu1 %vm1316_vm3, %v1411_v27  ;;  %v3488_v39 = vld [vmem:[%s4347_s25] sm:$0xff]  }
 0x410   : >> { %3235 = vmatprep.mubr.msk.bf16.mxu1 %vm3802_vm4, %v3801_v6  ;;  %3226 = vmatpush3.bf16.msra.mxu0 %v1604_v40  ;;  %v3489_v40 = vld [vmem:[%s4347_s25 + $0x8] sm:$0xff]  }
 0x411   : >> { %3239 = vmatprep.subr.bf16.mxu0 %v3801_v6  ;;  %3232 = vmatpush3.bf16.msra.mxu1 %v3484_v53  ;;  %v2975_v53 = vld [vmem:[%s1751_s16] ss:$0 sm:$0xff] }
 0x412   : >> { %3233 = vmatprep.subr.bf16.mxu1 %v3801_v6 }
 0x415   : >> { %3234 = vmatpush3.bf16.msra.mxu1 %v3485_v17 }
 0x416   : >> { %3247 = vmatprep.subr.bf16.mxu1 %v3801_v6 }
 0x4e2   : >> { %v1565_v29 = vpop.f32.mrb[4].mxu1 }
 0x4e3   : >> { %v1572_v30 = vmul.f32 0.17677669, %v1565_v29  ;;  %v3223_v31 = vpop.f32.mrb[5].mxu1 }
 0x4e4   : >> { %v1568_v32 = vpop.f32.mrb[6].mxu1 }
 0x4e5   : >> { %v1573_v33 = vmul.f32 0.17677669, %v1568_v32  ;;  %v3224_v34 = vpop.f32.mrb[7].mxu1  ;;  %v1575_v35 = vsel %vm1574_vm5, %v1572_v30, -inf }
 0x4e6   : >> { %1576 = vmax.xlane.f32.xlu0 %v1575_v35 }
 0x4e7   : >> { %v1578_v36 = vsel %vm1574_vm5, %v1573_v33, -inf }
 0x4ea   : >> { %1579 = vmax.xlane.f32.xlu0 %v1578_v36 }
 0x573   : >> { %v1577_v42 = vpop.xlane.xlu0 %1576 }
 0x574   : >> { %v1587_v43 = vsub.f32 %v1572_v30, %v1577_v42  ;;  %v1581_v54 = vsub.f32 -inf, %v1577_v42 }
 0x576   : >> { %v1589_v44 = vmul.f32 1.442695, %v1587_v43  ;;  %v1583_v57 = vmul.f32 1.442695, %v1581_v54 }
 0x577   : >> { %v1580_v45 = vpop.xlane.xlu0 %1579 }
 0x578   : >> { %v1588_v46 = vsub.f32 %v1573_v33, %v1580_v45  ;;  %3492 = vpow2.f32 %v1589_v44  ;;  %v1582_v56 = vsub.f32 -inf, %v1580_v45 }
 0x57a   : >> { %v1591_v47 = vmul.f32 1.442695, %v1588_v46  ;;  %v1585_v59 = vmul.f32 1.442695, %v1582_v56 }
 0x57c   : >> { %3494 = vpow2.f32 %v1591_v47 }
 0x57d   : >> { %3496 = vpow2.f32 %v1583_v57 }
 0x57e   : >> { %3498 = vpow2.f32 %v1585_v59  ;;  %v3490_v59 = vld [vmem:[%s4347_s25 + $0x10] sm:$0xff]  }
 0x582   : >> { %v3493_v48 = vpop.eup %3492 }
 0x583   : >> { %v1595_v49 = vsel %vm1574_vm5, %v3493_v48, 0.0 }
 0x584   : >> { %1596 = vadd.xlane.f32.xlu1 %v1595_v49 }
 0x586   : >> { %v3495_v50 = vpop.eup %3494 }
 0x587   : >> { %v1598_v51 = vsel %vm1574_vm5, %v3495_v50, 0.0  ;;  %v1603_v52 = vpack.c.bf16 %v3495_v50, %v3493_v48  ;;  %v3497_v61 = vpop.eup %3496  ;;  %v2974_v48 = vld [vmem:[%s1741_s28] ss:$0 sm:$0xff]  ;;  %s1960_s28 = scalar_lea.vmem [#allocation12], %s3772_s30 }
 0x588   : >> { %1599 = vadd.xlane.f32.xlu1 %v1598_v51  ;;  %v3499_v62 = vpop.eup %3498  ;;  %v1593_v63 = vmul.f32 0.0, %v3497_v61  ;;  %v2977_v61 = vld [vmem:[%s1768_s27] ss:$0 sm:$0xff] }
 0x589   : >> { %3228 = vmatmul.mubr.msk.bf16.vlgmr.msra.gmra.mrb[8].mxu0 %vm1574_vm5, %v1603_v52  ;;  %v1594_v7 = vmul.f32 0.0, %v3499_v62 }
 0x58a   : >> { %3243 = vmatprep.mubr.msk.bf16.mxu0 %vm3802_vm4, %v3801_v6  ;;  %3240 = vmatpush3.bf16.msra.mxu0 %v3486_v37 }
 0x58b   : >> { %3241 = vmatprep.subr.bf16.mxu0 %v3801_v6 }
 0x58e   : >> { %3242 = vmatpush3.bf16.msra.mxu0 %v3487_v38 }
 0x611   : >> { %v1597_v60 = vpop.xlane.xlu1 %1596 }
 0x612   : >> { %v1601_v2 = vadd.f32 %v1597_v60, %v1593_v63  ;;  %v3491_v60 = vld [vmem:[%s4347_s25 + $0x18] sm:$0xff]   ;;  %s1950_s25 = scalar_lea.vmem [#allocation11], %s3772_s30  ;;  %s1326_s30 = sadd.s32 1, %s3772_s30  }
 0x613   : >> { %v2989_v38 = vld [vmem:[%s1950_s25] ss:$0 sm:$0xff]  ;;  %p1323_p9 = scmp.ge.s32.totalorder %s1326_s30, 4  }
 0x614   : >> { %3500 = vrcp.f32 %v1601_v2  ;;  %s4393_s16 = smov (%p1323_p9), 0  }
 0x615   : >> { %v1600_v1 = vpop.xlane.xlu1 %1599 }
 0x616   : >> { %v1602_v8 = vadd.f32 %v1600_v1, %v1594_v7 }
 0x618   : >> { %3502 = vrcp.f32 %v1602_v8 }
 0x61e   : >> { %v3501_v12 = vpop.eup %3500 }
 0x622   : >> { %v3503_v18 = vpop.eup %3502 }
 0x65c   : >> { %v1642_v9 = vpop.f32.mrb[8].mxu0 }
 0x65d   : >> { %v1649_v10 = vadd.f32 %v1642_v9, %v1593_v63  ;;  %v3229_v11 = vpop.f32.mrb[9].mxu0 }
 0x65e   : >> { %v1645_v13 = vpop.f32.mrb[10].mxu0 }
 0x65f   : >> { %v1653_v14 = vmul.f32 %v3501_v12, %v1649_v10  ;;  %v1650_v15 = vadd.f32 %v1645_v13, %v1594_v7  ;;  %v3230_v16 = vpop.f32.mrb[11].mxu0 }
 0x661   : >> { %v1654_v19 = vmul.f32 %v3503_v18, %v1650_v15 }
 0x663   : >> { %v1655_v20 = vpack.c.bf16 %v1654_v19, %v1653_v14 }
 0x665   : >> { %3236 = vmatmul.mubr.msk.bf16.vlgmr.msra.gmra.mrb[8].mxu1 %vm1316_vm3, %v1655_v20 }
 0x666   : >> { %3255 = vmatprep.mubr.msk.bf16.mxu1 %vm3802_vm4, %v3801_v6  ;;  %3248 = vmatpush3.bf16.msra.mxu1 %v3488_v39 }
 0x667   : >> { %3249 = vmatprep.subr.bf16.mxu1 %v3801_v6 }
 0x66a   : >> { %3250 = vmatpush3.bf16.msra.mxu1 %v3489_v40 }
 0x66b   : >> { %3251 = vmatprep.subr.bf16.mxu1 %v3801_v6 }
 0x66e   : >> { %3252 = vmatpush3.bf16.msra.mxu1 %v3490_v59 }
 0x66f   : >> { %3253 = vmatprep.subr.bf16.mxu1 %v3801_v6  ;;  %v2983_v6 = vld [vmem:[%s1846_s1] ss:$0 sm:$0xff] }
 0x672   : >> { %3254 = vmatpush3.bf16.msra.mxu1 %v3491_v60 }
 0x738   : >> { %v1705_v21 = vpop.f32.mrb[8].mxu1 }
 0x739   : >> { %v1712_v22 = vadd.f32 %v3768_v5, %v1705_v21  ;;  %v3237_v23 = vpop.f32.mrb[9].mxu1 }
 0x73a   : >> { %v1708_v24 = vpop.f32.mrb[10].mxu1 }
 0x73b   : >> { %v1713_v25 = vadd.f32 %v3764_v4, %v1708_v24  ;;  %v3238_v26 = vpop.f32.mrb[11].mxu1  ;;  %v1714_v27 = vsel %vm1316_vm3, %v1712_v22, 0.0 }
 0x73c   : >> { %1715 = vadd.xlane.f32.xlu0 %v1714_v27 }
 0x73d   : >> { %v1717_v28 = vsel %vm1316_vm3, %v1713_v25, 0.0 }
 0x73e   : >> { %1718 = vadd.xlane.f32.xlu1 %v1717_v28 }
 0x7c9   : >> { %v1716_v29 = vpop.xlane.xlu0 %1715 }
 0x7ca   : >> { %v1721_v30 = vmul.f32 0.03125, %v1716_v29 }
 0x7cb   : >> { %v1719_v31 = vpop.xlane.xlu1 %1718 }
 0x7cc   : >> { %v1723_v32 = vsub.f32 %v1712_v22, %v1721_v30  ;;  %v1722_v33 = vmul.f32 0.03125, %v1719_v31 }
 0x7ce   : >> { %v1724_v34 = vsub.f32 %v1713_v25, %v1722_v33  ;;  %v1725_v5 = vmul.f32 %v1723_v32, %v1723_v32 }
 0x7d0   : >> { %v1727_v35 = vsel %vm1316_vm3, %v1725_v5, 0.0  ;;  %v1726_v36 = vmul.f32 %v1724_v34, %v1724_v34 }
 0x7d1   : >> { %1728 = vadd.xlane.f32.xlu0 %v1727_v35 }
 0x7d2   : >> { %v1730_v4 = vsel %vm1316_vm3, %v1726_v36, 0.0 }
 0x7d3   : >> { %1731 = vadd.xlane.f32.xlu1 %v1730_v4 }
 0x85e   : >> { %v1729_v41 = vpop.xlane.xlu0 %1728 }
 0x85f   : >> { %v1733_v42 = vmul.f32 0.03125, %v1729_v41  ;;  %v2990_v41 = vld [vmem:[%s1960_s28] ss:$0 sm:$0xff] }
 0x860   : >> { %v1732_v43 = vpop.xlane.xlu1 %1731 }
 0x861   : >> { %v1735_v44 = vadd.f32 1e-05, %v1733_v42  ;;  %v1734_v45 = vmul.f32 0.03125, %v1732_v43 }
 0x863   : >> { %3504 = vrsqrt.f32 %v1735_v44  ;;  %v1736_v46 = vadd.f32 1e-05, %v1734_v45 }
 0x865   : >> { %3506 = vrsqrt.f32 %v1736_v46 }
 0x86d   : >> { %v3505_v47 = vpop.eup %3504 }
 0x86e   : >> { %v1739_v49 = vmul.f32 %v3505_v47, %v1723_v32  ;;  %v4592_v47 = vmov (%p1323_p9), %v4254_v3 }
 0x86f   : >> { %v3507_v50 = vpop.eup %3506 }
 0x870   : >> { %v1740_v51 = vmul.f32 %v3507_v50, %v1724_v34  ;;  %v1749_v52 = vmul.f32 %v2974_v48, %v1739_v49 }
 0x872   : >> { %v1750_v17 = vmul.f32 %v2974_v48, %v1740_v51  ;;  %v1759_v54 = vadd.f32 %v2975_v53, %v1749_v52  ;;  %v4593_v48 = vmov (%p1323_p9), %v4250_v0 }
 0x874   : >> { %v1760_v56 = vadd.f32 %v2975_v53, %v1750_v17 }
 0x876   : >> { %v1761_v57 = vpack.c.bf16 %v1760_v56, %v1759_v54 }
 0x878   : >> { %3244 = vmatmul.mubr.msk.bf16.vlgmr.msra.gmra.mrb[12].mxu0 %vm1316_vm3, %v1761_v57 }
 0x94b   : >> { %v1825_v62 = vpop.f32.mrb[12].mxu0 }
 0x94c   : >> { %v1826_v63 = vadd.f32 %v2977_v61, %v1825_v62  ;;  %v3245_v1 = vpop.f32.mrb[13].mxu0 }
 0x94d   : >> { %v1828_v2 = vpop.f32.mrb[14].mxu0 }
 0x94e   : >> { %v1829_v7 = vadd.f32 %v2977_v61, %v1828_v2  ;;  %v3246_v8 = vpop.f32.mrb[15].mxu0  ;;  %v1832_v9 = vmax.f32 %v1826_v63, 0.0 }
 0x950   : >> { %v1833_v10 = vmax.f32 %v1829_v7, 0.0 }
 0x952   : >> { %v1834_v11 = vpack.c.bf16 %v1833_v10, %v1832_v9 }
 0x954   : >> { %3256 = vmatmul.mubr.msk.bf16.vlgmr.msra.gmra.mrb[12].mxu1 %vm939_vm2, %v1834_v11 }
 0xa27   : >> { %v1915_v12 = vpop.f32.mrb[12].mxu1 }
 0xa28   : >> { %v1916_v13 = vadd.f32 %v2983_v6, %v1915_v12  ;;  %v3257_v14 = vpop.f32.mrb[13].mxu1 }
 0xa29   : >> { %v1918_v15 = vpop.f32.mrb[14].mxu1 }
 0xa2a   : >> { %v1919_v16 = vadd.f32 %v2983_v6, %v1918_v15  ;;  %v3258_v18 = vpop.f32.mrb[15].mxu1  ;;  %v1922_v19 = vadd.f32 %v1916_v13, %v1759_v54 }
 0xa2c   : >> { %v1924_v20 = vsel %vm1316_vm3, %v1922_v19, 0.0  ;;  %v1923_v21 = vadd.f32 %v1919_v16, %v1760_v56 }
 0xa2d   : >> { %1925 = vadd.xlane.f32.xlu0 %v1924_v20 }
 0xa2e   : >> { %v1927_v22 = vsel %vm1316_vm3, %v1923_v21, 0.0 }
 0xa2f   : >> { %1928 = vadd.xlane.f32.xlu1 %v1927_v22 }
 0xaba   : >> { %v1926_v23 = vpop.xlane.xlu0 %1925 }
 0xabb   : >> { %v1930_v24 = vmul.f32 0.03125, %v1926_v23 }
 0xabc   : >> { %v1929_v25 = vpop.xlane.xlu1 %1928 }
 0xabd   : >> { %v1932_v26 = vsub.f32 %v1922_v19, %v1930_v24  ;;  %v1931_v27 = vmul.f32 0.03125, %v1929_v25 }
 0xabf   : >> { %v1933_v28 = vsub.f32 %v1923_v21, %v1931_v27  ;;  %v1934_v29 = vmul.f32 %v1932_v26, %v1932_v26 }
 0xac1   : >> { %v1936_v30 = vsel %vm1316_vm3, %v1934_v29, 0.0  ;;  %v1935_v31 = vmul.f32 %v1933_v28, %v1933_v28 }
 0xac2   : >> { %1937 = vadd.xlane.f32.xlu0 %v1936_v30 }
 0xac3   : >> { %v1939_v32 = vsel %vm1316_vm3, %v1935_v31, 0.0 }
 0xac4   : >> { %1940 = vadd.xlane.f32.xlu1 %v1939_v32 }
 0xb4f   : >> { %v1938_v33 = vpop.xlane.xlu0 %1937 }
 0xb50   : >> { %v1942_v34 = vmul.f32 0.03125, %v1938_v33 }
 0xb51   : >> { %v1941_v5 = vpop.xlane.xlu1 %1940 }
 0xb52   : >> { %v1944_v35 = vadd.f32 1e-05, %v1942_v34  ;;  %v1943_v36 = vmul.f32 0.03125, %v1941_v5 }
 0xb54   : >> { %3508 = vrsqrt.f32 %v1944_v35  ;;  %v1945_v4 = vadd.f32 1e-05, %v1943_v36 }
 0xb56   : >> { %3510 = vrsqrt.f32 %v1945_v4 }
 0xb5e   : >> { %v3509_v37 = vpop.eup %3508 }
 0xb5f   : >> { %v1948_v39 = vmul.f32 %v3509_v37, %v1932_v26 }
 0xb60   : >> { %v3511_v40 = vpop.eup %3510 }
 0xb61   : >> { %v1958_v42 = vmul.f32 %v2989_v38, %v1948_v39  ;;  %v1949_v43 = vmul.f32 %v3511_v40, %v1933_v28 }
 0xb62   : > { %1325 = sbr.rel (!%p1323_p9) target bundleno = 805 (0x325), region = 221 }
 0xb63   : >> { %v4374_v5 = vadd.f32 %v2990_v41, %v1958_v42   ;;  %v1959_v45 = vmul.f32 %v2989_v38, %v1949_v43 }
 0xb65   : >> { %v4588_v44 = vmov %v4374_v5  ;;  %v4376_v4 = vadd.f32 %v2990_v41, %v1959_v45  }
 0xb66   : >> { %v4591_v5 = vmov %v4588_v44 }
 0xb67   : >> { %v4589_v46 = vmov %v4376_v4 }
 0xb68   : >> { %v4590_v4 = vmov %v4589_v46 }
 0xb69 LB: >> { %v3803_v49 = vmov 0.0   ;;  %s4407_s30 = sshll.u32 %s3784_s16, 4  ;;  %vm3804_vm6 = vmmov 0   ;;  %v2062_v51 = vld [vmem:[#allocation2] sm:$0xff]  ;;  %v2063_v52 = vld [vmem:[#allocation2 + $0x8] sm:$0xff]  ;;  %v2004_v57 = vpack.c.bf16 %v3776_v47, %v3780_v48  ;;  %s3039_s27 = sshll.u32 %s3784_s16, 5  ;;  %s3784_s16 = sphi %s4393_s16, %s1975_s16   ;;  %v3780_v48 = vphi %v4593_v48, %v4598_v48   ;;  %v3776_v47 = vphi %v4592_v47, %v4597_v47  }
 0xb6a   : >> { %3267 = vmatprep.subr.bf16.mxu1 %v3803_v49  ;;  %3259 = vmatprep.subr.bf16.mxu0 %v3803_v49  ;;  %s2733_s26 = scalar_lea.vmem %s4533_s10, %s4407_s30  ;;  %s2730_s6 = scalar_lea.vmem %s4532_s9, %s4407_s30  ;;  %v2064_v56 = vpack.c.bf16 %v2063_v52, %v2062_v51 }
 0xb6b   : >> { %3271 = vmatprep.mubr.msk.bf16.mxu1 %vm3804_vm6, %v3803_v49  ;;  %3263 = vmatprep.mubr.msk.bf16.mxu0 %vm3804_vm6, %v3803_v49  ;;  %v3512_v50 = vld [vmem:[%s2733_s26 + $0x40] sm:$0xff]   ;;  %v3513_v53 = vld [vmem:[%s2733_s26 + $0x48] sm:$0xff]   ;;  %s2736_s25 = scalar_lea.vmem %s4534_s11, %s4407_s30  ;;  %s2739_s14 = scalar_lea.vmem %s4535_s12, %s4407_s30 }
 0xb6c   : >> { %3268 = vmatpush3.bf16.msra.mxu1 %v3512_v50  ;;  %v3514_v17 = vld [vmem:[%s2730_s6 + $0x40] sm:$0xff]   ;;  %v3515_v54 = vld [vmem:[%s2730_s6 + $0x48] sm:$0xff]   ;;  %s2746_s26 = scalar_lea.vmem [#allocation6], %s4407_s30  ;;  %s4594_s4 = sld [smem:[#allocation27_spill]] }
 0xb6d   : >> { %3269 = vmatprep.subr.bf16.mxu1 %v3803_v49  ;;  %3260 = vmatpush3.bf16.msra.mxu0 %v3514_v17  ;;  %v3516_v59 = vld [vmem:[%s2736_s25 + $0x40] sm:$0xff]   ;;  %v3517_v60 = vld [vmem:[%s2736_s25 + $0x48] sm:$0xff]   ;;  %s2741_s30 = scalar_lea.vmem [#allocation8], %s3784_s16  ;;  %s2743_s25 = scalar_lea.vmem [#allocation9], %s3784_s16 }
 0xb6e   : >> { %3261 = vmatprep.subr.bf16.mxu0 %v3803_v49  ;;  %v3518_v36 = vld [vmem:[%s2739_s14 + $0x40] sm:$0xff]   ;;  %v3519_v4 = vld [vmem:[%s2739_s14 + $0x48] sm:$0xff]   ;;  %s4595_s14 = sld [smem:[#allocation26_spill]]  ;;  %s4596_s6 = sld [smem:[#allocation28_spill]] }
 0xb70   : >> { %3270 = vmatpush3.bf16.msra.mxu1 %v3513_v53 }
 0xb71   : >> { %3283 = vmatprep.subr.bf16.mxu1 %v3803_v49  ;;  %3262 = vmatpush3.bf16.msra.mxu0 %v3515_v54 }
 0xb72   : >> { %3275 = vmatprep.subr.bf16.mxu0 %v3803_v49  ;;  %s4476_s1 = scalar_lea.vmem %s4594_s4, %s3039_s27 }
 0xb73   : >> { %3272 = vmatmul.mubr.msk.bf16.vlgmr.msra.gmra.mrb[0].mxu1 %vm1316_vm3, %v2064_v56 }
 0xb74   : >> { %3285 = vmatprep.mubr.msk.bf16.mxu1 %vm3804_vm6, %v3803_v49  ;;  %3264 = vmatmul.mubr.msk.bf16.vlgmr.msra.gmra.mrb[0].mxu0 %vm1316_vm3, %v2004_v57  ;;  %s2753_s4 = scalar_lea.vmem %s4596_s6, %s3784_s16 }
 0xb75   : >> { %3279 = vmatprep.mubr.msk.bf16.mxu0 %vm3804_vm6, %v3803_v49  ;;  %3276 = vmatpush3.bf16.msra.mxu0 %v3516_v59 }
 0xb76   : >> { %3277 = vmatprep.subr.bf16.mxu0 %v3803_v49 }
 0xb79   : >> { %3278 = vmatpush3.bf16.msra.mxu0 %v3517_v60 }
 0xb7a   : >> { %3289 = vmatprep.subr.bf16.mxu0 %v3803_v49 }
 0xb7c   : >> { %3280 = vmatmul.mubr.msk.bf16.vlgmr.msra.gmra.mrb[4].mxu0 %vm1316_vm3, %v2064_v56 }
 0xb7d   : >> { %3291 = vmatprep.mubr.msk.bf16.mxu0 %vm3804_vm6, %v3803_v49 }
 0xc46   : >> { %v2114_v61 = vpop.f32.mrb[0].mxu1 }
 0xc47   : >> { %v3273_v62 = vpop.f32.mrb[1].mxu1  ;;  %v2054_v1 = vpop.f32.mrb[0].mxu0 }
 0xc48   : >> { %v2117_v63 = vpop.f32.mrb[2].mxu1  ;;  %v3265_v8 = vpop.f32.mrb[1].mxu0 }
 0xc49   : >> { %v2174_v2 = vpack.c.bf16 %v2117_v63, %v2114_v61  ;;  %v3274_v7 = vpop.f32.mrb[3].mxu1  ;;  %v2057_v9 = vpop.f32.mrb[2].mxu0 }
 0xc4a   : >> { %v2061_v11 = vpack.c.bf16 %v2057_v9, %v2054_v1  ;;  %v3266_v6 = vpop.f32.mrb[3].mxu0 }
 0xc4b   : >> { %v2179_v10 = vsel %vm1316_vm3, %v2174_v2, 0 }
 0xc4c   : >> { %3284 = vmatpush3.bf16.xpose.msra.mxu1 %v2179_v10 }
 0xc4d   : >> { %3295 = vmatprep.subr.bf16.mxu1 %v3803_v49 }
 0xc4f   : >> { %v2167_v21 = vpop.f32.mrb[4].mxu0 }
 0xc50   : >> { %v3281_v22 = vpop.f32.mrb[5].mxu0 }
 0xc51   : >> { %v2170_v23 = vpop.f32.mrb[6].mxu0 }
 0xc52   : >> { %v2254_v24 = vpack.c.bf16 %v2170_v23, %v2167_v21  ;;  %v3282_v25 = vpop.f32.mrb[7].mxu0  ;;  %v3520_v23 = vld [vmem:[%s2746_s26 + $0x40] sm:$0xff]  }
 0xc53   : >> { %3286 = vmatmul.mubr.msk.bf16.vlgmr.msra.gmra.mrb[4].mxu1 %vm1316_vm3, %v2061_v11  ;;  %v3522_v25 = vld [vmem:[%s4476_s1 + $0x80] sm:$0xff]  }
 0xc54   : >> { %3299 = vmatprep.mubr.msk.bf16.mxu1 %vm3804_vm6, %v3803_v49  ;;  %3290 = vmatpush3.bf16.msra.mxu0 %v2254_v24  ;;  %v3521_v24 = vld [vmem:[%s2746_s26 + $0x48] sm:$0xff]   ;;  %s2748_s26 = scalar_lea.vmem %s4595_s14, %s3784_s16 }
 0xc55   : >> { %3303 = vmatprep.subr.bf16.mxu0 %v3803_v49  ;;  %3296 = vmatpush3.bf16.msra.mxu1 %v3518_v36 }
 0xc56   : >> { %3297 = vmatprep.subr.bf16.mxu1 %v3803_v49 }
 0xc59   : >> { %3298 = vmatpush3.bf16.msra.mxu1 %v3519_v4 }
 0xc5a   : >> { %3311 = vmatprep.subr.bf16.mxu1 %v3803_v49 }
 0xd26   : >> { %v2215_v12 = vpop.f32.mrb[4].mxu1 }
 0xd27   : >> { %v2222_v13 = vmul.f32 0.17677669, %v2215_v12  ;;  %v3287_v14 = vpop.f32.mrb[5].mxu1 }
 0xd28   : >> { %v2218_v15 = vpop.f32.mrb[6].mxu1 }
 0xd29   : >> { %v2223_v16 = vmul.f32 0.17677669, %v2218_v15  ;;  %v3288_v18 = vpop.f32.mrb[7].mxu1  ;;  %v2225_v19 = vsel %vm1574_vm5, %v2222_v13, -inf }
 0xd2a   : >> { %2226 = vmax.xlane.f32.xlu0 %v2225_v19 }
 0xd2b   : >> { %v2228_v20 = vsel %vm1574_vm5, %v2223_v16, -inf }
 0xd2e   : >> { %2229 = vmax.xlane.f32.xlu0 %v2228_v20 }
 0xdb7   : >> { %v2227_v26 = vpop.xlane.xlu0 %2226 }
 0xdb8   : >> { %v2237_v27 = vsub.f32 %v2222_v13, %v2227_v26  ;;  %v2231_v37 = vsub.f32 -inf, %v2227_v26  ;;  %v3523_v26 = vld [vmem:[%s4476_s1 + $0x88] sm:$0xff]  }
 0xdba   : >> { %v2239_v28 = vmul.f32 1.442695, %v2237_v27  ;;  %v2233_v39 = vmul.f32 1.442695, %v2231_v37  ;;  %v3028_v37 = vld [vmem:[%s2743_s25 + $0x4] ss:$0 sm:$0xff] }
 0xdbb   : >> { %v2230_v29 = vpop.xlane.xlu0 %2229 }
 0xdbc   : >> { %v2238_v30 = vsub.f32 %v2223_v16, %v2230_v29  ;;  %3526 = vpow2.f32 %v2239_v28  ;;  %v2232_v38 = vsub.f32 -inf, %v2230_v29 }
 0xdbe   : >> { %v2241_v31 = vmul.f32 1.442695, %v2238_v30  ;;  %v2235_v40 = vmul.f32 1.442695, %v2232_v38 }
 0xdc0   : >> { %3528 = vpow2.f32 %v2241_v31 }
 0xdc1   : >> { %3530 = vpow2.f32 %v2233_v39 }
 0xdc2   : >> { %3532 = vpow2.f32 %v2235_v40 }
 0xdc6   : >> { %v3527_v32 = vpop.eup %3526 }
 0xdc7   : >> { %v2245_v33 = vsel %vm1574_vm5, %v3527_v32, 0.0 }
 0xdc8   : >> { %2246 = vadd.xlane.f32.xlu1 %v2245_v33 }
 0xdca   : >> { %v3529_v34 = vpop.eup %3528 }
 0xdcb   : >> { %v2248_v5 = vsel %vm1574_vm5, %v3529_v34, 0.0  ;;  %v2253_v35 = vpack.c.bf16 %v3529_v34, %v3527_v32  ;;  %v3531_v42 = vpop.eup %3530  ;;  %v3026_v34 = vld [vmem:[%s2741_s30 + $0x4] ss:$0 sm:$0xff]  ;;  %s2757_s30 = scalar_lea.vmem [#allocation12], %s3784_s16 }
 0xdcc   : >> { %2249 = vadd.xlane.f32.xlu1 %v2248_v5  ;;  %v3533_v43 = vpop.eup %3532  ;;  %v2243_v45 = vmul.f32 0.0, %v3531_v42  ;;  %v3524_v42 = vld [vmem:[%s4476_s1 + $0x90] sm:$0xff]  }
 0xdcd   : >> { %3292 = vmatmul.mubr.msk.bf16.vlgmr.msra.gmra.mrb[8].mxu0 %vm1574_vm5, %v2253_v35  ;;  %v2244_v52 = vmul.f32 0.0, %v3533_v43  ;;  %v3525_v43 = vld [vmem:[%s4476_s1 + $0x98] sm:$0xff]   ;;  %s2755_s1 = scalar_lea.vmem [#allocation11], %s3784_s16  ;;  %s1975_s16 = sadd.s32 1, %s3784_s16  }
 0xdce   : >> { %3307 = vmatprep.mubr.msk.bf16.mxu0 %vm3804_vm6, %v3803_v49  ;;  %3304 = vmatpush3.bf16.msra.mxu0 %v3520_v23  ;;  %p1972_p10 = scmp.ge.s32.totalorder %s1975_s16, 4  }
 0xdcf   : >> { %3305 = vmatprep.subr.bf16.mxu0 %v3803_v49  ;;  %vm2630_vm7 = vcmask (%p1972_p10), 257024  }
 0xdd2   : >> { %3306 = vmatpush3.bf16.msra.mxu0 %v3521_v24 }
 0xe55   : >> { %v2247_v41 = vpop.xlane.xlu1 %2246 }
 0xe56   : >> { %v2251_v51 = vadd.f32 %v2247_v41, %v2243_v45 }
 0xe58   : >> { %3534 = vrcp.f32 %v2251_v51 }
 0xe59   : >> { %v2250_v50 = vpop.xlane.xlu1 %2249 }
 0xe5a   : >> { %v2252_v53 = vadd.f32 %v2250_v50, %v2244_v52 }
 0xe5c   : >> { %3536 = vrcp.f32 %v2252_v53 }
 0xe62   : >> { %v3535_v57 = vpop.eup %3534 }
 0xe66   : >> { %v3537_v63 = vpop.eup %3536 }
 0xea0   : >> { %v2292_v17 = vpop.f32.mrb[8].mxu0 }
 0xea1   : >> { %v2299_v54 = vadd.f32 %v2292_v17, %v2243_v45  ;;  %v3293_v56 = vpop.f32.mrb[9].mxu0  ;;  %v3035_v45 = vld [vmem:[%s2748_s26 + $0x4] ss:$0 sm:$0xff] }
 0xea2   : >> { %v2295_v59 = vpop.f32.mrb[10].mxu0 }
 0xea3   : >> { %v2303_v60 = vmul.f32 %v3535_v57, %v2299_v54  ;;  %v2300_v61 = vadd.f32 %v2295_v59, %v2244_v52  ;;  %v3294_v62 = vpop.f32.mrb[11].mxu0 }
 0xea5   : >> { %v2304_v1 = vmul.f32 %v3537_v63, %v2300_v61 }
 0xea7   : >> { %v2305_v2 = vpack.c.bf16 %v2304_v1, %v2303_v60 }
 0xea9   : >> { %3300 = vmatmul.mubr.msk.bf16.vlgmr.msra.gmra.mrb[8].mxu1 %vm1316_vm3, %v2305_v2 }
 0xeaa   : >> { %3319 = vmatprep.mubr.msk.bf16.mxu1 %vm3804_vm6, %v3803_v49  ;;  %3312 = vmatpush3.bf16.msra.mxu1 %v3522_v25 }
 0xeab   : >> { %3313 = vmatprep.subr.bf16.mxu1 %v3803_v49 }
 0xeae   : >> { %3314 = vmatpush3.bf16.msra.mxu1 %v3523_v26  ;;  %v3056_v26 = vld [vmem:[%s2755_s1 + $0x4] ss:$0 sm:$0xff] }
 0xeaf   : >> { %3315 = vmatprep.subr.bf16.mxu1 %v3803_v49 }
 0xeb2   : >> { %3316 = vmatpush3.bf16.msra.mxu1 %v3524_v42 }
 0xeb3   : >> { %3317 = vmatprep.subr.bf16.mxu1 %v3803_v49  ;;  %v3049_v49 = vld [vmem:[%s2753_s4 + $0x4] ss:$0 sm:$0xff] }
 0xeb6   : >> { %3318 = vmatpush3.bf16.msra.mxu1 %v3525_v43 }
 0xf7c   : >> { %v2355_v7 = vpop.f32.mrb[8].mxu1 }
 0xf7d   : >> { %v2362_v8 = vadd.f32 %v3780_v48, %v2355_v7  ;;  %v3301_v9 = vpop.f32.mrb[9].mxu1 }
 0xf7e   : >> { %v2358_v10 = vpop.f32.mrb[10].mxu1 }
 0xf7f   : >> { %v2363_v11 = vadd.f32 %v3776_v47, %v2358_v10  ;;  %v3302_v6 = vpop.f32.mrb[11].mxu1  ;;  %v2364_v12 = vsel %vm1316_vm3, %v2362_v8, 0.0 }
 0xf80   : >> { %2365 = vadd.xlane.f32.xlu0 %v2364_v12 }
 0xf81   : >> { %v2367_v13 = vsel %vm1316_vm3, %v2363_v11, 0.0 }
 0xf82   : >> { %2368 = vadd.xlane.f32.xlu1 %v2367_v13 }
0x100d   : >> { %v2366_v14 = vpop.xlane.xlu0 %2365 }
0x100e   : >> { %v2371_v15 = vmul.f32 0.03125, %v2366_v14 }
0x100f   : >> { %v2369_v16 = vpop.xlane.xlu1 %2368 }
0x1010   : >> { %v2373_v18 = vsub.f32 %v2362_v8, %v2371_v15  ;;  %v2372_v19 = vmul.f32 0.03125, %v2369_v16 }
0x1012   : >> { %v2374_v20 = vsub.f32 %v2363_v11, %v2372_v19  ;;  %v2375_v48 = vmul.f32 %v2373_v18, %v2373_v18 }
0x1014   : >> { %v2377_v21 = vsel %vm1316_vm3, %v2375_v48, 0.0  ;;  %v2376_v22 = vmul.f32 %v2374_v20, %v2374_v20 }
0x1015   : >> { %2378 = vadd.xlane.f32.xlu0 %v2377_v21 }
0x1016   : >> { %v2380_v47 = vsel %vm1316_vm3, %v2376_v22, 0.0 }
0x1017   : >> { %2381 = vadd.xlane.f32.xlu1 %v2380_v47 }
0x10a2   : >> { %v2379_v27 = vpop.xlane.xlu0 %2378 }
0x10a3   : >> { %v2383_v28 = vmul.f32 0.03125, %v2379_v27 }
0x10a4   : >> { %v2382_v29 = vpop.xlane.xlu1 %2381 }
0x10a5   : >> { %v2385_v30 = vadd.f32 1e-05, %v2383_v28  ;;  %v2384_v31 = vmul.f32 0.03125, %v2382_v29  ;;  %v3058_v29 = vld [vmem:[%s2757_s30 + $0x4] ss:$0 sm:$0xff] }
0x10a7   : >> { %3538 = vrsqrt.f32 %v2385_v30  ;;  %v2386_v32 = vadd.f32 1e-05, %v2384_v31 }
0x10a9   : >> { %3540 = vrsqrt.f32 %v2386_v32 }
0x10b1   : >> { %v3539_v33 = vpop.eup %3538 }
0x10b2   : >> { %v2389_v5 = vmul.f32 %v3539_v33, %v2373_v18 }
0x10b3   : >> { %v3541_v35 = vpop.eup %3540 }
0x10b4   : >> { %v2390_v36 = vmul.f32 %v3541_v35, %v2374_v20  ;;  %v2399_v4 = vmul.f32 %v3026_v34, %v2389_v5  ;;  %v2620_v5 = vadd.f32 (%p1972_p10), %v4588_v44, %v4242_v55  ;;  %v2621_v35 = vadd.f32 (%p1972_p10), %v4589_v46, %v4246_v58 }
0x10b6   : >> { %v2400_v38 = vmul.f32 %v3026_v34, %v2390_v36  ;;  %v2409_v39 = vadd.f32 %v3028_v37, %v2399_v4 }
0x10b8   : >> { %v2410_v40 = vadd.f32 %v3028_v37, %v2400_v38  ;;  %v3075_v37 = vpack.c.bf16 (%p1972_p10), %v2620_v5, %v2620_v5  ;;  %v3076_v38 = vpack.c.bf16 (%p1972_p10), %v2621_v35, %v2621_v35 }
0x10ba   : >> { %v2411_v41 = vpack.c.bf16 %v2410_v40, %v2409_v39  ;;  %2631 = vst.msk [vmem:[%s4132_s5] sm:$0xf] (%p1972_p10), %vm2630_vm7, %v3075_v37  ;;  %2632 = vst.msk [vmem:[%s4132_s5 + $0x4] sm:$0xf] (%p1972_p10), %vm2630_vm7, %v3076_v38 }
0x10bc   : >> { %3308 = vmatmul.mubr.msk.bf16.vlgmr.msra.gmra.mrb[12].mxu0 %vm1316_vm3, %v2411_v41 }
0x118f   : >> { %v2475_v50 = vpop.f32.mrb[12].mxu0 }
0x1190   : >> { %v2476_v51 = vadd.f32 %v3035_v45, %v2475_v50  ;;  %v3309_v52 = vpop.f32.mrb[13].mxu0 }
0x1191   : >> { %v2478_v53 = vpop.f32.mrb[14].mxu0 }
0x1192   : >> { %v2479_v17 = vadd.f32 %v3035_v45, %v2478_v53  ;;  %v3310_v54 = vpop.f32.mrb[15].mxu0  ;;  %v2482_v56 = vmax.f32 %v2476_v51, 0.0 }
0x1194   : >> { %v2483_v57 = vmax.f32 %v2479_v17, 0.0 }
0x1196   : >> { %v2484_v59 = vpack.c.bf16 %v2483_v57, %v2482_v56 }
0x1198   : >> { %3320 = vmatmul.mubr.msk.bf16.vlgmr.msra.gmra.mrb[12].mxu1 %vm939_vm2, %v2484_v59 }
0x126b   : >> { %v2565_v60 = vpop.f32.mrb[12].mxu1 }
0x126c   : >> { %v2566_v61 = vadd.f32 %v3049_v49, %v2565_v60  ;;  %v3321_v62 = vpop.f32.mrb[13].mxu1 }
0x126d   : >> { %v2568_v63 = vpop.f32.mrb[14].mxu1 }
0x126e   : >> { %v2569_v1 = vadd.f32 %v3049_v49, %v2568_v63  ;;  %v3322_v2 = vpop.f32.mrb[15].mxu1  ;;  %v2572_v7 = vadd.f32 %v2566_v61, %v2409_v39 }
0x1270   : >> { %v2574_v8 = vsel %vm1316_vm3, %v2572_v7, 0.0  ;;  %v2573_v9 = vadd.f32 %v2569_v1, %v2410_v40 }
0x1271   : >> { %2575 = vadd.xlane.f32.xlu0 %v2574_v8 }
0x1272   : >> { %v2577_v10 = vsel %vm1316_vm3, %v2573_v9, 0.0 }
0x1273   : >> { %2578 = vadd.xlane.f32.xlu1 %v2577_v10 }
0x12fe   : >> { %v2576_v11 = vpop.xlane.xlu0 %2575 }
0x12ff   : >> { %v2580_v6 = vmul.f32 0.03125, %v2576_v11 }
0x1300   : >> { %v2579_v12 = vpop.xlane.xlu1 %2578 }
0x1301   : >> { %v2582_v13 = vsub.f32 %v2572_v7, %v2580_v6  ;;  %v2581_v14 = vmul.f32 0.03125, %v2579_v12 }
0x1303   : >> { %v2583_v15 = vsub.f32 %v2573_v9, %v2581_v14  ;;  %v2584_v16 = vmul.f32 %v2582_v13, %v2582_v13 }
0x1305   : >> { %v2586_v18 = vsel %vm1316_vm3, %v2584_v16, 0.0  ;;  %v2585_v19 = vmul.f32 %v2583_v15, %v2583_v15 }
0x1306   : >> { %2587 = vadd.xlane.f32.xlu0 %v2586_v18 }
0x1307   : >> { %v2589_v20 = vsel %vm1316_vm3, %v2585_v19, 0.0 }
0x1308   : >> { %2590 = vadd.xlane.f32.xlu1 %v2589_v20 }
0x1393   : >> { %v2588_v48 = vpop.xlane.xlu0 %2587 }
0x1394   : >> { %v2592_v21 = vmul.f32 0.03125, %v2588_v48 }
0x1395   : >> { %v2591_v22 = vpop.xlane.xlu1 %2590 }
0x1396   : >> { %v2594_v47 = vadd.f32 1e-05, %v2592_v21  ;;  %v2593_v23 = vmul.f32 0.03125, %v2591_v22 }
0x1398   : >> { %3542 = vrsqrt.f32 %v2594_v47  ;;  %v2595_v24 = vadd.f32 1e-05, %v2593_v23 }
0x139a   : >> { %3544 = vrsqrt.f32 %v2595_v24 }
0x13a2   : >> { %v3543_v25 = vpop.eup %3542 }
0x13a3   : >> { %v2598_v27 = vmul.f32 %v3543_v25, %v2582_v13 }
0x13a4   : >> { %v3545_v28 = vpop.eup %3544 }
0x13a5   : >> { %v2608_v30 = vmul.f32 %v3056_v26, %v2598_v27  ;;  %v2599_v31 = vmul.f32 %v3545_v28, %v2583_v15  ;;  %1974 = sbr.rel (!%p1972_p10) target bundleno = 2921 (0xb69), region = 232 }
0x13a7   : >> { %v2618_v32 = vadd.f32 %v3058_v29, %v2608_v30   ;;  %v2609_v33 = vmul.f32 %v3056_v26, %v2599_v31 }
0x13a9   : >> { %v2619_v34 = vadd.f32 %v3058_v29, %v2609_v33   ;;  %v4598_v48 = vmov %v2618_v32  ;;  %v2633_v36 = vadd.f32 (%p1972_p10), %v2618_v32, %v4250_v0 }
0x13ab   : >> { %v4597_v47 = vmov %v2619_v34  ;;  %v2634_v4 = vadd.f32 (%p1972_p10), %v2619_v34, %v4254_v3  ;;  %v3077_v39 = vpack.c.bf16 (%p1972_p10), %v2633_v36, %v2633_v36 }
0x13ad   : > { %v3078_v40 = vpack.c.bf16 %v2634_v4, %v2634_v4  ;;  %2643 = vst.msk [vmem:[%s4137_s29] sm:$0xf] %vm2630_vm7, %v3077_v39 }
0x13af   : > { %2644 = vst.msk [vmem:[%s4137_s29 + $0x4] sm:$0xf] %vm2630_vm7, %v3078_v40 }
0x13b0 PF: > { %s4599_s16 = sld [smem:[#allocation18_spill]] }
0x13b6   : > { %s37_s3 = sadd.s32 1, %s4599_s16  }
0x13b7   : > { %p34_p11 = scmp.ge.s32.totalorder %s37_s3, 4  }
0x13b9   :  { %36 = sbr.rel (!%p34_p11) target bundleno = 15 (0xf), region = 243 }
0x13c0   :  { %2682 = vsyncpa [#allocation5], 1 }
0x13c1   :  { %2684 = vsyncpa [#allocation5 + $0x1], 1 }
0x13c2   :  { %2685 = vsyncpa [#allocation7], 1 }
0x13c3   :  { %2686 = vsyncpa [#allocation10], 1 }
0x13c4   :  { %2687 = vsyncpa [#allocation13], 1 }

</bundles_post_ra>
